<compile_context>
chip_gen: v7x
topology: tpu7x:2x2x1
jax: 0.10.0
libtpu: 0.0.40
codegen_flags: <defaults>
</compile_context>

<pallas_src>
import math
import jax
import jax.numpy as jnp
from jax.experimental import pallas as pl
from jax.experimental.pallas import tpu as pltpu


# ----------------------------- kernel ---------------------------------------


def _layernorm(x, gamma, beta, eps=1e-5):
    mu = jnp.mean(x, axis=-1, keepdims=True)
    var = jnp.mean((x - mu) ** 2, axis=-1, keepdims=True)
    return (x - mu) * jax.lax.rsqrt(var + eps) * gamma + beta


def _make_kernel(embed_dim, num_heads, num_layers, bblk, seq_len):
    E = embed_dim
    H = num_heads
    hd = E // H
    scale = 1.0 / math.sqrt(hd)
    R = bblk * seq_len          # rows in the activation slab
    bf16 = jnp.bfloat16
    f32 = jnp.float32

    def kernel(x_ref,
               win_ref, bin_ref, wout_ref, bout_ref, g1_ref, be1_ref,
               w1_ref, b1_ref, w2_ref, b2_ref, g2_ref, be2_ref,
               wo1_ref, bo1_ref, wo2_ref, bo2_ref,
               out_ref):
        # (R, E) slab: bblk batch elements x seq_len picks (input projections
        # are pre-fused in the wrapper).
        x = x_ref[...]
        xb = x.astype(bf16)                      # hoisted bf16 activation cast

        for l in range(num_layers):
            # ---- multi-head self-attention (all heads fused) ----
            qkv = jnp.dot(xb, win_ref[l], preferred_element_type=f32) + bin_ref[l]

            def split_heads(mat):                # (R, E) -> (bblk*H, N, hd)
                return jnp.concatenate(
                    [mat[:, h * hd:(h + 1) * hd].reshape(bblk, seq_len, hd)
                     for h in range(H)], axis=0)

            qz = split_heads(qkv[:, 0 * E:1 * E] * scale).astype(bf16)
            kz = split_heads(qkv[:, 1 * E:2 * E]).astype(bf16)
            vz = split_heads(qkv[:, 2 * E:3 * E]).astype(bf16)

            # one head-batched score einsum + one softmax + one P@V einsum
            s = jnp.einsum("znd,zmd->znm", qz, kz, preferred_element_type=f32)
            s = s - jnp.max(s, axis=-1, keepdims=True)
            p = jnp.exp(s)
            p = p * pl.reciprocal(
                jnp.sum(p, axis=-1, keepdims=True), approx=True)
            o = jnp.einsum("znm,zmd->znd", p.astype(bf16), vz,
                           preferred_element_type=f32)      # (bblk*H, N, hd)

            # merge heads back to (R, E); single (R,E)@(E,E) output projection
            merged = jnp.concatenate(
                [o[h * bblk:(h + 1) * bblk] for h in range(H)], axis=-1)
            attn = jnp.dot(merged.reshape(R, E).astype(bf16), wout_ref[l],
                           preferred_element_type=f32) + bout_ref[l]

            x = _layernorm(x + attn, g1_ref[l], be1_ref[l])
            xb = x.astype(bf16)

            # ---- feed-forward (ReLU) ----
            ff = jnp.dot(xb, w1_ref[l], preferred_element_type=f32) + b1_ref[l]
            ff = jnp.maximum(ff, 0.0)
            ff = jnp.dot(ff.astype(bf16), w2_ref[l],
                         preferred_element_type=f32) + b2_ref[l]
            x = _layernorm(x + ff, g2_ref[l], be2_ref[l])
            xb = x.astype(bf16)

        # ---- output head: Linear(E,64) -> ReLU -> Linear(64, out_pad) ----
        h1 = jnp.dot(xb, wo1_ref[...], preferred_element_type=f32) + bo1_ref[...]
        h1 = jnp.maximum(h1, 0.0)
        y = jnp.dot(h1.astype(bf16), wo2_ref[...],
                    preferred_element_type=f32) + bo2_ref[...]

        # F.normalize(p=2, dim=-1, eps=1e-12). Padded output columns are zero,
        # so the norm over the padded lane width equals the norm over out_dim.
        ssq = jnp.sum(y * y, axis=-1, keepdims=True)
        out_ref[...] = y * jax.lax.rsqrt(jnp.maximum(ssq, 1e-24))

    return kernel


# ----------------------------- wrapper ---------------------------------------


def sinusoidal_pe(seq_len, embed_dim):
    pos = jnp.arange(seq_len, dtype=jnp.float32)[:, None]
    div = jnp.exp(jnp.arange(0, embed_dim, 2, dtype=jnp.float32)
                  * -(math.log(10000.0) / embed_dim))
    pe = jnp.zeros((seq_len, embed_dim), jnp.float32)
    pe = pe.at[:, 0::2].set(jnp.sin(pos * div))
    pe = pe.at[:, 1::2].set(jnp.cos(pos * div))
    return pe[None]  # (1, seq_len, embed_dim)


def _choose_bblk(B, N, target_rows=1024):
    """Pick batch-block so the slab is big (>=target_rows rows) but the grid
    keeps >= 2 steps when B allows (v7x megacore), with rows % 8 == 0."""
    bblk = max(1, min(B, target_rows // max(N, 1)))
    if B >= 2:
        bblk = min(bblk, -(-B // 2))          # keep at least two grid steps
    # row block must be sublane-aligned whenever there is more than one block
    while bblk < B and (bblk * N) % 8 != 0:
        bblk += 1
    return bblk


def phase_pick_transformer(pick_features, station_ids, params,
                           embed_dim, num_heads, num_layers):
    B, N, _ = pick_features.shape
    E = embed_dim
    f32 = jnp.float32
    bf16 = jnp.bfloat16

    # ---- tiny K=3 input projections: fused by XLA outside the kernel ----
    feats = pick_features[:, :, 3:6].astype(f32)
    coords = pick_features[:, :, 0:3].astype(f32)
    x0 = feats @ params["wf"] + params["bf"]
    c = jnp.maximum(coords @ params["wc1"] + params["bc1"], 0.0)
    x0 = x0 + c @ params["wc2"] + params["bc2"]
    x0 = x0 + params["station_embedding"][station_ids]   # embedding gather glue
    x0 = (x0 + sinusoidal_pe(N, E)).astype(f32)

    # ---- batch blocking ----
    bblk = _choose_bblk(B, N, target_rows=1024)
    nblk = -(-B // bblk)
    bpad = nblk * bblk
    if bpad != B:
        x0 = jnp.pad(x0, ((0, bpad - B), (0, 0), (0, 0)))
    rows = bblk * N
    assert rows % 8 == 0 or nblk == 1, (rows, nblk)      # (8,128) BlockSpec rule
    x_flat = x0.reshape(bpad * N, E)

    # ---- stacked per-layer weights; bf16 MXU operands, f32 bias/LN params ----
    lp = params["layers"]

    def stack(name, dtype):
        return jnp.stack([layer[name] for layer in lp]).astype(dtype)

    win = stack("win", bf16)      # (L, E, 3E)
    binp = stack("bin", f32)      # (L, 1, 3E)
    wout = stack("wout", bf16)    # (L, E, E)
    bout = stack("bout", f32)     # (L, 1, E)
    g1 = stack("g1", f32)
    be1 = stack("be1", f32)
    w1 = stack("w1", bf16)        # (L, E, F)
    b1 = stack("b1", f32)
    w2 = stack("w2", bf16)        # (L, F, E)
    b2 = stack("b2", f32)
    g2 = stack("g2", f32)
    be2 = stack("be2", f32)
    ffn_dim = w1.shape[-1]

    # ---- output head, zero-padded to a lane-dense (multiple-of-128) width ----
    out_dim = params["wo2"].shape[1]
    out_pad = -(-out_dim // 128) * 128
    wo1 = params["wo1"].astype(bf16)
    bo1 = params["bo1"].astype(f32)
    wo2 = jnp.pad(params["wo2"], ((0, 0), (0, out_pad - out_dim))).astype(bf16)
    bo2 = jnp.pad(params["bo2"], ((0, 0), (0, out_pad - out_dim))).astype(f32)

    inputs = [x_flat,
              win, binp, wout, bout, g1, be1,
              w1, b1, w2, b2, g2, be2,
              wo1, bo1, wo2, bo2]

    # ---- VMEM budget: per-row intermediates x2 headroom, capped at 64 MiB ----
    f32b = 4
    per_row = (2 * E * f32b                       # x block (x2 buffers)
               + 2 * out_pad * f32b               # out block (x2 buffers)
               + 3 * E * f32b                     # qkv activations
               + 6 * num_heads * 128 * f32b       # head-split q/k/v/s/p/o (lane pad)
               + ffn_dim * f32b                   # FFN hidden
               + 4 * E * f32b)                    # residual / attn temporaries
    weight_bytes = 2 * sum(int(a.size) * a.dtype.itemsize for a in inputs[1:])
    vmem_limit = int(min(64 << 20,
                         max(32 << 20, 2 * (rows * per_row + weight_bytes))))

    out_shape = jax.ShapeDtypeStruct((bpad * N, out_pad), f32)
    out_spec = pl.BlockSpec((rows, out_pad), lambda b: (b, 0))
    kernel = _make_kernel(E, num_heads, num_layers, bblk, N)

    def const_spec(a, single_buffer):
        idx = lambda b, _nd=a.ndim: (0,) * _nd
        if single_buffer:
            # weights never change across grid steps -> single-buffer them
            return pl.BlockSpec(a.shape, idx, pipeline_mode=pl.Buffered(1))
        return pl.BlockSpec(a.shape, idx)

    def build_and_call(single_buffer):
        in_specs = [pl.BlockSpec((rows, E), lambda b: (b, 0))]
        in_specs += [const_spec(a, single_buffer) for a in inputs[1:]]
        return pl.pallas_call(
            kernel,
            out_shape=out_shape,
            grid_spec=pltpu.PrefetchScalarGridSpec(
                num_scalar_prefetch=0,
                grid=(nblk,),
                in_specs=in_specs,
                out_specs=out_spec),
            compiler_params=pltpu.CompilerParams(
                dimension_semantics=("parallel",),
                vmem_limit_bytes=vmem_limit),
        )(*inputs)

    try:
        out = build_and_call(True)
    except Exception:
        # Fall back to default double-buffered weight blocks if this Pallas
        # build rejects pipeline_mode=pl.Buffered(1).
        out = build_and_call(False)

    return out.reshape(bpad, N, out_pad)[:B, :, :out_dim]


# ----------------------------- params ----------------------------------------


def init_params(key, num_stations, embed_dim, num_layers, output_dim,
                ffn_dim=256, coord_hidden=32, out_hidden=64):
    keys = iter(jax.random.split(key, 128))

    def w(shape, s=0.05):
        return (s * jax.random.normal(next(keys), shape)).astype(jnp.float32)

    params = {
        # feature_proj: Linear(3, E)     (weights stored as (in, out))
        "wf": w((3, embed_dim)), "bf": w((1, embed_dim)),
        # coord_proj: Linear(3,32) -> ReLU -> Linear(32,E)
        "wc1": w((3, coord_hidden)), "bc1": w((1, coord_hidden)),
        "wc2": w((coord_hidden, embed_dim)), "bc2": w((1, embed_dim)),
        # station embedding table
        "station_embedding": w((num_stations, embed_dim)),
        # output_proj: Linear(E,64) -> ReLU -> Linear(64,out_dim)
        "wo1": w((embed_dim, out_hidden)), "bo1": w((1, out_hidden)),
        "wo2": w((out_hidden, output_dim)), "bo2": w((1, output_dim)),
        "layers": [],
    }
    for _ in range(num_layers):
        params["layers"].append({
            "win": w((embed_dim, 3 * embed_dim)),
            "bin": w((1, 3 * embed_dim)),
            "wout": w((embed_dim, embed_dim)),
            "bout": w((1, embed_dim)),
            "g1": jnp.ones((1, embed_dim), jnp.float32),
            "be1": jnp.zeros((1, embed_dim), jnp.float32),
            "w1": w((embed_dim, ffn_dim)), "b1": w((1, ffn_dim)),
            "w2": w((ffn_dim, embed_dim)), "b2": w((1, embed_dim)),
            "g2": jnp.ones((1, embed_dim), jnp.float32),
            "be2": jnp.zeros((1, embed_dim), jnp.float32),
        })
    return params


# ------------------------------ main ------------------------------------------


if __name__ == "__main__":
    B, N = 2, 8                 # batch, number of picks (sequence length)
    input_dim = 6               # input_dim - 3 == 3 feature columns
    num_stations = 10
    embed_dim = 32
    num_heads = 4
    num_layers = 2
    output_dim = 16

    key = jax.random.PRNGKey(0)
    kx, kid, kp = jax.random.split(key, 3)
    pick_features = jax.random.normal(kx, (B, N, input_dim), dtype=jnp.float32)
    station_ids = jax.random.randint(kid, (B, N), 0, num_stations)
    params = init_params(kp, num_stations, embed_dim, num_layers, output_dim)

    out = phase_pick_transformer(pick_features, station_ids, params,
                                 embed_dim, num_heads, num_layers)
    out = jax.block_until_ready(out)

    assert out.shape == (B, N, output_dim), out.shape
    assert bool(jnp.all(jnp.isfinite(out)))
    # rows are L2-normalized (loose tolerance: bf16 MXU operands + EUP rsqrt)
    assert bool(jnp.allclose(jnp.linalg.norm(out, axis=-1), 1.0, atol=1e-2))
    print("KERNEL_OK")
</pallas_src>

<mosaic_0001>
module attributes {stable_mosaic.version = 11 : i64} {
  func.func @kernel(%arg0: i32, %arg1: memref<8x32xf32, #tpu.memory_space<vmem>>, %arg2: memref<2x32x96xbf16, #tpu.memory_space<vmem>>, %arg3: memref<2x1x96xf32, #tpu.memory_space<vmem>>, %arg4: memref<2x32x32xbf16, #tpu.memory_space<vmem>>, %arg5: memref<2x1x32xf32, #tpu.memory_space<vmem>>, %arg6: memref<2x1x32xf32, #tpu.memory_space<vmem>>, %arg7: memref<2x1x32xf32, #tpu.memory_space<vmem>>, %arg8: memref<2x32x256xbf16, #tpu.memory_space<vmem>>, %arg9: memref<2x1x256xf32, #tpu.memory_space<vmem>>, %arg10: memref<2x256x32xbf16, #tpu.memory_space<vmem>>, %arg11: memref<2x1x32xf32, #tpu.memory_space<vmem>>, %arg12: memref<2x1x32xf32, #tpu.memory_space<vmem>>, %arg13: memref<2x1x32xf32, #tpu.memory_space<vmem>>, %arg14: memref<32x64xbf16, #tpu.memory_space<vmem>>, %arg15: memref<1x64xf32, #tpu.memory_space<vmem>>, %arg16: memref<64x128xbf16, #tpu.memory_space<vmem>>, %arg17: memref<1x128xf32, #tpu.memory_space<vmem>>, %arg18: memref<8x128xf32, #tpu.memory_space<vmem>>) attributes {dimension_semantics = [#tpu.dimension_semantics<parallel>], iteration_bounds = array<i64: 2>, scalar_prefetch = 0 : i64, scratch_operands = 0 : i64, tpu.core_type = #tpu.core_type<tc>, window_params = [{transform_indices = @transform_0, window_bounds = array<i64: 8, 32>}, {pipeline_mode = #tpu.pipeline_mode<synchronous>, transform_indices = @transform_1, window_bounds = array<i64: 2, 32, 96>}, {pipeline_mode = #tpu.pipeline_mode<synchronous>, transform_indices = @transform_2, window_bounds = array<i64: 2, 1, 96>}, {pipeline_mode = #tpu.pipeline_mode<synchronous>, transform_indices = @transform_3, window_bounds = array<i64: 2, 32, 32>}, {pipeline_mode = #tpu.pipeline_mode<synchronous>, transform_indices = @transform_4, window_bounds = array<i64: 2, 1, 32>}, {pipeline_mode = #tpu.pipeline_mode<synchronous>, transform_indices = @transform_5, window_bounds = array<i64: 2, 1, 32>}, {pipeline_mode = #tpu.pipeline_mode<synchronous>, transform_indices = @transform_6, window_bounds = array<i64: 2, 1, 32>}, {pipeline_mode = #tpu.pipeline_mode<synchronous>, transform_indices = @transform_7, window_bounds = array<i64: 2, 32, 256>}, {pipeline_mode = #tpu.pipeline_mode<synchronous>, transform_indices = @transform_8, window_bounds = array<i64: 2, 1, 256>}, {pipeline_mode = #tpu.pipeline_mode<synchronous>, transform_indices = @transform_9, window_bounds = array<i64: 2, 256, 32>}, {pipeline_mode = #tpu.pipeline_mode<synchronous>, transform_indices = @transform_10, window_bounds = array<i64: 2, 1, 32>}, {pipeline_mode = #tpu.pipeline_mode<synchronous>, transform_indices = @transform_11, window_bounds = array<i64: 2, 1, 32>}, {pipeline_mode = #tpu.pipeline_mode<synchronous>, transform_indices = @transform_12, window_bounds = array<i64: 2, 1, 32>}, {pipeline_mode = #tpu.pipeline_mode<synchronous>, transform_indices = @transform_13, window_bounds = array<i64: 32, 64>}, {pipeline_mode = #tpu.pipeline_mode<synchronous>, transform_indices = @transform_14, window_bounds = array<i64: 1, 64>}, {pipeline_mode = #tpu.pipeline_mode<synchronous>, transform_indices = @transform_15, window_bounds = array<i64: 64, 128>}, {pipeline_mode = #tpu.pipeline_mode<synchronous>, transform_indices = @transform_16, window_bounds = array<i64: 1, 128>}, {transform_indices = @transform_17, window_bounds = array<i64: 8, 128>}]} {
    %c0 = arith.constant 0 : index
    %c0_0 = arith.constant 0 : index
    %0 = vector.load %arg1[%c0, %c0_0] : memref<8x32xf32, #tpu.memory_space<vmem>>, vector<8x32xf32>
    %1 = arith.truncf %0 : vector<8x32xf32> to vector<8x32xbf16>
    %c0_1 = arith.constant 0 : index
    %c0_2 = arith.constant 0 : index
    %c0_3 = arith.constant 0 : index
    %2 = vector.load %arg2[%c0_1, %c0_2, %c0_3] : memref<2x32x96xbf16, #tpu.memory_space<vmem>>, vector<1x32x96xbf16>
    %3 = vector.shape_cast %2 : vector<1x32x96xbf16> to vector<32x96xbf16>
    %cst = arith.constant dense<0.000000e+00> : vector<8x96xf32>
    %4 = tpu.matmul %1, %3, %cst {dimension_numbers = #tpu.dot_dimension_numbers<[1], [0], [0], [1], [0, 0, 1, 1], [], []>} : vector<8x32xbf16>, vector<32x96xbf16>, vector<8x96xf32> -> vector<8x96xf32>
    %c0_4 = arith.constant 0 : index
    %c0_5 = arith.constant 0 : index
    %c0_6 = arith.constant 0 : index
    %5 = vector.load %arg3[%c0_4, %c0_5, %c0_6] : memref<2x1x96xf32, #tpu.memory_space<vmem>>, vector<1x1x96xf32>
    %6 = vector.shape_cast %5 : vector<1x1x96xf32> to vector<1x96xf32>
    %7 = vector.broadcast %6 : vector<1x96xf32> to vector<8x96xf32>
    %8 = arith.addf %4, %7 : vector<8x96xf32>
    %9 = vector.extract_strided_slice %8 {offsets = [0, 0], sizes = [8, 32], strides = [1, 1]} : vector<8x96xf32> to vector<8x32xf32>
    %cst_7 = arith.constant 0.353553385 : f32
    %10 = vector.broadcast %cst_7 : f32 to vector<8x32xf32>
    %11 = arith.mulf %9, %10 : vector<8x32xf32>
    %12 = vector.extract_strided_slice %11 {offsets = [0, 0], sizes = [8, 8], strides = [1, 1]} : vector<8x32xf32> to vector<8x8xf32>
    %13 = vector.shape_cast %12 : vector<8x8xf32> to vector<1x8x8xf32>
    %14 = vector.extract_strided_slice %11 {offsets = [0, 8], sizes = [8, 8], strides = [1, 1]} : vector<8x32xf32> to vector<8x8xf32>
    %15 = vector.shape_cast %14 : vector<8x8xf32> to vector<1x8x8xf32>
    %16 = vector.extract_strided_slice %11 {offsets = [0, 16], sizes = [8, 8], strides = [1, 1]} : vector<8x32xf32> to vector<8x8xf32>
    %17 = vector.shape_cast %16 : vector<8x8xf32> to vector<1x8x8xf32>
    %18 = vector.extract_strided_slice %11 {offsets = [0, 24], sizes = [8, 8], strides = [1, 1]} : vector<8x32xf32> to vector<8x8xf32>
    %19 = vector.shape_cast %18 : vector<8x8xf32> to vector<1x8x8xf32>
    %20 = tpu.concatenate %13, %15, %17, %19 in 0 : vector<1x8x8xf32>, vector<1x8x8xf32>, vector<1x8x8xf32>, vector<1x8x8xf32> -> vector<4x8x8xf32>
    %21 = arith.truncf %20 : vector<4x8x8xf32> to vector<4x8x8xbf16>
    %22 = vector.extract_strided_slice %8 {offsets = [0, 32], sizes = [8, 32], strides = [1, 1]} : vector<8x96xf32> to vector<8x32xf32>
    %23 = vector.extract_strided_slice %22 {offsets = [0, 0], sizes = [8, 8], strides = [1, 1]} : vector<8x32xf32> to vector<8x8xf32>
    %24 = vector.shape_cast %23 : vector<8x8xf32> to vector<1x8x8xf32>
    %25 = vector.extract_strided_slice %22 {offsets = [0, 8], sizes = [8, 8], strides = [1, 1]} : vector<8x32xf32> to vector<8x8xf32>
    %26 = vector.shape_cast %25 : vector<8x8xf32> to vector<1x8x8xf32>
    %27 = vector.extract_strided_slice %22 {offsets = [0, 16], sizes = [8, 8], strides = [1, 1]} : vector<8x32xf32> to vector<8x8xf32>
    %28 = vector.shape_cast %27 : vector<8x8xf32> to vector<1x8x8xf32>
    %29 = vector.extract_strided_slice %22 {offsets = [0, 24], sizes = [8, 8], strides = [1, 1]} : vector<8x32xf32> to vector<8x8xf32>
    %30 = vector.shape_cast %29 : vector<8x8xf32> to vector<1x8x8xf32>
    %31 = tpu.concatenate %24, %26, %28, %30 in 0 : vector<1x8x8xf32>, vector<1x8x8xf32>, vector<1x8x8xf32>, vector<1x8x8xf32> -> vector<4x8x8xf32>
    %32 = arith.truncf %31 : vector<4x8x8xf32> to vector<4x8x8xbf16>
    %33 = vector.extract_strided_slice %8 {offsets = [0, 64], sizes = [8, 32], strides = [1, 1]} : vector<8x96xf32> to vector<8x32xf32>
    %34 = vector.extract_strided_slice %33 {offsets = [0, 0], sizes = [8, 8], strides = [1, 1]} : vector<8x32xf32> to vector<8x8xf32>
    %35 = vector.shape_cast %34 : vector<8x8xf32> to vector<1x8x8xf32>
    %36 = vector.extract_strided_slice %33 {offsets = [0, 8], sizes = [8, 8], strides = [1, 1]} : vector<8x32xf32> to vector<8x8xf32>
    %37 = vector.shape_cast %36 : vector<8x8xf32> to vector<1x8x8xf32>
    %38 = vector.extract_strided_slice %33 {offsets = [0, 16], sizes = [8, 8], strides = [1, 1]} : vector<8x32xf32> to vector<8x8xf32>
    %39 = vector.shape_cast %38 : vector<8x8xf32> to vector<1x8x8xf32>
    %40 = vector.extract_strided_slice %33 {offsets = [0, 24], sizes = [8, 8], strides = [1, 1]} : vector<8x32xf32> to vector<8x8xf32>
    %41 = vector.shape_cast %40 : vector<8x8xf32> to vector<1x8x8xf32>
    %42 = tpu.concatenate %35, %37, %39, %41 in 0 : vector<1x8x8xf32>, vector<1x8x8xf32>, vector<1x8x8xf32>, vector<1x8x8xf32> -> vector<4x8x8xf32>
    %43 = arith.truncf %42 : vector<4x8x8xf32> to vector<4x8x8xbf16>
    "tpu.trace_start"() <{level = 10 : i32, message = "znd,zmd->znm"}> : () -> ()
    %cst_8 = arith.constant dense<0.000000e+00> : vector<4x8x8xf32>
    %44 = tpu.matmul %21, %32, %cst_8 {dimension_numbers = #tpu.dot_dimension_numbers<[2], [2], [1], [1], [0, 0, 0, 1, 1, 1], [0], [0]>} : vector<4x8x8xbf16>, vector<4x8x8xbf16>, vector<4x8x8xf32> -> vector<4x8x8xf32>
    "tpu.trace_stop"() : () -> ()
    %cst_9 = arith.constant dense<0xFF800000> : vector<4x8xf32>
    %45 = vector.multi_reduction <maximumf>, %44, %cst_9 [2] : vector<4x8x8xf32> to vector<4x8xf32>
    %46 = vector.shape_cast %45 : vector<4x8xf32> to vector<4x8x1xf32>
    %47 = vector.broadcast %46 : vector<4x8x1xf32> to vector<4x8x8xf32>
    %48 = arith.subf %44, %47 : vector<4x8x8xf32>
    %49 = math.exp %48 : vector<4x8x8xf32>
    %cst_10 = arith.constant dense<0.000000e+00> : vector<4x8xf32>
    %50 = vector.multi_reduction <add>, %49, %cst_10 [2] : vector<4x8x8xf32> to vector<4x8xf32>
    %51 = vector.shape_cast %50 : vector<4x8xf32> to vector<4x8x1xf32>
    %52 = tpu.reciprocal %51 {approx = true} : vector<4x8x1xf32> -> vector<4x8x1xf32>
    %53 = vector.broadcast %52 : vector<4x8x1xf32> to vector<4x8x8xf32>
    %54 = arith.mulf %49, %53 : vector<4x8x8xf32>
    %55 = arith.truncf %54 : vector<4x8x8xf32> to vector<4x8x8xbf16>
    "tpu.trace_start"() <{level = 10 : i32, message = "znm,zmd->znd"}> : () -> ()
    %cst_11 = arith.constant dense<0.000000e+00> : vector<4x8x8xf32>
    %56 = tpu.matmul %55, %43, %cst_11 {dimension_numbers = #tpu.dot_dimension_numbers<[2], [1], [1], [2], [0, 0, 0, 1, 1, 2], [0], [0]>} : vector<4x8x8xbf16>, vector<4x8x8xbf16>, vector<4x8x8xf32> -> vector<4x8x8xf32>
    "tpu.trace_stop"() : () -> ()
    %57 = vector.extract_strided_slice %56 {offsets = [0, 0, 0], sizes = [1, 8, 8], strides = [1, 1, 1]} : vector<4x8x8xf32> to vector<1x8x8xf32>
    %58 = vector.extract_strided_slice %56 {offsets = [1, 0, 0], sizes = [1, 8, 8], strides = [1, 1, 1]} : vector<4x8x8xf32> to vector<1x8x8xf32>
    %59 = vector.extract_strided_slice %56 {offsets = [2, 0, 0], sizes = [1, 8, 8], strides = [1, 1, 1]} : vector<4x8x8xf32> to vector<1x8x8xf32>
    %60 = vector.extract_strided_slice %56 {offsets = [3, 0, 0], sizes = [1, 8, 8], strides = [1, 1, 1]} : vector<4x8x8xf32> to vector<1x8x8xf32>
    %61 = tpu.concatenate %57, %58, %59, %60 in 2 : vector<1x8x8xf32>, vector<1x8x8xf32>, vector<1x8x8xf32>, vector<1x8x8xf32> -> vector<1x8x32xf32>
    %62 = vector.shape_cast %61 : vector<1x8x32xf32> to vector<8x32xf32>
    %63 = arith.truncf %62 : vector<8x32xf32> to vector<8x32xbf16>
    %c0_12 = arith.constant 0 : index
    %c0_13 = arith.constant 0 : index
    %c0_14 = arith.constant 0 : index
    %64 = vector.load %arg4[%c0_12, %c0_13, %c0_14] : memref<2x32x32xbf16, #tpu.memory_space<vmem>>, vector<1x32x32xbf16>
    %65 = vector.shape_cast %64 : vector<1x32x32xbf16> to vector<32x32xbf16>
    %cst_15 = arith.constant dense<0.000000e+00> : vector<8x32xf32>
    %66 = tpu.matmul %63, %65, %cst_15 {dimension_numbers = #tpu.dot_dimension_numbers<[1], [0], [0], [1], [0, 0, 1, 1], [], []>} : vector<8x32xbf16>, vector<32x32xbf16>, vector<8x32xf32> -> vector<8x32xf32>
    %c0_16 = arith.constant 0 : index
    %c0_17 = arith.constant 0 : index
    %c0_18 = arith.constant 0 : index
    %67 = vector.load %arg5[%c0_16, %c0_17, %c0_18] : memref<2x1x32xf32, #tpu.memory_space<vmem>>, vector<1x1x32xf32>
    %68 = vector.shape_cast %67 : vector<1x1x32xf32> to vector<1x32xf32>
    %69 = vector.broadcast %68 : vector<1x32xf32> to vector<8x32xf32>
    %70 = arith.addf %66, %69 : vector<8x32xf32>
    %71 = arith.addf %0, %70 : vector<8x32xf32>
    %c0_19 = arith.constant 0 : index
    %c0_20 = arith.constant 0 : index
    %c0_21 = arith.constant 0 : index
    %72 = vector.load %arg6[%c0_19, %c0_20, %c0_21] : memref<2x1x32xf32, #tpu.memory_space<vmem>>, vector<1x1x32xf32>
    %73 = vector.shape_cast %72 : vector<1x1x32xf32> to vector<1x32xf32>
    %c0_22 = arith.constant 0 : index
    %c0_23 = arith.constant 0 : index
    %c0_24 = arith.constant 0 : index
    %74 = vector.load %arg7[%c0_22, %c0_23, %c0_24] : memref<2x1x32xf32, #tpu.memory_space<vmem>>, vector<1x1x32xf32>
    %75 = vector.shape_cast %74 : vector<1x1x32xf32> to vector<1x32xf32>
    %cst_25 = arith.constant dense<0.000000e+00> : vector<8xf32>
    %76 = vector.multi_reduction <add>, %71, %cst_25 [1] : vector<8x32xf32> to vector<8xf32>
    %77 = vector.shape_cast %76 : vector<8xf32> to vector<8x1xf32>
    %cst_26 = arith.constant 3.200000e+01 : f32
    %78 = vector.broadcast %cst_26 : f32 to vector<8x1xf32>
    %79 = arith.divf %77, %78 : vector<8x1xf32>
    %80 = vector.broadcast %79 : vector<8x1xf32> to vector<8x32xf32>
    %81 = arith.subf %71, %80 : vector<8x32xf32>
    %82 = arith.mulf %81, %81 : vector<8x32xf32>
    %cst_27 = arith.constant dense<0.000000e+00> : vector<8xf32>
    %83 = vector.multi_reduction <add>, %82, %cst_27 [1] : vector<8x32xf32> to vector<8xf32>
    %84 = vector.shape_cast %83 : vector<8xf32> to vector<8x1xf32>
    %cst_28 = arith.constant 3.200000e+01 : f32
    %85 = vector.broadcast %cst_28 : f32 to vector<8x1xf32>
    %86 = arith.divf %84, %85 : vector<8x1xf32>
    %87 = vector.broadcast %79 : vector<8x1xf32> to vector<8x32xf32>
    %88 = arith.subf %71, %87 : vector<8x32xf32>
    %cst_29 = arith.constant 9.99999974E-6 : f32
    %89 = vector.broadcast %cst_29 : f32 to vector<8x1xf32>
    %90 = arith.addf %86, %89 : vector<8x1xf32>
    %91 = math.rsqrt %90 : vector<8x1xf32>
    %92 = vector.broadcast %91 : vector<8x1xf32> to vector<8x32xf32>
    %93 = arith.mulf %88, %92 : vector<8x32xf32>
    %94 = vector.broadcast %73 : vector<1x32xf32> to vector<8x32xf32>
    %95 = arith.mulf %93, %94 : vector<8x32xf32>
    %96 = vector.broadcast %75 : vector<1x32xf32> to vector<8x32xf32>
    %97 = arith.addf %95, %96 : vector<8x32xf32>
    %98 = arith.truncf %97 : vector<8x32xf32> to vector<8x32xbf16>
    %c0_30 = arith.constant 0 : index
    %c0_31 = arith.constant 0 : index
    %c0_32 = arith.constant 0 : index
    %99 = vector.load %arg8[%c0_30, %c0_31, %c0_32] : memref<2x32x256xbf16, #tpu.memory_space<vmem>>, vector<1x32x256xbf16>
    %100 = vector.shape_cast %99 : vector<1x32x256xbf16> to vector<32x256xbf16>
    %cst_33 = arith.constant dense<0.000000e+00> : vector<8x256xf32>
    %101 = tpu.matmul %98, %100, %cst_33 {dimension_numbers = #tpu.dot_dimension_numbers<[1], [0], [0], [1], [0, 0, 1, 1], [], []>} : vector<8x32xbf16>, vector<32x256xbf16>, vector<8x256xf32> -> vector<8x256xf32>
    %c0_34 = arith.constant 0 : index
    %c0_35 = arith.constant 0 : index
    %c0_36 = arith.constant 0 : index
    %102 = vector.load %arg9[%c0_34, %c0_35, %c0_36] : memref<2x1x256xf32, #tpu.memory_space<vmem>>, vector<1x1x256xf32>
    %103 = vector.shape_cast %102 : vector<1x1x256xf32> to vector<1x256xf32>
    %104 = vector.broadcast %103 : vector<1x256xf32> to vector<8x256xf32>
    %105 = arith.addf %101, %104 : vector<8x256xf32>
    %cst_37 = arith.constant 0.000000e+00 : f32
    %106 = vector.broadcast %cst_37 : f32 to vector<8x256xf32>
    %107 = arith.maximumf %105, %106 : vector<8x256xf32>
    %108 = arith.truncf %107 : vector<8x256xf32> to vector<8x256xbf16>
    %c0_38 = arith.constant 0 : index
    %c0_39 = arith.constant 0 : index
    %c0_40 = arith.constant 0 : index
    %109 = vector.load %arg10[%c0_38, %c0_39, %c0_40] : memref<2x256x32xbf16, #tpu.memory_space<vmem>>, vector<1x256x32xbf16>
    %110 = vector.shape_cast %109 : vector<1x256x32xbf16> to vector<256x32xbf16>
    %cst_41 = arith.constant dense<0.000000e+00> : vector<8x32xf32>
    %111 = tpu.matmul %108, %110, %cst_41 {dimension_numbers = #tpu.dot_dimension_numbers<[1], [0], [0], [1], [0, 0, 1, 1], [], []>} : vector<8x256xbf16>, vector<256x32xbf16>, vector<8x32xf32> -> vector<8x32xf32>
    %c0_42 = arith.constant 0 : index
    %c0_43 = arith.constant 0 : index
    %c0_44 = arith.constant 0 : index
    %112 = vector.load %arg11[%c0_42, %c0_43, %c0_44] : memref<2x1x32xf32, #tpu.memory_space<vmem>>, vector<1x1x32xf32>
    %113 = vector.shape_cast %112 : vector<1x1x32xf32> to vector<1x32xf32>
    %114 = vector.broadcast %113 : vector<1x32xf32> to vector<8x32xf32>
    %115 = arith.addf %111, %114 : vector<8x32xf32>
    %116 = arith.addf %97, %115 : vector<8x32xf32>
    %c0_45 = arith.constant 0 : index
    %c0_46 = arith.constant 0 : index
    %c0_47 = arith.constant 0 : index
    %117 = vector.load %arg12[%c0_45, %c0_46, %c0_47] : memref<2x1x32xf32, #tpu.memory_space<vmem>>, vector<1x1x32xf32>
    %118 = vector.shape_cast %117 : vector<1x1x32xf32> to vector<1x32xf32>
    %c0_48 = arith.constant 0 : index
    %c0_49 = arith.constant 0 : index
    %c0_50 = arith.constant 0 : index
    %119 = vector.load %arg13[%c0_48, %c0_49, %c0_50] : memref<2x1x32xf32, #tpu.memory_space<vmem>>, vector<1x1x32xf32>
    %120 = vector.shape_cast %119 : vector<1x1x32xf32> to vector<1x32xf32>
    %cst_51 = arith.constant dense<0.000000e+00> : vector<8xf32>
    %121 = vector.multi_reduction <add>, %116, %cst_51 [1] : vector<8x32xf32> to vector<8xf32>
    %122 = vector.shape_cast %121 : vector<8xf32> to vector<8x1xf32>
    %cst_52 = arith.constant 3.200000e+01 : f32
    %123 = vector.broadcast %cst_52 : f32 to vector<8x1xf32>
    %124 = arith.divf %122, %123 : vector<8x1xf32>
    %125 = vector.broadcast %124 : vector<8x1xf32> to vector<8x32xf32>
    %126 = arith.subf %116, %125 : vector<8x32xf32>
    %127 = arith.mulf %126, %126 : vector<8x32xf32>
    %cst_53 = arith.constant dense<0.000000e+00> : vector<8xf32>
    %128 = vector.multi_reduction <add>, %127, %cst_53 [1] : vector<8x32xf32> to vector<8xf32>
    %129 = vector.shape_cast %128 : vector<8xf32> to vector<8x1xf32>
    %cst_54 = arith.constant 3.200000e+01 : f32
    %130 = vector.broadcast %cst_54 : f32 to vector<8x1xf32>
    %131 = arith.divf %129, %130 : vector<8x1xf32>
    %132 = vector.broadcast %124 : vector<8x1xf32> to vector<8x32xf32>
    %133 = arith.subf %116, %132 : vector<8x32xf32>
    %cst_55 = arith.constant 9.99999974E-6 : f32
    %134 = vector.broadcast %cst_55 : f32 to vector<8x1xf32>
    %135 = arith.addf %131, %134 : vector<8x1xf32>
    %136 = math.rsqrt %135 : vector<8x1xf32>
    %137 = vector.broadcast %136 : vector<8x1xf32> to vector<8x32xf32>
    %138 = arith.mulf %133, %137 : vector<8x32xf32>
    %139 = vector.broadcast %118 : vector<1x32xf32> to vector<8x32xf32>
    %140 = arith.mulf %138, %139 : vector<8x32xf32>
    %141 = vector.broadcast %120 : vector<1x32xf32> to vector<8x32xf32>
    %142 = arith.addf %140, %141 : vector<8x32xf32>
    %143 = arith.truncf %142 : vector<8x32xf32> to vector<8x32xbf16>
    %c1 = arith.constant 1 : index
    %c0_56 = arith.constant 0 : index
    %c0_57 = arith.constant 0 : index
    %144 = vector.load %arg2[%c1, %c0_56, %c0_57] : memref<2x32x96xbf16, #tpu.memory_space<vmem>>, vector<1x32x96xbf16>
    %145 = vector.shape_cast %144 : vector<1x32x96xbf16> to vector<32x96xbf16>
    %cst_58 = arith.constant dense<0.000000e+00> : vector<8x96xf32>
    %146 = tpu.matmul %143, %145, %cst_58 {dimension_numbers = #tpu.dot_dimension_numbers<[1], [0], [0], [1], [0, 0, 1, 1], [], []>} : vector<8x32xbf16>, vector<32x96xbf16>, vector<8x96xf32> -> vector<8x96xf32>
    %c1_59 = arith.constant 1 : index
    %c0_60 = arith.constant 0 : index
    %c0_61 = arith.constant 0 : index
    %147 = vector.load %arg3[%c1_59, %c0_60, %c0_61] : memref<2x1x96xf32, #tpu.memory_space<vmem>>, vector<1x1x96xf32>
    %148 = vector.shape_cast %147 : vector<1x1x96xf32> to vector<1x96xf32>
    %149 = vector.broadcast %148 : vector<1x96xf32> to vector<8x96xf32>
    %150 = arith.addf %146, %149 : vector<8x96xf32>
    %151 = vector.extract_strided_slice %150 {offsets = [0, 0], sizes = [8, 32], strides = [1, 1]} : vector<8x96xf32> to vector<8x32xf32>
    %cst_62 = arith.constant 0.353553385 : f32
    %152 = vector.broadcast %cst_62 : f32 to vector<8x32xf32>
    %153 = arith.mulf %151, %152 : vector<8x32xf32>
    %154 = vector.extract_strided_slice %153 {offsets = [0, 0], sizes = [8, 8], strides = [1, 1]} : vector<8x32xf32> to vector<8x8xf32>
    %155 = vector.shape_cast %154 : vector<8x8xf32> to vector<1x8x8xf32>
    %156 = vector.extract_strided_slice %153 {offsets = [0, 8], sizes = [8, 8], strides = [1, 1]} : vector<8x32xf32> to vector<8x8xf32>
    %157 = vector.shape_cast %156 : vector<8x8xf32> to vector<1x8x8xf32>
    %158 = vector.extract_strided_slice %153 {offsets = [0, 16], sizes = [8, 8], strides = [1, 1]} : vector<8x32xf32> to vector<8x8xf32>
    %159 = vector.shape_cast %158 : vector<8x8xf32> to vector<1x8x8xf32>
    %160 = vector.extract_strided_slice %153 {offsets = [0, 24], sizes = [8, 8], strides = [1, 1]} : vector<8x32xf32> to vector<8x8xf32>
    %161 = vector.shape_cast %160 : vector<8x8xf32> to vector<1x8x8xf32>
    %162 = tpu.concatenate %155, %157, %159, %161 in 0 : vector<1x8x8xf32>, vector<1x8x8xf32>, vector<1x8x8xf32>, vector<1x8x8xf32> -> vector<4x8x8xf32>
    %163 = arith.truncf %162 : vector<4x8x8xf32> to vector<4x8x8xbf16>
    %164 = vector.extract_strided_slice %150 {offsets = [0, 32], sizes = [8, 32], strides = [1, 1]} : vector<8x96xf32> to vector<8x32xf32>
    %165 = vector.extract_strided_slice %164 {offsets = [0, 0], sizes = [8, 8], strides = [1, 1]} : vector<8x32xf32> to vector<8x8xf32>
    %166 = vector.shape_cast %165 : vector<8x8xf32> to vector<1x8x8xf32>
    %167 = vector.extract_strided_slice %164 {offsets = [0, 8], sizes = [8, 8], strides = [1, 1]} : vector<8x32xf32> to vector<8x8xf32>
    %168 = vector.shape_cast %167 : vector<8x8xf32> to vector<1x8x8xf32>
    %169 = vector.extract_strided_slice %164 {offsets = [0, 16], sizes = [8, 8], strides = [1, 1]} : vector<8x32xf32> to vector<8x8xf32>
    %170 = vector.shape_cast %169 : vector<8x8xf32> to vector<1x8x8xf32>
    %171 = vector.extract_strided_slice %164 {offsets = [0, 24], sizes = [8, 8], strides = [1, 1]} : vector<8x32xf32> to vector<8x8xf32>
    %172 = vector.shape_cast %171 : vector<8x8xf32> to vector<1x8x8xf32>
    %173 = tpu.concatenate %166, %168, %170, %172 in 0 : vector<1x8x8xf32>, vector<1x8x8xf32>, vector<1x8x8xf32>, vector<1x8x8xf32> -> vector<4x8x8xf32>
    %174 = arith.truncf %173 : vector<4x8x8xf32> to vector<4x8x8xbf16>
    %175 = vector.extract_strided_slice %150 {offsets = [0, 64], sizes = [8, 32], strides = [1, 1]} : vector<8x96xf32> to vector<8x32xf32>
    %176 = vector.extract_strided_slice %175 {offsets = [0, 0], sizes = [8, 8], strides = [1, 1]} : vector<8x32xf32> to vector<8x8xf32>
    %177 = vector.shape_cast %176 : vector<8x8xf32> to vector<1x8x8xf32>
    %178 = vector.extract_strided_slice %175 {offsets = [0, 8], sizes = [8, 8], strides = [1, 1]} : vector<8x32xf32> to vector<8x8xf32>
    %179 = vector.shape_cast %178 : vector<8x8xf32> to vector<1x8x8xf32>
    %180 = vector.extract_strided_slice %175 {offsets = [0, 16], sizes = [8, 8], strides = [1, 1]} : vector<8x32xf32> to vector<8x8xf32>
    %181 = vector.shape_cast %180 : vector<8x8xf32> to vector<1x8x8xf32>
    %182 = vector.extract_strided_slice %175 {offsets = [0, 24], sizes = [8, 8], strides = [1, 1]} : vector<8x32xf32> to vector<8x8xf32>
    %183 = vector.shape_cast %182 : vector<8x8xf32> to vector<1x8x8xf32>
    %184 = tpu.concatenate %177, %179, %181, %183 in 0 : vector<1x8x8xf32>, vector<1x8x8xf32>, vector<1x8x8xf32>, vector<1x8x8xf32> -> vector<4x8x8xf32>
    %185 = arith.truncf %184 : vector<4x8x8xf32> to vector<4x8x8xbf16>
    "tpu.trace_start"() <{level = 10 : i32, message = "znd,zmd->znm"}> : () -> ()
    %cst_63 = arith.constant dense<0.000000e+00> : vector<4x8x8xf32>
    %186 = tpu.matmul %163, %174, %cst_63 {dimension_numbers = #tpu.dot_dimension_numbers<[2], [2], [1], [1], [0, 0, 0, 1, 1, 1], [0], [0]>} : vector<4x8x8xbf16>, vector<4x8x8xbf16>, vector<4x8x8xf32> -> vector<4x8x8xf32>
    "tpu.trace_stop"() : () -> ()
    %cst_64 = arith.constant dense<0xFF800000> : vector<4x8xf32>
    %187 = vector.multi_reduction <maximumf>, %186, %cst_64 [2] : vector<4x8x8xf32> to vector<4x8xf32>
    %188 = vector.shape_cast %187 : vector<4x8xf32> to vector<4x8x1xf32>
    %189 = vector.broadcast %188 : vector<4x8x1xf32> to vector<4x8x8xf32>
    %190 = arith.subf %186, %189 : vector<4x8x8xf32>
    %191 = math.exp %190 : vector<4x8x8xf32>
    %cst_65 = arith.constant dense<0.000000e+00> : vector<4x8xf32>
    %192 = vector.multi_reduction <add>, %191, %cst_65 [2] : vector<4x8x8xf32> to vector<4x8xf32>
    %193 = vector.shape_cast %192 : vector<4x8xf32> to vector<4x8x1xf32>
    %194 = tpu.reciprocal %193 {approx = true} : vector<4x8x1xf32> -> vector<4x8x1xf32>
    %195 = vector.broadcast %194 : vector<4x8x1xf32> to vector<4x8x8xf32>
    %196 = arith.mulf %191, %195 : vector<4x8x8xf32>
    %197 = arith.truncf %196 : vector<4x8x8xf32> to vector<4x8x8xbf16>
    "tpu.trace_start"() <{level = 10 : i32, message = "znm,zmd->znd"}> : () -> ()
    %cst_66 = arith.constant dense<0.000000e+00> : vector<4x8x8xf32>
    %198 = tpu.matmul %197, %185, %cst_66 {dimension_numbers = #tpu.dot_dimension_numbers<[2], [1], [1], [2], [0, 0, 0, 1, 1, 2], [0], [0]>} : vector<4x8x8xbf16>, vector<4x8x8xbf16>, vector<4x8x8xf32> -> vector<4x8x8xf32>
    "tpu.trace_stop"() : () -> ()
    %199 = vector.extract_strided_slice %198 {offsets = [0, 0, 0], sizes = [1, 8, 8], strides = [1, 1, 1]} : vector<4x8x8xf32> to vector<1x8x8xf32>
    %200 = vector.extract_strided_slice %198 {offsets = [1, 0, 0], sizes = [1, 8, 8], strides = [1, 1, 1]} : vector<4x8x8xf32> to vector<1x8x8xf32>
    %201 = vector.extract_strided_slice %198 {offsets = [2, 0, 0], sizes = [1, 8, 8], strides = [1, 1, 1]} : vector<4x8x8xf32> to vector<1x8x8xf32>
    %202 = vector.extract_strided_slice %198 {offsets = [3, 0, 0], sizes = [1, 8, 8], strides = [1, 1, 1]} : vector<4x8x8xf32> to vector<1x8x8xf32>
    %203 = tpu.concatenate %199, %200, %201, %202 in 2 : vector<1x8x8xf32>, vector<1x8x8xf32>, vector<1x8x8xf32>, vector<1x8x8xf32> -> vector<1x8x32xf32>
    %204 = vector.shape_cast %203 : vector<1x8x32xf32> to vector<8x32xf32>
    %205 = arith.truncf %204 : vector<8x32xf32> to vector<8x32xbf16>
    %c1_67 = arith.constant 1 : index
    %c0_68 = arith.constant 0 : index
    %c0_69 = arith.constant 0 : index
    %206 = vector.load %arg4[%c1_67, %c0_68, %c0_69] : memref<2x32x32xbf16, #tpu.memory_space<vmem>>, vector<1x32x32xbf16>
    %207 = vector.shape_cast %206 : vector<1x32x32xbf16> to vector<32x32xbf16>
    %cst_70 = arith.constant dense<0.000000e+00> : vector<8x32xf32>
    %208 = tpu.matmul %205, %207, %cst_70 {dimension_numbers = #tpu.dot_dimension_numbers<[1], [0], [0], [1], [0, 0, 1, 1], [], []>} : vector<8x32xbf16>, vector<32x32xbf16>, vector<8x32xf32> -> vector<8x32xf32>
    %c1_71 = arith.constant 1 : index
    %c0_72 = arith.constant 0 : index
    %c0_73 = arith.constant 0 : index
    %209 = vector.load %arg5[%c1_71, %c0_72, %c0_73] : memref<2x1x32xf32, #tpu.memory_space<vmem>>, vector<1x1x32xf32>
    %210 = vector.shape_cast %209 : vector<1x1x32xf32> to vector<1x32xf32>
    %211 = vector.broadcast %210 : vector<1x32xf32> to vector<8x32xf32>
    %212 = arith.addf %208, %211 : vector<8x32xf32>
    %213 = arith.addf %142, %212 : vector<8x32xf32>
    %c1_74 = arith.constant 1 : index
    %c0_75 = arith.constant 0 : index
    %c0_76 = arith.constant 0 : index
    %214 = vector.load %arg6[%c1_74, %c0_75, %c0_76] : memref<2x1x32xf32, #tpu.memory_space<vmem>>, vector<1x1x32xf32>
    %215 = vector.shape_cast %214 : vector<1x1x32xf32> to vector<1x32xf32>
    %c1_77 = arith.constant 1 : index
    %c0_78 = arith.constant 0 : index
    %c0_79 = arith.constant 0 : index
    %216 = vector.load %arg7[%c1_77, %c0_78, %c0_79] : memref<2x1x32xf32, #tpu.memory_space<vmem>>, vector<1x1x32xf32>
    %217 = vector.shape_cast %216 : vector<1x1x32xf32> to vector<1x32xf32>
    %cst_80 = arith.constant dense<0.000000e+00> : vector<8xf32>
    %218 = vector.multi_reduction <add>, %213, %cst_80 [1] : vector<8x32xf32> to vector<8xf32>
    %219 = vector.shape_cast %218 : vector<8xf32> to vector<8x1xf32>
    %cst_81 = arith.constant 3.200000e+01 : f32
    %220 = vector.broadcast %cst_81 : f32 to vector<8x1xf32>
    %221 = arith.divf %219, %220 : vector<8x1xf32>
    %222 = vector.broadcast %221 : vector<8x1xf32> to vector<8x32xf32>
    %223 = arith.subf %213, %222 : vector<8x32xf32>
    %224 = arith.mulf %223, %223 : vector<8x32xf32>
    %cst_82 = arith.constant dense<0.000000e+00> : vector<8xf32>
    %225 = vector.multi_reduction <add>, %224, %cst_82 [1] : vector<8x32xf32> to vector<8xf32>
    %226 = vector.shape_cast %225 : vector<8xf32> to vector<8x1xf32>
    %cst_83 = arith.constant 3.200000e+01 : f32
    %227 = vector.broadcast %cst_83 : f32 to vector<8x1xf32>
    %228 = arith.divf %226, %227 : vector<8x1xf32>
    %229 = vector.broadcast %221 : vector<8x1xf32> to vector<8x32xf32>
    %230 = arith.subf %213, %229 : vector<8x32xf32>
    %cst_84 = arith.constant 9.99999974E-6 : f32
    %231 = vector.broadcast %cst_84 : f32 to vector<8x1xf32>
    %232 = arith.addf %228, %231 : vector<8x1xf32>
    %233 = math.rsqrt %232 : vector<8x1xf32>
    %234 = vector.broadcast %233 : vector<8x1xf32> to vector<8x32xf32>
    %235 = arith.mulf %230, %234 : vector<8x32xf32>
    %236 = vector.broadcast %215 : vector<1x32xf32> to vector<8x32xf32>
    %237 = arith.mulf %235, %236 : vector<8x32xf32>
    %238 = vector.broadcast %217 : vector<1x32xf32> to vector<8x32xf32>
    %239 = arith.addf %237, %238 : vector<8x32xf32>
    %240 = arith.truncf %239 : vector<8x32xf32> to vector<8x32xbf16>
    %c1_85 = arith.constant 1 : index
    %c0_86 = arith.constant 0 : index
    %c0_87 = arith.constant 0 : index
    %241 = vector.load %arg8[%c1_85, %c0_86, %c0_87] : memref<2x32x256xbf16, #tpu.memory_space<vmem>>, vector<1x32x256xbf16>
    %242 = vector.shape_cast %241 : vector<1x32x256xbf16> to vector<32x256xbf16>
    %cst_88 = arith.constant dense<0.000000e+00> : vector<8x256xf32>
    %243 = tpu.matmul %240, %242, %cst_88 {dimension_numbers = #tpu.dot_dimension_numbers<[1], [0], [0], [1], [0, 0, 1, 1], [], []>} : vector<8x32xbf16>, vector<32x256xbf16>, vector<8x256xf32> -> vector<8x256xf32>
    %c1_89 = arith.constant 1 : index
    %c0_90 = arith.constant 0 : index
    %c0_91 = arith.constant 0 : index
    %244 = vector.load %arg9[%c1_89, %c0_90, %c0_91] : memref<2x1x256xf32, #tpu.memory_space<vmem>>, vector<1x1x256xf32>
    %245 = vector.shape_cast %244 : vector<1x1x256xf32> to vector<1x256xf32>
    %246 = vector.broadcast %245 : vector<1x256xf32> to vector<8x256xf32>
    %247 = arith.addf %243, %246 : vector<8x256xf32>
    %cst_92 = arith.constant 0.000000e+00 : f32
    %248 = vector.broadcast %cst_92 : f32 to vector<8x256xf32>
    %249 = arith.maximumf %247, %248 : vector<8x256xf32>
    %250 = arith.truncf %249 : vector<8x256xf32> to vector<8x256xbf16>
    %c1_93 = arith.constant 1 : index
    %c0_94 = arith.constant 0 : index
    %c0_95 = arith.constant 0 : index
    %251 = vector.load %arg10[%c1_93, %c0_94, %c0_95] : memref<2x256x32xbf16, #tpu.memory_space<vmem>>, vector<1x256x32xbf16>
    %252 = vector.shape_cast %251 : vector<1x256x32xbf16> to vector<256x32xbf16>
    %cst_96 = arith.constant dense<0.000000e+00> : vector<8x32xf32>
    %253 = tpu.matmul %250, %252, %cst_96 {dimension_numbers = #tpu.dot_dimension_numbers<[1], [0], [0], [1], [0, 0, 1, 1], [], []>} : vector<8x256xbf16>, vector<256x32xbf16>, vector<8x32xf32> -> vector<8x32xf32>
    %c1_97 = arith.constant 1 : index
    %c0_98 = arith.constant 0 : index
    %c0_99 = arith.constant 0 : index
    %254 = vector.load %arg11[%c1_97, %c0_98, %c0_99] : memref<2x1x32xf32, #tpu.memory_space<vmem>>, vector<1x1x32xf32>
    %255 = vector.shape_cast %254 : vector<1x1x32xf32> to vector<1x32xf32>
    %256 = vector.broadcast %255 : vector<1x32xf32> to vector<8x32xf32>
    %257 = arith.addf %253, %256 : vector<8x32xf32>
    %258 = arith.addf %239, %257 : vector<8x32xf32>
    %c1_100 = arith.constant 1 : index
    %c0_101 = arith.constant 0 : index
    %c0_102 = arith.constant 0 : index
    %259 = vector.load %arg12[%c1_100, %c0_101, %c0_102] : memref<2x1x32xf32, #tpu.memory_space<vmem>>, vector<1x1x32xf32>
    %260 = vector.shape_cast %259 : vector<1x1x32xf32> to vector<1x32xf32>
    %c1_103 = arith.constant 1 : index
    %c0_104 = arith.constant 0 : index
    %c0_105 = arith.constant 0 : index
    %261 = vector.load %arg13[%c1_103, %c0_104, %c0_105] : memref<2x1x32xf32, #tpu.memory_space<vmem>>, vector<1x1x32xf32>
    %262 = vector.shape_cast %261 : vector<1x1x32xf32> to vector<1x32xf32>
    %cst_106 = arith.constant dense<0.000000e+00> : vector<8xf32>
    %263 = vector.multi_reduction <add>, %258, %cst_106 [1] : vector<8x32xf32> to vector<8xf32>
    %264 = vector.shape_cast %263 : vector<8xf32> to vector<8x1xf32>
    %cst_107 = arith.constant 3.200000e+01 : f32
    %265 = vector.broadcast %cst_107 : f32 to vector<8x1xf32>
    %266 = arith.divf %264, %265 : vector<8x1xf32>
    %267 = vector.broadcast %266 : vector<8x1xf32> to vector<8x32xf32>
    %268 = arith.subf %258, %267 : vector<8x32xf32>
    %269 = arith.mulf %268, %268 : vector<8x32xf32>
    %cst_108 = arith.constant dense<0.000000e+00> : vector<8xf32>
    %270 = vector.multi_reduction <add>, %269, %cst_108 [1] : vector<8x32xf32> to vector<8xf32>
    %271 = vector.shape_cast %270 : vector<8xf32> to vector<8x1xf32>
    %cst_109 = arith.constant 3.200000e+01 : f32
    %272 = vector.broadcast %cst_109 : f32 to vector<8x1xf32>
    %273 = arith.divf %271, %272 : vector<8x1xf32>
    %274 = vector.broadcast %266 : vector<8x1xf32> to vector<8x32xf32>
    %275 = arith.subf %258, %274 : vector<8x32xf32>
    %cst_110 = arith.constant 9.99999974E-6 : f32
    %276 = vector.broadcast %cst_110 : f32 to vector<8x1xf32>
    %277 = arith.addf %273, %276 : vector<8x1xf32>
    %278 = math.rsqrt %277 : vector<8x1xf32>
    %279 = vector.broadcast %278 : vector<8x1xf32> to vector<8x32xf32>
    %280 = arith.mulf %275, %279 : vector<8x32xf32>
    %281 = vector.broadcast %260 : vector<1x32xf32> to vector<8x32xf32>
    %282 = arith.mulf %280, %281 : vector<8x32xf32>
    %283 = vector.broadcast %262 : vector<1x32xf32> to vector<8x32xf32>
    %284 = arith.addf %282, %283 : vector<8x32xf32>
    %285 = arith.truncf %284 : vector<8x32xf32> to vector<8x32xbf16>
    %c0_111 = arith.constant 0 : index
    %c0_112 = arith.constant 0 : index
    %286 = vector.load %arg14[%c0_111, %c0_112] : memref<32x64xbf16, #tpu.memory_space<vmem>>, vector<32x64xbf16>
    %cst_113 = arith.constant dense<0.000000e+00> : vector<8x64xf32>
    %287 = tpu.matmul %285, %286, %cst_113 {dimension_numbers = #tpu.dot_dimension_numbers<[1], [0], [0], [1], [0, 0, 1, 1], [], []>} : vector<8x32xbf16>, vector<32x64xbf16>, vector<8x64xf32> -> vector<8x64xf32>
    %c0_114 = arith.constant 0 : index
    %c0_115 = arith.constant 0 : index
    %288 = vector.load %arg15[%c0_114, %c0_115] : memref<1x64xf32, #tpu.memory_space<vmem>>, vector<1x64xf32>
    %289 = vector.broadcast %288 : vector<1x64xf32> to vector<8x64xf32>
    %290 = arith.addf %287, %289 : vector<8x64xf32>
    %cst_116 = arith.constant 0.000000e+00 : f32
    %291 = vector.broadcast %cst_116 : f32 to vector<8x64xf32>
    %292 = arith.maximumf %290, %291 : vector<8x64xf32>
    %293 = arith.truncf %292 : vector<8x64xf32> to vector<8x64xbf16>
    %c0_117 = arith.constant 0 : index
    %c0_118 = arith.constant 0 : index
    %294 = vector.load %arg16[%c0_117, %c0_118] : memref<64x128xbf16, #tpu.memory_space<vmem>>, vector<64x128xbf16>
    %cst_119 = arith.constant dense<0.000000e+00> : vector<8x128xf32>
    %295 = tpu.matmul %293, %294, %cst_119 {dimension_numbers = #tpu.dot_dimension_numbers<[1], [0], [0], [1], [0, 0, 1, 1], [], []>} : vector<8x64xbf16>, vector<64x128xbf16>, vector<8x128xf32> -> vector<8x128xf32>
    %c0_120 = arith.constant 0 : index
    %c0_121 = arith.constant 0 : index
    %296 = vector.load %arg17[%c0_120, %c0_121] : memref<1x128xf32, #tpu.memory_space<vmem>>, vector<1x128xf32>
    %297 = vector.broadcast %296 : vector<1x128xf32> to vector<8x128xf32>
    %298 = arith.addf %295, %297 : vector<8x128xf32>
    %299 = arith.mulf %298, %298 : vector<8x128xf32>
    %cst_122 = arith.constant dense<0.000000e+00> : vector<8xf32>
    %300 = vector.multi_reduction <add>, %299, %cst_122 [1] : vector<8x128xf32> to vector<8xf32>
    %301 = vector.shape_cast %300 : vector<8xf32> to vector<8x1xf32>
    %cst_123 = arith.constant 1.000000e-24 : f32
    %302 = vector.broadcast %cst_123 : f32 to vector<8x1xf32>
    %303 = arith.maximumf %301, %302 : vector<8x1xf32>
    %304 = math.rsqrt %303 : vector<8x1xf32>
    %305 = vector.broadcast %304 : vector<8x1xf32> to vector<8x128xf32>
    %306 = arith.mulf %298, %305 : vector<8x128xf32>
    %c0_124 = arith.constant 0 : index
    %c0_125 = arith.constant 0 : index
    %307 = vector.load %arg18[%c0_124, %c0_125] : memref<8x128xf32, #tpu.memory_space<vmem>>, vector<8x128xf32>
    tpu.vector_store %arg18[%c0_124, %c0_125], %306 {strides = array<i32>} : memref<8x128xf32, #tpu.memory_space<vmem>>, vector<8x128xf32>,
    return
  }
  func.func @transform_0(%arg0: i32) -> (i32, i32) {
    %c0_i32 = arith.constant 0 : i32
    %c0_i32_0 = arith.constant 0 : i32
    return %arg0, %c0_i32 : i32, i32
  }
  func.func @transform_1(%arg0: i32) -> (i32, i32, i32) {
    %c0_i32 = arith.constant 0 : i32
    %c0_i32_0 = arith.constant 0 : i32
    %c0_i32_1 = arith.constant 0 : i32
    %c0_i32_2 = arith.constant 0 : i32
    return %c0_i32, %c0_i32_0, %c0_i32_1 : i32, i32, i32
  }
  func.func @transform_2(%arg0: i32) -> (i32, i32, i32) {
    %c0_i32 = arith.constant 0 : i32
    %c0_i32_0 = arith.constant 0 : i32
    %c0_i32_1 = arith.constant 0 : i32
    %c0_i32_2 = arith.constant 0 : i32
    return %c0_i32, %c0_i32_0, %c0_i32_1 : i32, i32, i32
  }
  func.func @transform_3(%arg0: i32) -> (i32, i32, i32) {
    %c0_i32 = arith.constant 0 : i32
    %c0_i32_0 = arith.constant 0 : i32
    %c0_i32_1 = arith.constant 0 : i32
    %c0_i32_2 = arith.constant 0 : i32
    return %c0_i32, %c0_i32_0, %c0_i32_1 : i32, i32, i32
  }
  func.func @transform_4(%arg0: i32) -> (i32, i32, i32) {
    %c0_i32 = arith.constant 0 : i32
    %c0_i32_0 = arith.constant 0 : i32
    %c0_i32_1 = arith.constant 0 : i32
    %c0_i32_2 = arith.constant 0 : i32
    return %c0_i32, %c0_i32_0, %c0_i32_1 : i32, i32, i32
  }
  func.func @transform_5(%arg0: i32) -> (i32, i32, i32) {
    %c0_i32 = arith.constant 0 : i32
    %c0_i32_0 = arith.constant 0 : i32
    %c0_i32_1 = arith.constant 0 : i32
    %c0_i32_2 = arith.constant 0 : i32
    return %c0_i32, %c0_i32_0, %c0_i32_1 : i32, i32, i32
  }
  func.func @transform_6(%arg0: i32) -> (i32, i32, i32) {
    %c0_i32 = arith.constant 0 : i32
    %c0_i32_0 = arith.constant 0 : i32
    %c0_i32_1 = arith.constant 0 : i32
    %c0_i32_2 = arith.constant 0 : i32
    return %c0_i32, %c0_i32_0, %c0_i32_1 : i32, i32, i32
  }
  func.func @transform_7(%arg0: i32) -> (i32, i32, i32) {
    %c0_i32 = arith.constant 0 : i32
    %c0_i32_0 = arith.constant 0 : i32
    %c0_i32_1 = arith.constant 0 : i32
    %c0_i32_2 = arith.constant 0 : i32
    return %c0_i32, %c0_i32_0, %c0_i32_1 : i32, i32, i32
  }
  func.func @transform_8(%arg0: i32) -> (i32, i32, i32) {
    %c0_i32 = arith.constant 0 : i32
    %c0_i32_0 = arith.constant 0 : i32
    %c0_i32_1 = arith.constant 0 : i32
    %c0_i32_2 = arith.constant 0 : i32
    return %c0_i32, %c0_i32_0, %c0_i32_1 : i32, i32, i32
  }
  func.func @transform_9(%arg0: i32) -> (i32, i32, i32) {
    %c0_i32 = arith.constant 0 : i32
    %c0_i32_0 = arith.constant 0 : i32
    %c0_i32_1 = arith.constant 0 : i32
    %c0_i32_2 = arith.constant 0 : i32
    return %c0_i32, %c0_i32_0, %c0_i32_1 : i32, i32, i32
  }
  func.func @transform_10(%arg0: i32) -> (i32, i32, i32) {
    %c0_i32 = arith.constant 0 : i32
    %c0_i32_0 = arith.constant 0 : i32
    %c0_i32_1 = arith.constant 0 : i32
    %c0_i32_2 = arith.constant 0 : i32
    return %c0_i32, %c0_i32_0, %c0_i32_1 : i32, i32, i32
  }
  func.func @transform_11(%arg0: i32) -> (i32, i32, i32) {
    %c0_i32 = arith.constant 0 : i32
    %c0_i32_0 = arith.constant 0 : i32
    %c0_i32_1 = arith.constant 0 : i32
    %c0_i32_2 = arith.constant 0 : i32
    return %c0_i32, %c0_i32_0, %c0_i32_1 : i32, i32, i32
  }
  func.func @transform_12(%arg0: i32) -> (i32, i32, i32) {
    %c0_i32 = arith.constant 0 : i32
    %c0_i32_0 = arith.constant 0 : i32
    %c0_i32_1 = arith.constant 0 : i32
    %c0_i32_2 = arith.constant 0 : i32
    return %c0_i32, %c0_i32_0, %c0_i32_1 : i32, i32, i32
  }
  func.func @transform_13(%arg0: i32) -> (i32, i32) {
    %c0_i32 = arith.constant 0 : i32
    %c0_i32_0 = arith.constant 0 : i32
    %c0_i32_1 = arith.constant 0 : i32
    return %c0_i32, %c0_i32_0 : i32, i32
  }
  func.func @transform_14(%arg0: i32) -> (i32, i32) {
    %c0_i32 = arith.constant 0 : i32
    %c0_i32_0 = arith.constant 0 : i32
    %c0_i32_1 = arith.constant 0 : i32
    return %c0_i32, %c0_i32_0 : i32, i32
  }
  func.func @transform_15(%arg0: i32) -> (i32, i32) {
    %c0_i32 = arith.constant 0 : i32
    %c0_i32_0 = arith.constant 0 : i32
    %c0_i32_1 = arith.constant 0 : i32
    return %c0_i32, %c0_i32_0 : i32, i32
  }
  func.func @transform_16(%arg0: i32) -> (i32, i32) {
    %c0_i32 = arith.constant 0 : i32
    %c0_i32_0 = arith.constant 0 : i32
    %c0_i32_1 = arith.constant 0 : i32
    return %c0_i32, %c0_i32_0 : i32, i32
  }
  func.func @transform_17(%arg0: i32) -> (i32, i32) {
    %c0_i32 = arith.constant 0 : i32
    %c0_i32_0 = arith.constant 0 : i32
    return %arg0, %c0_i32 : i32, i32
  }
}

module attributes {stable_mosaic.version = 11 : i64} {
  func.func @kernel(%arg0: i32, %arg1: memref<8x32xf32, #tpu.memory_space<vmem>>, %arg2: memref<2x32x96xbf16, #tpu.memory_space<vmem>>, %arg3: memref<2x1x96xf32, #tpu.memory_space<vmem>>, %arg4: memref<2x32x32xbf16, #tpu.memory_space<vmem>>, %arg5: memref<2x1x32xf32, #tpu.memory_space<vmem>>, %arg6: memref<2x1x32xf32, #tpu.memory_space<vmem>>, %arg7: memref<2x1x32xf32, #tpu.memory_space<vmem>>, %arg8: memref<2x32x256xbf16, #tpu.memory_space<vmem>>, %arg9: memref<2x1x256xf32, #tpu.memory_space<vmem>>, %arg10: memref<2x256x32xbf16, #tpu.memory_space<vmem>>, %arg11: memref<2x1x32xf32, #tpu.memory_space<vmem>>, %arg12: memref<2x1x32xf32, #tpu.memory_space<vmem>>, %arg13: memref<2x1x32xf32, #tpu.memory_space<vmem>>, %arg14: memref<32x64xbf16, #tpu.memory_space<vmem>>, %arg15: memref<1x64xf32, #tpu.memory_space<vmem>>, %arg16: memref<64x128xbf16, #tpu.memory_space<vmem>>, %arg17: memref<1x128xf32, #tpu.memory_space<vmem>>, %arg18: memref<8x128xf32, #tpu.memory_space<vmem>>) attributes {dimension_semantics = [#tpu.dimension_semantics<parallel>], iteration_bounds = array<i64: 2>, scalar_prefetch = 0 : i64, scratch_operands = 0 : i64, tpu.core_type = #tpu.core_type<tc>, window_params = [{transform_indices = @transform_0, window_bounds = array<i64: 8, 32>}, {pipeline_mode = #tpu.pipeline_mode<synchronous>, transform_indices = @transform_1, window_bounds = array<i64: 2, 32, 96>}, {pipeline_mode = #tpu.pipeline_mode<synchronous>, transform_indices = @transform_2, window_bounds = array<i64: 2, 1, 96>}, {pipeline_mode = #tpu.pipeline_mode<synchronous>, transform_indices = @transform_3, window_bounds = array<i64: 2, 32, 32>}, {pipeline_mode = #tpu.pipeline_mode<synchronous>, transform_indices = @transform_4, window_bounds = array<i64: 2, 1, 32>}, {pipeline_mode = #tpu.pipeline_mode<synchronous>, transform_indices = @transform_5, window_bounds = array<i64: 2, 1, 32>}, {pipeline_mode = #tpu.pipeline_mode<synchronous>, transform_indices = @transform_6, window_bounds = array<i64: 2, 1, 32>}, {pipeline_mode = #tpu.pipeline_mode<synchronous>, transform_indices = @transform_7, window_bounds = array<i64: 2, 32, 256>}, {pipeline_mode = #tpu.pipeline_mode<synchronous>, transform_indices = @transform_8, window_bounds = array<i64: 2, 1, 256>}, {pipeline_mode = #tpu.pipeline_mode<synchronous>, transform_indices = @transform_9, window_bounds = array<i64: 2, 256, 32>}, {pipeline_mode = #tpu.pipeline_mode<synchronous>, transform_indices = @transform_10, window_bounds = array<i64: 2, 1, 32>}, {pipeline_mode = #tpu.pipeline_mode<synchronous>, transform_indices = @transform_11, window_bounds = array<i64: 2, 1, 32>}, {pipeline_mode = #tpu.pipeline_mode<synchronous>, transform_indices = @transform_12, window_bounds = array<i64: 2, 1, 32>}, {pipeline_mode = #tpu.pipeline_mode<synchronous>, transform_indices = @transform_13, window_bounds = array<i64: 32, 64>}, {pipeline_mode = #tpu.pipeline_mode<synchronous>, transform_indices = @transform_14, window_bounds = array<i64: 1, 64>}, {pipeline_mode = #tpu.pipeline_mode<synchronous>, transform_indices = @transform_15, window_bounds = array<i64: 64, 128>}, {pipeline_mode = #tpu.pipeline_mode<synchronous>, transform_indices = @transform_16, window_bounds = array<i64: 1, 128>}, {transform_indices = @transform_17, window_bounds = array<i64: 8, 128>}]} {
    %c0 = arith.constant 0 : index
    %c0_0 = arith.constant 0 : index
    %0 = vector.load %arg1[%c0, %c0_0] : memref<8x32xf32, #tpu.memory_space<vmem>>, vector<8x32xf32>
    %1 = arith.truncf %0 : vector<8x32xf32> to vector<8x32xbf16>
    %c0_1 = arith.constant 0 : index
    %c0_2 = arith.constant 0 : index
    %c0_3 = arith.constant 0 : index
    %2 = vector.load %arg2[%c0_1, %c0_2, %c0_3] : memref<2x32x96xbf16, #tpu.memory_space<vmem>>, vector<1x32x96xbf16>
    %3 = vector.shape_cast %2 : vector<1x32x96xbf16> to vector<32x96xbf16>
    %cst = arith.constant dense<0.000000e+00> : vector<8x96xf32>
    %4 = tpu.matmul %1, %3, %cst {dimension_numbers = #tpu.dot_dimension_numbers<[1], [0], [0], [1], [0, 0, 1, 1], [], []>} : vector<8x32xbf16>, vector<32x96xbf16>, vector<8x96xf32> -> vector<8x96xf32>
    %c0_4 = arith.constant 0 : index
    %c0_5 = arith.constant 0 : index
    %c0_6 = arith.constant 0 : index
    %5 = vector.load %arg3[%c0_4, %c0_5, %c0_6] : memref<2x1x96xf32, #tpu.memory_space<vmem>>, vector<1x1x96xf32>
    %6 = vector.shape_cast %5 : vector<1x1x96xf32> to vector<1x96xf32>
    %7 = vector.broadcast %6 : vector<1x96xf32> to vector<8x96xf32>
    %8 = arith.addf %4, %7 : vector<8x96xf32>
    %9 = vector.extract_strided_slice %8 {offsets = [0, 0], sizes = [8, 32], strides = [1, 1]} : vector<8x96xf32> to vector<8x32xf32>
    %cst_7 = arith.constant 0.353553385 : f32
    %10 = vector.broadcast %cst_7 : f32 to vector<8x32xf32>
    %11 = arith.mulf %9, %10 : vector<8x32xf32>
    %12 = vector.extract_strided_slice %11 {offsets = [0, 0], sizes = [8, 8], strides = [1, 1]} : vector<8x32xf32> to vector<8x8xf32>
    %13 = vector.shape_cast %12 : vector<8x8xf32> to vector<1x8x8xf32>
    %14 = vector.extract_strided_slice %11 {offsets = [0, 8], sizes = [8, 8], strides = [1, 1]} : vector<8x32xf32> to vector<8x8xf32>
    %15 = vector.shape_cast %14 : vector<8x8xf32> to vector<1x8x8xf32>
    %16 = vector.extract_strided_slice %11 {offsets = [0, 16], sizes = [8, 8], strides = [1, 1]} : vector<8x32xf32> to vector<8x8xf32>
    %17 = vector.shape_cast %16 : vector<8x8xf32> to vector<1x8x8xf32>
    %18 = vector.extract_strided_slice %11 {offsets = [0, 24], sizes = [8, 8], strides = [1, 1]} : vector<8x32xf32> to vector<8x8xf32>
    %19 = vector.shape_cast %18 : vector<8x8xf32> to vector<1x8x8xf32>
    %20 = tpu.concatenate %13, %15, %17, %19 in 0 : vector<1x8x8xf32>, vector<1x8x8xf32>, vector<1x8x8xf32>, vector<1x8x8xf32> -> vector<4x8x8xf32>
    %21 = arith.truncf %20 : vector<4x8x8xf32> to vector<4x8x8xbf16>
    %22 = vector.extract_strided_slice %8 {offsets = [0, 32], sizes = [8, 32], strides = [1, 1]} : vector<8x96xf32> to vector<8x32xf32>
    %23 = vector.extract_strided_slice %22 {offsets = [0, 0], sizes = [8, 8], strides = [1, 1]} : vector<8x32xf32> to vector<8x8xf32>
    %24 = vector.shape_cast %23 : vector<8x8xf32> to vector<1x8x8xf32>
    %25 = vector.extract_strided_slice %22 {offsets = [0, 8], sizes = [8, 8], strides = [1, 1]} : vector<8x32xf32> to vector<8x8xf32>
    %26 = vector.shape_cast %25 : vector<8x8xf32> to vector<1x8x8xf32>
    %27 = vector.extract_strided_slice %22 {offsets = [0, 16], sizes = [8, 8], strides = [1, 1]} : vector<8x32xf32> to vector<8x8xf32>
    %28 = vector.shape_cast %27 : vector<8x8xf32> to vector<1x8x8xf32>
    %29 = vector.extract_strided_slice %22 {offsets = [0, 24], sizes = [8, 8], strides = [1, 1]} : vector<8x32xf32> to vector<8x8xf32>
    %30 = vector.shape_cast %29 : vector<8x8xf32> to vector<1x8x8xf32>
    %31 = tpu.concatenate %24, %26, %28, %30 in 0 : vector<1x8x8xf32>, vector<1x8x8xf32>, vector<1x8x8xf32>, vector<1x8x8xf32> -> vector<4x8x8xf32>
    %32 = arith.truncf %31 : vector<4x8x8xf32> to vector<4x8x8xbf16>
    %33 = vector.extract_strided_slice %8 {offsets = [0, 64], sizes = [8, 32], strides = [1, 1]} : vector<8x96xf32> to vector<8x32xf32>
    %34 = vector.extract_strided_slice %33 {offsets = [0, 0], sizes = [8, 8], strides = [1, 1]} : vector<8x32xf32> to vector<8x8xf32>
    %35 = vector.shape_cast %34 : vector<8x8xf32> to vector<1x8x8xf32>
    %36 = vector.extract_strided_slice %33 {offsets = [0, 8], sizes = [8, 8], strides = [1, 1]} : vector<8x32xf32> to vector<8x8xf32>
    %37 = vector.shape_cast %36 : vector<8x8xf32> to vector<1x8x8xf32>
    %38 = vector.extract_strided_slice %33 {offsets = [0, 16], sizes = [8, 8], strides = [1, 1]} : vector<8x32xf32> to vector<8x8xf32>
    %39 = vector.shape_cast %38 : vector<8x8xf32> to vector<1x8x8xf32>
    %40 = vector.extract_strided_slice %33 {offsets = [0, 24], sizes = [8, 8], strides = [1, 1]} : vector<8x32xf32> to vector<8x8xf32>
    %41 = vector.shape_cast %40 : vector<8x8xf32> to vector<1x8x8xf32>
    %42 = tpu.concatenate %35, %37, %39, %41 in 0 : vector<1x8x8xf32>, vector<1x8x8xf32>, vector<1x8x8xf32>, vector<1x8x8xf32> -> vector<4x8x8xf32>
    %43 = arith.truncf %42 : vector<4x8x8xf32> to vector<4x8x8xbf16>
    "tpu.trace_start"() <{level = 10 : i32, message = "znd,zmd->znm"}> : () -> ()
    %cst_8 = arith.constant dense<0.000000e+00> : vector<4x8x8xf32>
    %44 = tpu.matmul %21, %32, %cst_8 {dimension_numbers = #tpu.dot_dimension_numbers<[2], [2], [1], [1], [0, 0, 0, 1, 1, 1], [0], [0]>} : vector<4x8x8xbf16>, vector<4x8x8xbf16>, vector<4x8x8xf32> -> vector<4x8x8xf32>
    "tpu.trace_stop"() : () -> ()
    %cst_9 = arith.constant dense<0xFF800000> : vector<4x8xf32>
    %45 = vector.multi_reduction <maximumf>, %44, %cst_9 [2] : vector<4x8x8xf32> to vector<4x8xf32>
    %46 = vector.shape_cast %45 : vector<4x8xf32> to vector<4x8x1xf32>
    %47 = vector.broadcast %46 : vector<4x8x1xf32> to vector<4x8x8xf32>
    %48 = arith.subf %44, %47 : vector<4x8x8xf32>
    %49 = math.exp %48 : vector<4x8x8xf32>
    %cst_10 = arith.constant dense<0.000000e+00> : vector<4x8xf32>
    %50 = vector.multi_reduction <add>, %49, %cst_10 [2] : vector<4x8x8xf32> to vector<4x8xf32>
    %51 = vector.shape_cast %50 : vector<4x8xf32> to vector<4x8x1xf32>
    %52 = tpu.reciprocal %51 {approx = true} : vector<4x8x1xf32> -> vector<4x8x1xf32>
    %53 = vector.broadcast %52 : vector<4x8x1xf32> to vector<4x8x8xf32>
    %54 = arith.mulf %49, %53 : vector<4x8x8xf32>
    %55 = arith.truncf %54 : vector<4x8x8xf32> to vector<4x8x8xbf16>
    "tpu.trace_start"() <{level = 10 : i32, message = "znm,zmd->znd"}> : () -> ()
    %cst_11 = arith.constant dense<0.000000e+00> : vector<4x8x8xf32>
    %56 = tpu.matmul %55, %43, %cst_11 {dimension_numbers = #tpu.dot_dimension_numbers<[2], [1], [1], [2], [0, 0, 0, 1, 1, 2], [0], [0]>} : vector<4x8x8xbf16>, vector<4x8x8xbf16>, vector<4x8x8xf32> -> vector<4x8x8xf32>
    "tpu.trace_stop"() : () -> ()
    %57 = vector.extract_strided_slice %56 {offsets = [0, 0, 0], sizes = [1, 8, 8], strides = [1, 1, 1]} : vector<4x8x8xf32> to vector<1x8x8xf32>
    %58 = vector.extract_strided_slice %56 {offsets = [1, 0, 0], sizes = [1, 8, 8], strides = [1, 1, 1]} : vector<4x8x8xf32> to vector<1x8x8xf32>
    %59 = vector.extract_strided_slice %56 {offsets = [2, 0, 0], sizes = [1, 8, 8], strides = [1, 1, 1]} : vector<4x8x8xf32> to vector<1x8x8xf32>
    %60 = vector.extract_strided_slice %56 {offsets = [3, 0, 0], sizes = [1, 8, 8], strides = [1, 1, 1]} : vector<4x8x8xf32> to vector<1x8x8xf32>
    %61 = tpu.concatenate %57, %58, %59, %60 in 2 : vector<1x8x8xf32>, vector<1x8x8xf32>, vector<1x8x8xf32>, vector<1x8x8xf32> -> vector<1x8x32xf32>
    %62 = vector.shape_cast %61 : vector<1x8x32xf32> to vector<8x32xf32>
    %63 = arith.truncf %62 : vector<8x32xf32> to vector<8x32xbf16>
    %c0_12 = arith.constant 0 : index
    %c0_13 = arith.constant 0 : index
    %c0_14 = arith.constant 0 : index
    %64 = vector.load %arg4[%c0_12, %c0_13, %c0_14] : memref<2x32x32xbf16, #tpu.memory_space<vmem>>, vector<1x32x32xbf16>
    %65 = vector.shape_cast %64 : vector<1x32x32xbf16> to vector<32x32xbf16>
    %cst_15 = arith.constant dense<0.000000e+00> : vector<8x32xf32>
    %66 = tpu.matmul %63, %65, %cst_15 {dimension_numbers = #tpu.dot_dimension_numbers<[1], [0], [0], [1], [0, 0, 1, 1], [], []>} : vector<8x32xbf16>, vector<32x32xbf16>, vector<8x32xf32> -> vector<8x32xf32>
    %c0_16 = arith.constant 0 : index
    %c0_17 = arith.constant 0 : index
    %c0_18 = arith.constant 0 : index
    %67 = vector.load %arg5[%c0_16, %c0_17, %c0_18] : memref<2x1x32xf32, #tpu.memory_space<vmem>>, vector<1x1x32xf32>
    %68 = vector.shape_cast %67 : vector<1x1x32xf32> to vector<1x32xf32>
    %69 = vector.broadcast %68 : vector<1x32xf32> to vector<8x32xf32>
    %70 = arith.addf %66, %69 : vector<8x32xf32>
    %71 = arith.addf %0, %70 : vector<8x32xf32>
    %c0_19 = arith.constant 0 : index
    %c0_20 = arith.constant 0 : index
    %c0_21 = arith.constant 0 : index
    %72 = vector.load %arg6[%c0_19, %c0_20, %c0_21] : memref<2x1x32xf32, #tpu.memory_space<vmem>>, vector<1x1x32xf32>
    %73 = vector.shape_cast %72 : vector<1x1x32xf32> to vector<1x32xf32>
    %c0_22 = arith.constant 0 : index
    %c0_23 = arith.constant 0 : index
    %c0_24 = arith.constant 0 : index
    %74 = vector.load %arg7[%c0_22, %c0_23, %c0_24] : memref<2x1x32xf32, #tpu.memory_space<vmem>>, vector<1x1x32xf32>
    %75 = vector.shape_cast %74 : vector<1x1x32xf32> to vector<1x32xf32>
    %cst_25 = arith.constant dense<0.000000e+00> : vector<8xf32>
    %76 = vector.multi_reduction <add>, %71, %cst_25 [1] : vector<8x32xf32> to vector<8xf32>
    %77 = vector.shape_cast %76 : vector<8xf32> to vector<8x1xf32>
    %cst_26 = arith.constant 3.200000e+01 : f32
    %78 = vector.broadcast %cst_26 : f32 to vector<8x1xf32>
    %79 = arith.divf %77, %78 : vector<8x1xf32>
    %80 = vector.broadcast %79 : vector<8x1xf32> to vector<8x32xf32>
    %81 = arith.subf %71, %80 : vector<8x32xf32>
    %82 = arith.mulf %81, %81 : vector<8x32xf32>
    %cst_27 = arith.constant dense<0.000000e+00> : vector<8xf32>
    %83 = vector.multi_reduction <add>, %82, %cst_27 [1] : vector<8x32xf32> to vector<8xf32>
    %84 = vector.shape_cast %83 : vector<8xf32> to vector<8x1xf32>
    %cst_28 = arith.constant 3.200000e+01 : f32
    %85 = vector.broadcast %cst_28 : f32 to vector<8x1xf32>
    %86 = arith.divf %84, %85 : vector<8x1xf32>
    %87 = vector.broadcast %79 : vector<8x1xf32> to vector<8x32xf32>
    %88 = arith.subf %71, %87 : vector<8x32xf32>
    %cst_29 = arith.constant 9.99999974E-6 : f32
    %89 = vector.broadcast %cst_29 : f32 to vector<8x1xf32>
    %90 = arith.addf %86, %89 : vector<8x1xf32>
    %91 = math.rsqrt %90 : vector<8x1xf32>
    %92 = vector.broadcast %91 : vector<8x1xf32> to vector<8x32xf32>
    %93 = arith.mulf %88, %92 : vector<8x32xf32>
    %94 = vector.broadcast %73 : vector<1x32xf32> to vector<8x32xf32>
    %95 = arith.mulf %93, %94 : vector<8x32xf32>
    %96 = vector.broadcast %75 : vector<1x32xf32> to vector<8x32xf32>
    %97 = arith.addf %95, %96 : vector<8x32xf32>
    %98 = arith.truncf %97 : vector<8x32xf32> to vector<8x32xbf16>
    %c0_30 = arith.constant 0 : index
    %c0_31 = arith.constant 0 : index
    %c0_32 = arith.constant 0 : index
    %99 = vector.load %arg8[%c0_30, %c0_31, %c0_32] : memref<2x32x256xbf16, #tpu.memory_space<vmem>>, vector<1x32x256xbf16>
    %100 = vector.shape_cast %99 : vector<1x32x256xbf16> to vector<32x256xbf16>
    %cst_33 = arith.constant dense<0.000000e+00> : vector<8x256xf32>
    %101 = tpu.matmul %98, %100, %cst_33 {dimension_numbers = #tpu.dot_dimension_numbers<[1], [0], [0], [1], [0, 0, 1, 1], [], []>} : vector<8x32xbf16>, vector<32x256xbf16>, vector<8x256xf32> -> vector<8x256xf32>
    %c0_34 = arith.constant 0 : index
    %c0_35 = arith.constant 0 : index
    %c0_36 = arith.constant 0 : index
    %102 = vector.load %arg9[%c0_34, %c0_35, %c0_36] : memref<2x1x256xf32, #tpu.memory_space<vmem>>, vector<1x1x256xf32>
    %103 = vector.shape_cast %102 : vector<1x1x256xf32> to vector<1x256xf32>
    %104 = vector.broadcast %103 : vector<1x256xf32> to vector<8x256xf32>
    %105 = arith.addf %101, %104 : vector<8x256xf32>
    %cst_37 = arith.constant 0.000000e+00 : f32
    %106 = vector.broadcast %cst_37 : f32 to vector<8x256xf32>
    %107 = arith.maximumf %105, %106 : vector<8x256xf32>
    %108 = arith.truncf %107 : vector<8x256xf32> to vector<8x256xbf16>
    %c0_38 = arith.constant 0 : index
    %c0_39 = arith.constant 0 : index
    %c0_40 = arith.constant 0 : index
    %109 = vector.load %arg10[%c0_38, %c0_39, %c0_40] : memref<2x256x32xbf16, #tpu.memory_space<vmem>>, vector<1x256x32xbf16>
    %110 = vector.shape_cast %109 : vector<1x256x32xbf16> to vector<256x32xbf16>
    %cst_41 = arith.constant dense<0.000000e+00> : vector<8x32xf32>
    %111 = tpu.matmul %108, %110, %cst_41 {dimension_numbers = #tpu.dot_dimension_numbers<[1], [0], [0], [1], [0, 0, 1, 1], [], []>} : vector<8x256xbf16>, vector<256x32xbf16>, vector<8x32xf32> -> vector<8x32xf32>
    %c0_42 = arith.constant 0 : index
    %c0_43 = arith.constant 0 : index
    %c0_44 = arith.constant 0 : index
    %112 = vector.load %arg11[%c0_42, %c0_43, %c0_44] : memref<2x1x32xf32, #tpu.memory_space<vmem>>, vector<1x1x32xf32>
    %113 = vector.shape_cast %112 : vector<1x1x32xf32> to vector<1x32xf32>
    %114 = vector.broadcast %113 : vector<1x32xf32> to vector<8x32xf32>
    %115 = arith.addf %111, %114 : vector<8x32xf32>
    %116 = arith.addf %97, %115 : vector<8x32xf32>
    %c0_45 = arith.constant 0 : index
    %c0_46 = arith.constant 0 : index
    %c0_47 = arith.constant 0 : index
    %117 = vector.load %arg12[%c0_45, %c0_46, %c0_47] : memref<2x1x32xf32, #tpu.memory_space<vmem>>, vector<1x1x32xf32>
    %118 = vector.shape_cast %117 : vector<1x1x32xf32> to vector<1x32xf32>
    %c0_48 = arith.constant 0 : index
    %c0_49 = arith.constant 0 : index
    %c0_50 = arith.constant 0 : index
    %119 = vector.load %arg13[%c0_48, %c0_49, %c0_50] : memref<2x1x32xf32, #tpu.memory_space<vmem>>, vector<1x1x32xf32>
    %120 = vector.shape_cast %119 : vector<1x1x32xf32> to vector<1x32xf32>
    %cst_51 = arith.constant dense<0.000000e+00> : vector<8xf32>
    %121 = vector.multi_reduction <add>, %116, %cst_51 [1] : vector<8x32xf32> to vector<8xf32>
    %122 = vector.shape_cast %121 : vector<8xf32> to vector<8x1xf32>
    %cst_52 = arith.constant 3.200000e+01 : f32
    %123 = vector.broadcast %cst_52 : f32 to vector<8x1xf32>
    %124 = arith.divf %122, %123 : vector<8x1xf32>
    %125 = vector.broadcast %124 : vector<8x1xf32> to vector<8x32xf32>
    %126 = arith.subf %116, %125 : vector<8x32xf32>
    %127 = arith.mulf %126, %126 : vector<8x32xf32>
    %cst_53 = arith.constant dense<0.000000e+00> : vector<8xf32>
    %128 = vector.multi_reduction <add>, %127, %cst_53 [1] : vector<8x32xf32> to vector<8xf32>
    %129 = vector.shape_cast %128 : vector<8xf32> to vector<8x1xf32>
    %cst_54 = arith.constant 3.200000e+01 : f32
    %130 = vector.broadcast %cst_54 : f32 to vector<8x1xf32>
    %131 = arith.divf %129, %130 : vector<8x1xf32>
    %132 = vector.broadcast %124 : vector<8x1xf32> to vector<8x32xf32>
    %133 = arith.subf %116, %132 : vector<8x32xf32>
    %cst_55 = arith.constant 9.99999974E-6 : f32
    %134 = vector.broadcast %cst_55 : f32 to vector<8x1xf32>
    %135 = arith.addf %131, %134 : vector<8x1xf32>
    %136 = math.rsqrt %135 : vector<8x1xf32>
    %137 = vector.broadcast %136 : vector<8x1xf32> to vector<8x32xf32>
    %138 = arith.mulf %133, %137 : vector<8x32xf32>
    %139 = vector.broadcast %118 : vector<1x32xf32> to vector<8x32xf32>
    %140 = arith.mulf %138, %139 : vector<8x32xf32>
    %141 = vector.broadcast %120 : vector<1x32xf32> to vector<8x32xf32>
    %142 = arith.addf %140, %141 : vector<8x32xf32>
    %143 = arith.truncf %142 : vector<8x32xf32> to vector<8x32xbf16>
    %c1 = arith.constant 1 : index
    %c0_56 = arith.constant 0 : index
    %c0_57 = arith.constant 0 : index
    %144 = vector.load %arg2[%c1, %c0_56, %c0_57] : memref<2x32x96xbf16, #tpu.memory_space<vmem>>, vector<1x32x96xbf16>
    %145 = vector.shape_cast %144 : vector<1x32x96xbf16> to vector<32x96xbf16>
    %cst_58 = arith.constant dense<0.000000e+00> : vector<8x96xf32>
    %146 = tpu.matmul %143, %145, %cst_58 {dimension_numbers = #tpu.dot_dimension_numbers<[1], [0], [0], [1], [0, 0, 1, 1], [], []>} : vector<8x32xbf16>, vector<32x96xbf16>, vector<8x96xf32> -> vector<8x96xf32>
    %c1_59 = arith.constant 1 : index
    %c0_60 = arith.constant 0 : index
    %c0_61 = arith.constant 0 : index
    %147 = vector.load %arg3[%c1_59, %c0_60, %c0_61] : memref<2x1x96xf32, #tpu.memory_space<vmem>>, vector<1x1x96xf32>
    %148 = vector.shape_cast %147 : vector<1x1x96xf32> to vector<1x96xf32>
    %149 = vector.broadcast %148 : vector<1x96xf32> to vector<8x96xf32>
    %150 = arith.addf %146, %149 : vector<8x96xf32>
    %151 = vector.extract_strided_slice %150 {offsets = [0, 0], sizes = [8, 32], strides = [1, 1]} : vector<8x96xf32> to vector<8x32xf32>
    %cst_62 = arith.constant 0.353553385 : f32
    %152 = vector.broadcast %cst_62 : f32 to vector<8x32xf32>
    %153 = arith.mulf %151, %152 : vector<8x32xf32>
    %154 = vector.extract_strided_slice %153 {offsets = [0, 0], sizes = [8, 8], strides = [1, 1]} : vector<8x32xf32> to vector<8x8xf32>
    %155 = vector.shape_cast %154 : vector<8x8xf32> to vector<1x8x8xf32>
    %156 = vector.extract_strided_slice %153 {offsets = [0, 8], sizes = [8, 8], strides = [1, 1]} : vector<8x32xf32> to vector<8x8xf32>
    %157 = vector.shape_cast %156 : vector<8x8xf32> to vector<1x8x8xf32>
    %158 = vector.extract_strided_slice %153 {offsets = [0, 16], sizes = [8, 8], strides = [1, 1]} : vector<8x32xf32> to vector<8x8xf32>
    %159 = vector.shape_cast %158 : vector<8x8xf32> to vector<1x8x8xf32>
    %160 = vector.extract_strided_slice %153 {offsets = [0, 24], sizes = [8, 8], strides = [1, 1]} : vector<8x32xf32> to vector<8x8xf32>
    %161 = vector.shape_cast %160 : vector<8x8xf32> to vector<1x8x8xf32>
    %162 = tpu.concatenate %155, %157, %159, %161 in 0 : vector<1x8x8xf32>, vector<1x8x8xf32>, vector<1x8x8xf32>, vector<1x8x8xf32> -> vector<4x8x8xf32>
    %163 = arith.truncf %162 : vector<4x8x8xf32> to vector<4x8x8xbf16>
    %164 = vector.extract_strided_slice %150 {offsets = [0, 32], sizes = [8, 32], strides = [1, 1]} : vector<8x96xf32> to vector<8x32xf32>
    %165 = vector.extract_strided_slice %164 {offsets = [0, 0], sizes = [8, 8], strides = [1, 1]} : vector<8x32xf32> to vector<8x8xf32>
    %166 = vector.shape_cast %165 : vector<8x8xf32> to vector<1x8x8xf32>
    %167 = vector.extract_strided_slice %164 {offsets = [0, 8], sizes = [8, 8], strides = [1, 1]} : vector<8x32xf32> to vector<8x8xf32>
    %168 = vector.shape_cast %167 : vector<8x8xf32> to vector<1x8x8xf32>
    %169 = vector.extract_strided_slice %164 {offsets = [0, 16], sizes = [8, 8], strides = [1, 1]} : vector<8x32xf32> to vector<8x8xf32>
    %170 = vector.shape_cast %169 : vector<8x8xf32> to vector<1x8x8xf32>
    %171 = vector.extract_strided_slice %164 {offsets = [0, 24], sizes = [8, 8], strides = [1, 1]} : vector<8x32xf32> to vector<8x8xf32>
    %172 = vector.shape_cast %171 : vector<8x8xf32> to vector<1x8x8xf32>
    %173 = tpu.concatenate %166, %168, %170, %172 in 0 : vector<1x8x8xf32>, vector<1x8x8xf32>, vector<1x8x8xf32>, vector<1x8x8xf32> -> vector<4x8x8xf32>
    %174 = arith.truncf %173 : vector<4x8x8xf32> to vector<4x8x8xbf16>
    %175 = vector.extract_strided_slice %150 {offsets = [0, 64], sizes = [8, 32], strides = [1, 1]} : vector<8x96xf32> to vector<8x32xf32>
    %176 = vector.extract_strided_slice %175 {offsets = [0, 0], sizes = [8, 8], strides = [1, 1]} : vector<8x32xf32> to vector<8x8xf32>
    %177 = vector.shape_cast %176 : vector<8x8xf32> to vector<1x8x8xf32>
    %178 = vector.extract_strided_slice %175 {offsets = [0, 8], sizes = [8, 8], strides = [1, 1]} : vector<8x32xf32> to vector<8x8xf32>
    %179 = vector.shape_cast %178 : vector<8x8xf32> to vector<1x8x8xf32>
    %180 = vector.extract_strided_slice %175 {offsets = [0, 16], sizes = [8, 8], strides = [1, 1]} : vector<8x32xf32> to vector<8x8xf32>
    %181 = vector.shape_cast %180 : vector<8x8xf32> to vector<1x8x8xf32>
    %182 = vector.extract_strided_slice %175 {offsets = [0, 24], sizes = [8, 8], strides = [1, 1]} : vector<8x32xf32> to vector<8x8xf32>
    %183 = vector.shape_cast %182 : vector<8x8xf32> to vector<1x8x8xf32>
    %184 = tpu.concatenate %177, %179, %181, %183 in 0 : vector<1x8x8xf32>, vector<1x8x8xf32>, vector<1x8x8xf32>, vector<1x8x8xf32> -> vector<4x8x8xf32>
    %185 = arith.truncf %184 : vector<4x8x8xf32> to vector<4x8x8xbf16>
    "tpu.trace_start"() <{level = 10 : i32, message = "znd,zmd->znm"}> : () -> ()
    %cst_63 = arith.constant dense<0.000000e+00> : vector<4x8x8xf32>
    %186 = tpu.matmul %163, %174, %cst_63 {dimension_numbers = #tpu.dot_dimension_numbers<[2], [2], [1], [1], [0, 0, 0, 1, 1, 1], [0], [0]>} : vector<4x8x8xbf16>, vector<4x8x8xbf16>, vector<4x8x8xf32> -> vector<4x8x8xf32>
    "tpu.trace_stop"() : () -> ()
    %cst_64 = arith.constant dense<0xFF800000> : vector<4x8xf32>
    %187 = vector.multi_reduction <maximumf>, %186, %cst_64 [2] : vector<4x8x8xf32> to vector<4x8xf32>
    %188 = vector.shape_cast %187 : vector<4x8xf32> to vector<4x8x1xf32>
    %189 = vector.broadcast %188 : vector<4x8x1xf32> to vector<4x8x8xf32>
    %190 = arith.subf %186, %189 : vector<4x8x8xf32>
    %191 = math.exp %190 : vector<4x8x8xf32>
    %cst_65 = arith.constant dense<0.000000e+00> : vector<4x8xf32>
    %192 = vector.multi_reduction <add>, %191, %cst_65 [2] : vector<4x8x8xf32> to vector<4x8xf32>
    %193 = vector.shape_cast %192 : vector<4x8xf32> to vector<4x8x1xf32>
    %194 = tpu.reciprocal %193 {approx = true} : vector<4x8x1xf32> -> vector<4x8x1xf32>
    %195 = vector.broadcast %194 : vector<4x8x1xf32> to vector<4x8x8xf32>
    %196 = arith.mulf %191, %195 : vector<4x8x8xf32>
    %197 = arith.truncf %196 : vector<4x8x8xf32> to vector<4x8x8xbf16>
    "tpu.trace_start"() <{level = 10 : i32, message = "znm,zmd->znd"}> : () -> ()
    %cst_66 = arith.constant dense<0.000000e+00> : vector<4x8x8xf32>
    %198 = tpu.matmul %197, %185, %cst_66 {dimension_numbers = #tpu.dot_dimension_numbers<[2], [1], [1], [2], [0, 0, 0, 1, 1, 2], [0], [0]>} : vector<4x8x8xbf16>, vector<4x8x8xbf16>, vector<4x8x8xf32> -> vector<4x8x8xf32>
    "tpu.trace_stop"() : () -> ()
    %199 = vector.extract_strided_slice %198 {offsets = [0, 0, 0], sizes = [1, 8, 8], strides = [1, 1, 1]} : vector<4x8x8xf32> to vector<1x8x8xf32>
    %200 = vector.extract_strided_slice %198 {offsets = [1, 0, 0], sizes = [1, 8, 8], strides = [1, 1, 1]} : vector<4x8x8xf32> to vector<1x8x8xf32>
    %201 = vector.extract_strided_slice %198 {offsets = [2, 0, 0], sizes = [1, 8, 8], strides = [1, 1, 1]} : vector<4x8x8xf32> to vector<1x8x8xf32>
    %202 = vector.extract_strided_slice %198 {offsets = [3, 0, 0], sizes = [1, 8, 8], strides = [1, 1, 1]} : vector<4x8x8xf32> to vector<1x8x8xf32>
    %203 = tpu.concatenate %199, %200, %201, %202 in 2 : vector<1x8x8xf32>, vector<1x8x8xf32>, vector<1x8x8xf32>, vector<1x8x8xf32> -> vector<1x8x32xf32>
    %204 = vector.shape_cast %203 : vector<1x8x32xf32> to vector<8x32xf32>
    %205 = arith.truncf %204 : vector<8x32xf32> to vector<8x32xbf16>
    %c1_67 = arith.constant 1 : index
    %c0_68 = arith.constant 0 : index
    %c0_69 = arith.constant 0 : index
    %206 = vector.load %arg4[%c1_67, %c0_68, %c0_69] : memref<2x32x32xbf16, #tpu.memory_space<vmem>>, vector<1x32x32xbf16>
    %207 = vector.shape_cast %206 : vector<1x32x32xbf16> to vector<32x32xbf16>
    %cst_70 = arith.constant dense<0.000000e+00> : vector<8x32xf32>
    %208 = tpu.matmul %205, %207, %cst_70 {dimension_numbers = #tpu.dot_dimension_numbers<[1], [0], [0], [1], [0, 0, 1, 1], [], []>} : vector<8x32xbf16>, vector<32x32xbf16>, vector<8x32xf32> -> vector<8x32xf32>
    %c1_71 = arith.constant 1 : index
    %c0_72 = arith.constant 0 : index
    %c0_73 = arith.constant 0 : index
    %209 = vector.load %arg5[%c1_71, %c0_72, %c0_73] : memref<2x1x32xf32, #tpu.memory_space<vmem>>, vector<1x1x32xf32>
    %210 = vector.shape_cast %209 : vector<1x1x32xf32> to vector<1x32xf32>
    %211 = vector.broadcast %210 : vector<1x32xf32> to vector<8x32xf32>
    %212 = arith.addf %208, %211 : vector<8x32xf32>
    %213 = arith.addf %142, %212 : vector<8x32xf32>
    %c1_74 = arith.constant 1 : index
    %c0_75 = arith.constant 0 : index
    %c0_76 = arith.constant 0 : index
    %214 = vector.load %arg6[%c1_74, %c0_75, %c0_76] : memref<2x1x32xf32, #tpu.memory_space<vmem>>, vector<1x1x32xf32>
    %215 = vector.shape_cast %214 : vector<1x1x32xf32> to vector<1x32xf32>
    %c1_77 = arith.constant 1 : index
    %c0_78 = arith.constant 0 : index
    %c0_79 = arith.constant 0 : index
    %216 = vector.load %arg7[%c1_77, %c0_78, %c0_79] : memref<2x1x32xf32, #tpu.memory_space<vmem>>, vector<1x1x32xf32>
    %217 = vector.shape_cast %216 : vector<1x1x32xf32> to vector<1x32xf32>
    %cst_80 = arith.constant dense<0.000000e+00> : vector<8xf32>
    %218 = vector.multi_reduction <add>, %213, %cst_80 [1] : vector<8x32xf32> to vector<8xf32>
    %219 = vector.shape_cast %218 : vector<8xf32> to vector<8x1xf32>
    %cst_81 = arith.constant 3.200000e+01 : f32
    %220 = vector.broadcast %cst_81 : f32 to vector<8x1xf32>
    %221 = arith.divf %219, %220 : vector<8x1xf32>
    %222 = vector.broadcast %221 : vector<8x1xf32> to vector<8x32xf32>
    %223 = arith.subf %213, %222 : vector<8x32xf32>
    %224 = arith.mulf %223, %223 : vector<8x32xf32>
    %cst_82 = arith.constant dense<0.000000e+00> : vector<8xf32>
    %225 = vector.multi_reduction <add>, %224, %cst_82 [1] : vector<8x32xf32> to vector<8xf32>
    %226 = vector.shape_cast %225 : vector<8xf32> to vector<8x1xf32>
    %cst_83 = arith.constant 3.200000e+01 : f32
    %227 = vector.broadcast %cst_83 : f32 to vector<8x1xf32>
    %228 = arith.divf %226, %227 : vector<8x1xf32>
    %229 = vector.broadcast %221 : vector<8x1xf32> to vector<8x32xf32>
    %230 = arith.subf %213, %229 : vector<8x32xf32>
    %cst_84 = arith.constant 9.99999974E-6 : f32
    %231 = vector.broadcast %cst_84 : f32 to vector<8x1xf32>
    %232 = arith.addf %228, %231 : vector<8x1xf32>
    %233 = math.rsqrt %232 : vector<8x1xf32>
    %234 = vector.broadcast %233 : vector<8x1xf32> to vector<8x32xf32>
    %235 = arith.mulf %230, %234 : vector<8x32xf32>
    %236 = vector.broadcast %215 : vector<1x32xf32> to vector<8x32xf32>
    %237 = arith.mulf %235, %236 : vector<8x32xf32>
    %238 = vector.broadcast %217 : vector<1x32xf32> to vector<8x32xf32>
    %239 = arith.addf %237, %238 : vector<8x32xf32>
    %240 = arith.truncf %239 : vector<8x32xf32> to vector<8x32xbf16>
    %c1_85 = arith.constant 1 : index
    %c0_86 = arith.constant 0 : index
    %c0_87 = arith.constant 0 : index
    %241 = vector.load %arg8[%c1_85, %c0_86, %c0_87] : memref<2x32x256xbf16, #tpu.memory_space<vmem>>, vector<1x32x256xbf16>
    %242 = vector.shape_cast %241 : vector<1x32x256xbf16> to vector<32x256xbf16>
    %cst_88 = arith.constant dense<0.000000e+00> : vector<8x256xf32>
    %243 = tpu.matmul %240, %242, %cst_88 {dimension_numbers = #tpu.dot_dimension_numbers<[1], [0], [0], [1], [0, 0, 1, 1], [], []>} : vector<8x32xbf16>, vector<32x256xbf16>, vector<8x256xf32> -> vector<8x256xf32>
    %c1_89 = arith.constant 1 : index
    %c0_90 = arith.constant 0 : index
    %c0_91 = arith.constant 0 : index
    %244 = vector.load %arg9[%c1_89, %c0_90, %c0_91] : memref<2x1x256xf32, #tpu.memory_space<vmem>>, vector<1x1x256xf32>
    %245 = vector.shape_cast %244 : vector<1x1x256xf32> to vector<1x256xf32>
    %246 = vector.broadcast %245 : vector<1x256xf32> to vector<8x256xf32>
    %247 = arith.addf %243, %246 : vector<8x256xf32>
    %cst_92 = arith.constant 0.000000e+00 : f32
    %248 = vector.broadcast %cst_92 : f32 to vector<8x256xf32>
    %249 = arith.maximumf %247, %248 : vector<8x256xf32>
    %250 = arith.truncf %249 : vector<8x256xf32> to vector<8x256xbf16>
    %c1_93 = arith.constant 1 : index
    %c0_94 = arith.constant 0 : index
    %c0_95 = arith.constant 0 : index
    %251 = vector.load %arg10[%c1_93, %c0_94, %c0_95] : memref<2x256x32xbf16, #tpu.memory_space<vmem>>, vector<1x256x32xbf16>
    %252 = vector.shape_cast %251 : vector<1x256x32xbf16> to vector<256x32xbf16>
    %cst_96 = arith.constant dense<0.000000e+00> : vector<8x32xf32>
    %253 = tpu.matmul %250, %252, %cst_96 {dimension_numbers = #tpu.dot_dimension_numbers<[1], [0], [0], [1], [0, 0, 1, 1], [], []>} : vector<8x256xbf16>, vector<256x32xbf16>, vector<8x32xf32> -> vector<8x32xf32>
    %c1_97 = arith.constant 1 : index
    %c0_98 = arith.constant 0 : index
    %c0_99 = arith.constant 0 : index
    %254 = vector.load %arg11[%c1_97, %c0_98, %c0_99] : memref<2x1x32xf32, #tpu.memory_space<vmem>>, vector<1x1x32xf32>
    %255 = vector.shape_cast %254 : vector<1x1x32xf32> to vector<1x32xf32>
    %256 = vector.broadcast %255 : vector<1x32xf32> to vector<8x32xf32>
    %257 = arith.addf %253, %256 : vector<8x32xf32>
    %258 = arith.addf %239, %257 : vector<8x32xf32>
    %c1_100 = arith.constant 1 : index
    %c0_101 = arith.constant 0 : index
    %c0_102 = arith.constant 0 : index
    %259 = vector.load %arg12[%c1_100, %c0_101, %c0_102] : memref<2x1x32xf32, #tpu.memory_space<vmem>>, vector<1x1x32xf32>
    %260 = vector.shape_cast %259 : vector<1x1x32xf32> to vector<1x32xf32>
    %c1_103 = arith.constant 1 : index
    %c0_104 = arith.constant 0 : index
    %c0_105 = arith.constant 0 : index
    %261 = vector.load %arg13[%c1_103, %c0_104, %c0_105] : memref<2x1x32xf32, #tpu.memory_space<vmem>>, vector<1x1x32xf32>
    %262 = vector.shape_cast %261 : vector<1x1x32xf32> to vector<1x32xf32>
    %cst_106 = arith.constant dense<0.000000e+00> : vector<8xf32>
    %263 = vector.multi_reduction <add>, %258, %cst_106 [1] : vector<8x32xf32> to vector<8xf32>
    %264 = vector.shape_cast %263 : vector<8xf32> to vector<8x1xf32>
    %cst_107 = arith.constant 3.200000e+01 : f32
    %265 = vector.broadcast %cst_107 : f32 to vector<8x1xf32>
    %266 = arith.divf %264, %265 : vector<8x1xf32>
    %267 = vector.broadcast %266 : vector<8x1xf32> to vector<8x32xf32>
    %268 = arith.subf %258, %267 : vector<8x32xf32>
    %269 = arith.mulf %268, %268 : vector<8x32xf32>
    %cst_108 = arith.constant dense<0.000000e+00> : vector<8xf32>
    %270 = vector.multi_reduction <add>, %269, %cst_108 [1] : vector<8x32xf32> to vector<8xf32>
    %271 = vector.shape_cast %270 : vector<8xf32> to vector<8x1xf32>
    %cst_109 = arith.constant 3.200000e+01 : f32
    %272 = vector.broadcast %cst_109 : f32 to vector<8x1xf32>
    %273 = arith.divf %271, %272 : vector<8x1xf32>
    %274 = vector.broadcast %266 : vector<8x1xf32> to vector<8x32xf32>
    %275 = arith.subf %258, %274 : vector<8x32xf32>
    %cst_110 = arith.constant 9.99999974E-6 : f32
    %276 = vector.broadcast %cst_110 : f32 to vector<8x1xf32>
    %277 = arith.addf %273, %276 : vector<8x1xf32>
    %278 = math.rsqrt %277 : vector<8x1xf32>
    %279 = vector.broadcast %278 : vector<8x1xf32> to vector<8x32xf32>
    %280 = arith.mulf %275, %279 : vector<8x32xf32>
    %281 = vector.broadcast %260 : vector<1x32xf32> to vector<8x32xf32>
    %282 = arith.mulf %280, %281 : vector<8x32xf32>
    %283 = vector.broadcast %262 : vector<1x32xf32> to vector<8x32xf32>
    %284 = arith.addf %282, %283 : vector<8x32xf32>
    %285 = arith.truncf %284 : vector<8x32xf32> to vector<8x32xbf16>
    %c0_111 = arith.constant 0 : index
    %c0_112 = arith.constant 0 : index
    %286 = vector.load %arg14[%c0_111, %c0_112] : memref<32x64xbf16, #tpu.memory_space<vmem>>, vector<32x64xbf16>
    %cst_113 = arith.constant dense<0.000000e+00> : vector<8x64xf32>
    %287 = tpu.matmul %285, %286, %cst_113 {dimension_numbers = #tpu.dot_dimension_numbers<[1], [0], [0], [1], [0, 0, 1, 1], [], []>} : vector<8x32xbf16>, vector<32x64xbf16>, vector<8x64xf32> -> vector<8x64xf32>
    %c0_114 = arith.constant 0 : index
    %c0_115 = arith.constant 0 : index
    %288 = vector.load %arg15[%c0_114, %c0_115] : memref<1x64xf32, #tpu.memory_space<vmem>>, vector<1x64xf32>
    %289 = vector.broadcast %288 : vector<1x64xf32> to vector<8x64xf32>
    %290 = arith.addf %287, %289 : vector<8x64xf32>
    %cst_116 = arith.constant 0.000000e+00 : f32
    %291 = vector.broadcast %cst_116 : f32 to vector<8x64xf32>
    %292 = arith.maximumf %290, %291 : vector<8x64xf32>
    %293 = arith.truncf %292 : vector<8x64xf32> to vector<8x64xbf16>
    %c0_117 = arith.constant 0 : index
    %c0_118 = arith.constant 0 : index
    %294 = vector.load %arg16[%c0_117, %c0_118] : memref<64x128xbf16, #tpu.memory_space<vmem>>, vector<64x128xbf16>
    %cst_119 = arith.constant dense<0.000000e+00> : vector<8x128xf32>
    %295 = tpu.matmul %293, %294, %cst_119 {dimension_numbers = #tpu.dot_dimension_numbers<[1], [0], [0], [1], [0, 0, 1, 1], [], []>} : vector<8x64xbf16>, vector<64x128xbf16>, vector<8x128xf32> -> vector<8x128xf32>
    %c0_120 = arith.constant 0 : index
    %c0_121 = arith.constant 0 : index
    %296 = vector.load %arg17[%c0_120, %c0_121] : memref<1x128xf32, #tpu.memory_space<vmem>>, vector<1x128xf32>
    %297 = vector.broadcast %296 : vector<1x128xf32> to vector<8x128xf32>
    %298 = arith.addf %295, %297 : vector<8x128xf32>
    %299 = arith.mulf %298, %298 : vector<8x128xf32>
    %cst_122 = arith.constant dense<0.000000e+00> : vector<8xf32>
    %300 = vector.multi_reduction <add>, %299, %cst_122 [1] : vector<8x128xf32> to vector<8xf32>
    %301 = vector.shape_cast %300 : vector<8xf32> to vector<8x1xf32>
    %cst_123 = arith.constant 1.000000e-24 : f32
    %302 = vector.broadcast %cst_123 : f32 to vector<8x1xf32>
    %303 = arith.maximumf %301, %302 : vector<8x1xf32>
    %304 = math.rsqrt %303 : vector<8x1xf32>
    %305 = vector.broadcast %304 : vector<8x1xf32> to vector<8x128xf32>
    %306 = arith.mulf %298, %305 : vector<8x128xf32>
    %c0_124 = arith.constant 0 : index
    %c0_125 = arith.constant 0 : index
    %307 = vector.load %arg18[%c0_124, %c0_125] : memref<8x128xf32, #tpu.memory_space<vmem>>, vector<8x128xf32>
    tpu.vector_store %arg18[%c0_124, %c0_125], %306 {strides = array<i32>} : memref<8x128xf32, #tpu.memory_space<vmem>>, vector<8x128xf32>,
    return
  }
  func.func @transform_0(%arg0: i32) -> (i32, i32) {
    %c0_i32 = arith.constant 0 : i32
    %c0_i32_0 = arith.constant 0 : i32
    return %arg0, %c0_i32 : i32, i32
  }
  func.func @transform_1(%arg0: i32) -> (i32, i32, i32) {
    %c0_i32 = arith.constant 0 : i32
    %c0_i32_0 = arith.constant 0 : i32
    %c0_i32_1 = arith.constant 0 : i32
    %c0_i32_2 = arith.constant 0 : i32
    return %c0_i32, %c0_i32_0, %c0_i32_1 : i32, i32, i32
  }
  func.func @transform_2(%arg0: i32) -> (i32, i32, i32) {
    %c0_i32 = arith.constant 0 : i32
    %c0_i32_0 = arith.constant 0 : i32
    %c0_i32_1 = arith.constant 0 : i32
    %c0_i32_2 = arith.constant 0 : i32
    return %c0_i32, %c0_i32_0, %c0_i32_1 : i32, i32, i32
  }
  func.func @transform_3(%arg0: i32) -> (i32, i32, i32) {
    %c0_i32 = arith.constant 0 : i32
    %c0_i32_0 = arith.constant 0 : i32
    %c0_i32_1 = arith.constant 0 : i32
    %c0_i32_2 = arith.constant 0 : i32
    return %c0_i32, %c0_i32_0, %c0_i32_1 : i32, i32, i32
  }
  func.func @transform_4(%arg0: i32) -> (i32, i32, i32) {
    %c0_i32 = arith.constant 0 : i32
    %c0_i32_0 = arith.constant 0 : i32
    %c0_i32_1 = arith.constant 0 : i32
    %c0_i32_2 = arith.constant 0 : i32
    return %c0_i32, %c0_i32_0, %c0_i32_1 : i32, i32, i32
  }
  func.func @transform_5(%arg0: i32) -> (i32, i32, i32) {
    %c0_i32 = arith.constant 0 : i32
    %c0_i32_0 = arith.constant 0 : i32
    %c0_i32_1 = arith.constant 0 : i32
    %c0_i32_2 = arith.constant 0 : i32
    return %c0_i32, %c0_i32_0, %c0_i32_1 : i32, i32, i32
  }
  func.func @transform_6(%arg0: i32) -> (i32, i32, i32) {
    %c0_i32 = arith.constant 0 : i32
    %c0_i32_0 = arith.constant 0 : i32
    %c0_i32_1 = arith.constant 0 : i32
    %c0_i32_2 = arith.constant 0 : i32
    return %c0_i32, %c0_i32_0, %c0_i32_1 : i32, i32, i32
  }
  func.func @transform_7(%arg0: i32) -> (i32, i32, i32) {
    %c0_i32 = arith.constant 0 : i32
    %c0_i32_0 = arith.constant 0 : i32
    %c0_i32_1 = arith.constant 0 : i32
    %c0_i32_2 = arith.constant 0 : i32
    return %c0_i32, %c0_i32_0, %c0_i32_1 : i32, i32, i32
  }
  func.func @transform_8(%arg0: i32) -> (i32, i32, i32) {
    %c0_i32 = arith.constant 0 : i32
    %c0_i32_0 = arith.constant 0 : i32
    %c0_i32_1 = arith.constant 0 : i32
    %c0_i32_2 = arith.constant 0 : i32
    return %c0_i32, %c0_i32_0, %c0_i32_1 : i32, i32, i32
  }
  func.func @transform_9(%arg0: i32) -> (i32, i32, i32) {
    %c0_i32 = arith.constant 0 : i32
    %c0_i32_0 = arith.constant 0 : i32
    %c0_i32_1 = arith.constant 0 : i32
    %c0_i32_2 = arith.constant 0 : i32
    return %c0_i32, %c0_i32_0, %c0_i32_1 : i32, i32, i32
  }
  func.func @transform_10(%arg0: i32) -> (i32, i32, i32) {
    %c0_i32 = arith.constant 0 : i32
    %c0_i32_0 = arith.constant 0 : i32
    %c0_i32_1 = arith.constant 0 : i32
    %c0_i32_2 = arith.constant 0 : i32
    return %c0_i32, %c0_i32_0, %c0_i32_1 : i32, i32, i32
  }
  func.func @transform_11(%arg0: i32) -> (i32, i32, i32) {
    %c0_i32 = arith.constant 0 : i32
    %c0_i32_0 = arith.constant 0 : i32
    %c0_i32_1 = arith.constant 0 : i32
    %c0_i32_2 = arith.constant 0 : i32
    return %c0_i32, %c0_i32_0, %c0_i32_1 : i32, i32, i32
  }
  func.func @transform_12(%arg0: i32) -> (i32, i32, i32) {
    %c0_i32 = arith.constant 0 : i32
    %c0_i32_0 = arith.constant 0 : i32
    %c0_i32_1 = arith.constant 0 : i32
    %c0_i32_2 = arith.constant 0 : i32
    return %c0_i32, %c0_i32_0, %c0_i32_1 : i32, i32, i32
  }
  func.func @transform_13(%arg0: i32) -> (i32, i32) {
    %c0_i32 = arith.constant 0 : i32
    %c0_i32_0 = arith.constant 0 : i32
    %c0_i32_1 = arith.constant 0 : i32
    return %c0_i32, %c0_i32_0 : i32, i32
  }
  func.func @transform_14(%arg0: i32) -> (i32, i32) {
    %c0_i32 = arith.constant 0 : i32
    %c0_i32_0 = arith.constant 0 : i32
    %c0_i32_1 = arith.constant 0 : i32
    return %c0_i32, %c0_i32_0 : i32, i32
  }
  func.func @transform_15(%arg0: i32) -> (i32, i32) {
    %c0_i32 = arith.constant 0 : i32
    %c0_i32_0 = arith.constant 0 : i32
    %c0_i32_1 = arith.constant 0 : i32
    return %c0_i32, %c0_i32_0 : i32, i32
  }
  func.func @transform_16(%arg0: i32) -> (i32, i32) {
    %c0_i32 = arith.constant 0 : i32
    %c0_i32_0 = arith.constant 0 : i32
    %c0_i32_1 = arith.constant 0 : i32
    return %c0_i32, %c0_i32_0 : i32, i32
  }
  func.func @transform_17(%arg0: i32) -> (i32, i32) {
    %c0_i32 = arith.constant 0 : i32
    %c0_i32_0 = arith.constant 0 : i32
    return %arg0, %c0_i32 : i32, i32
  }
}

</mosaic_0001>

<bundles_post_ra>
// kernel: tpu_custom_call.1
= control target key start
LH: loop header
LB: loop body
LE: loop exit
PB: predicated region body
PF: predicated region fallthrough
CT: control target
= control target key end

     0   :  { %s3929_s0 = inlined_call_operand.vmem [shape: f32[16,32], index: 0, kind: input, shape index: {}]   ;;  %s3930_s1 = inlined_call_operand.vmem [shape: bf16[2,32,96], index: 1, kind: input, shape index: {}]   ;;  %s3931_s2 = inlined_call_operand.vmem [shape: f32[2,1,96], index: 2, kind: input, shape index: {}]   ;;  %s3932_s3 = inlined_call_operand.vmem [shape: bf16[2,32,32], index: 3, kind: input, shape index: {}]   ;;  %s3933_s4 = inlined_call_operand.vmem [shape: f32[2,1,32], index: 4, kind: input, shape index: {}]   ;;  %s3934_s5 = inlined_call_operand.vmem [shape: f32[2,1,32], index: 5, kind: input, shape index: {}]   ;;  %s3935_s6 = inlined_call_operand.vmem [shape: f32[2,1,32], index: 6, kind: input, shape index: {}]   ;;  %s3936_s7 = inlined_call_operand.vmem [shape: bf16[2,32,256], index: 7, kind: input, shape index: {}]   ;;  %s3937_s8 = inlined_call_operand.vmem [shape: f32[2,1,256], index: 8, kind: input, shape index: {}]   ;;  %s3938_s9 = inlined_call_operand.vmem [shape: bf16[2,256,32], index: 9, kind: input, shape index: {}]   ;;  %s3939_s10 = inlined_call_operand.vmem [shape: f32[2,1,32], index: 10, kind: input, shape index: {}]   ;;  %s3940_s11 = inlined_call_operand.vmem [shape: f32[2,1,32], index: 11, kind: input, shape index: {}]   ;;  %s3941_s12 = inlined_call_operand.vmem [shape: f32[2,1,32], index: 12, kind: input, shape index: {}]   ;;  %s3942_s13 = inlined_call_operand.vmem [shape: bf16[32,64], index: 13, kind: input, shape index: {}]   ;;  %s3943_s14 = inlined_call_operand.vmem [shape: f32[1,64], index: 14, kind: input, shape index: {}]   ;;  %s3944_s15 = inlined_call_operand.vmem [shape: bf16[64,128], index: 15, kind: input, shape index: {}]   ;;  %s3945_s16 = inlined_call_operand.vmem [shape: f32[1,128], index: 16, kind: input, shape index: {}]   ;;  %s3946_s17 = inlined_call_operand.hbm [shape: f32[16,128], index: 17, kind: output, shape index: {}]  }
   0x1   :  { %3966 = sst [smem:[#allocation10_spill]] %s3929_s0 }
   0x2   :  { %3967 = sst [smem:[#allocation11_spill]] %s3930_s1 }
   0x3   :  { %3968 = sst [smem:[#allocation12_spill]] %s3931_s2 }
   0x4   :  { %22 = vsyncpa [#allocation3], 0 }
   0x5   :  { %24 = vsyncpa [#allocation3 + $0x1], 0  ;;  %s3380_s24 = smov 0   ;;  %s3382_s25 = smov 0  }
   0x6   :  { %s3384_s26 = smov 0   ;;  %s3386_s27 = smov 0  }
   0x7 LB: > { %3969 = sst [smem:[#allocation5_spill]] %s3264_s24  ;;  %s3401_s28 = sadd.s32 4294967295, %s3276_s27   ;;  %s3276_s27 = sphi %s3386_s27, %s3989_s27   ;;  %s3272_s26 = sphi %s3384_s26, %s3991_s26   ;;  %s3268_s25 = sphi %s3382_s25, %s3993_s25   ;;  %s3264_s24 = sphi %s3380_s24, %s3992_s24  }
   0x8   : > { %3970 = sst [smem:[#allocation6_spill]] %s3272_s26  ;;  %s2664_s29 = sadd.s32 4294967294, %s3276_s27  }
   0x9   : > { %s3405_s0 = sadd.s32 1, %s3276_s27   ;;  %s399_s30 = sadd.s32 1, %s3272_s26 }
   0xa   : > { %3971 = sst [smem:[#allocation7_spill]] %s3405_s0  ;;  %s396_s18 = ssub.s32 %s3276_s27, %s3405_s0 }
   0xb   : > { %p409_p0 = scmp.ne.s32.totalorder %s3272_s26, %s3268_s25  ;;  %p397_p1 = scmp.eq.s32.totalorder %s396_s18, 0 }
   0xc   : > { %p410_p2 = scmp.eq.s32.totalorder %s3401_s28, 1  ;;  %p415_p3 = scmp.ne.s32.totalorder %s3268_s25, %s3264_s24 }
   0xd   : > { %p416_p4 = scmp.eq.s32.totalorder %s2664_s29, 1  ;;  %p2667_p7 = scmp.ge.s32.totalorder %s3276_s27, 1 }
   0xe   : > { %s3416_s19 = scalar_select %p397_p1, %s3272_s26, %s399_s30  }
   0xf   : > { %p3418_p5 = por %p410_p2, %p409_p0  ;;  %p3422_p6 = por %p416_p4, %p415_p3 }
  0x10   : > { %3972 = sst [smem:[#allocation8_spill]] %s3416_s19  ;;  %p489_p8 = scmp.lt.s32.totalorder %s3276_s27, 3 }
  0x11   : > { %s3974_s20 = scalar_select %p3422_p6, 1, 0 }
  0x12   : > { %p490_p9 = pnand %p2667_p7, %p489_p8 }
  0x13   : > { %3975 = sst [smem:[#allocation9_spill]] %s3974_s20  ;;  %s3976_s23 = sld [smem:[#allocation11_spill]] (!%p490_p9)  ;;  %v3278_v1 = vmov (!%p490_p9), 0.0   ;;  %vm3279_vm0 = vmmov (!%p490_p9), 0   ;;  %vm570_vm1 = vcmask (!%p490_p9), 261120   ;;  %vm646_vm2 = vcmask (!%p490_p9), 64512  }
  0x14   : > { %493 = sbr.rel (%p490_p9) target bundleno = 5851 (0x16db), region = 88  ;;  %2916 = vmatprep.subr.bf16.mxu0 (!%p490_p9), %v3278_v1  ;;  %2924 = vmatprep.subr.bf16.mxu1 (!%p490_p9), %v3278_v1  ;;  %p540_p10 = scmp.lt.s32.totalorder (!%p490_p9), %s3401_s28, 1  ;;  %vm893_vm3 = vcmask (!%p490_p9), 1043456   ;;  %vm1094_vm4 = vcmask (!%p490_p9), 130048   ;;  %vm1096_vm5 = vcmask (!%p490_p9), 195584   ;;  %vm2540_vm6 = vcmask (!%p490_p9), 523264  }
  0x15   : > { %2920 = vmatprep.mubr.msk.bf16.mxu0 (!%p490_p9), %vm3279_vm0, %v3278_v1  ;;  %2926 = vmatprep.mubr.msk.bf16.mxu1 (!%p490_p9), %vm3279_vm0, %v3278_v1  ;;  %s3977_s26 = sld [smem:[#allocation10_spill]] (!%p490_p9)  ;;  %s3978_s2 = sld [smem:[#allocation12_spill]] (!%p490_p9) }
  0x16   : > { %s3962_s19 = smov (!%p490_p9), 112   ;;  %s3958_s22 = smov (!%p490_p9), 24  }
  0x17   : > { %s3979_s30 = smov (!%p490_p9), 112   ;;  %s3982_s29 = smov (!%p490_p9), 96  }
  0x18   : > { %s3984_s20 = smov (!%p490_p9), 8  }
  0x19   : > { %v3114_v0 = vld [vmem:[%s3976_s23] sm:$0xff] (!%p490_p9)   ;;  %v3115_v2 = vld [vmem:[%s3976_s23 + $0x8] sm:$0xff] (!%p490_p9)  }
  0x1a   : > { %2917 = vmatpush3.bf16.msra.mxu0 (!%p490_p9), %v3114_v0 }
  0x1b   : > { %2918 = vmatprep.subr.bf16.mxu0 %v3278_v1  ;;  %s541_s18 = scalar_select %p540_p10, %s3401_s28, 1  ;;  %v2670_v5 = vld [vmem:[%s3978_s2] ss:$0 sm:$0xff] }
  0x1d   : > { %s2669_s21 = sshll.u32 %s541_s18, 3  ;;  %s3953_s18 = smov 96  }
  0x1e   : > { %2919 = vmatpush3.bf16.msra.mxu0 %v3115_v2  ;;  %s543_s0 = scalar_lea.vmem %s3977_s26, %s2669_s21  ;;  %s3955_s26 = smov 104  }
  0x1f   : > { %2930 = vmatprep.subr.bf16.mxu0 %v3278_v1  ;;  %v3447_v3 = vld [vmem:[%s543_s0] sm:$0xff]  ;;  %s3960_s0 = smov 120   ;;  %s3951_s21 = smov 64  }
  0x20   : > { %v546_v4 = vpack.c.bf16 %v3447_v3, %v3447_v3 }
  0x22   : > { %2921 = vmatmul.mubr.msk.bf16.vlgmr.msra.gmra.mrb[0].mxu0 %vm570_vm1, %v546_v4 }
  0x23   : > { %2932 = vmatprep.mubr.msk.bf16.mxu0 %vm3279_vm0, %v3278_v1 }
  0xf5   : > { %v608_v6 = vpop.f32.mrb[0].mxu0 }
  0xf6   : > { %v609_v7 = vadd.f32 %v2670_v5, %v608_v6  ;;  %v2922_v8 = vpop.f32.mrb[1].mxu0 }
  0xf7   : > { %v611_v9 = vpop.f32.mrb[2].mxu0 }
  0xf8   : > { %636 = vrot.lane.b32.xlu1 %v609_v7, %s3955_s26  ;;  %630 = vrot.lane.b32.xlu0 %v609_v7, %s3960_s0  ;;  %v2923_v10 = vpop.f32.mrb[3].mxu0  ;;  %v3459_v11 = vpack.c.bf16 %v609_v7, %v609_v7  ;;  %v614_v12 = vmul.f32 0.35355338, %v609_v7 }
  0xfa   : > { %v625_v21 = vpack.c.bf16 %v614_v12, %v614_v12 }
  0xfc   : > { %633 = vrot.lane.b32.xlu0 %v609_v7, %s3962_s19  ;;  %644 = vrot.lane.b32.xlu1 %v3459_v11, %s3953_s18 }
 0x100   : > { %616 = vrot.lane.b32.xlu1 %v614_v12, %s3960_s0 }
 0x16a   : > { %v637_v13 = vpop.permute.xlu1 %636  ;;  %v631_v14 = vpop.permute.xlu0 %630 }
 0x16b   : > { %v3465_v15 = vpack.c.bf16 %v637_v13, %v637_v13  ;;  %v3467_v16 = vpack.c.bf16 %v631_v14, %v631_v14 }
 0x16d   : > { %694 = vrot.lane.b32.xlu0 %v3467_v16, %s3953_s18  ;;  %792 = vrot.lane.b32.xlu1 %v3465_v15, %s3953_s18 }
 0x16e   : > { %v634_v17 = vpop.permute.xlu0 %633  ;;  %v645_v18 = vpop.permute.xlu1 %644 }
 0x16f   : > { %v3473_v19 = vpack.c.bf16 %v634_v17, %v634_v17  ;;  %v651_v20 = vsel %vm646_vm2, %v645_v18, 0 }
 0x170   : > { %2925 = vmatpush3.bf16.xpose.msra.mxu1 %v651_v20 }
 0x171   : > { %743 = vrot.lane.b32.xlu0 %v3473_v19, %s3953_s18  ;;  %622 = vrot.lane.b32.xlu1 %v614_v12, %s3955_s26  ;;  %s3959_s18 = smov 8   ;;  %s3957_s26 = smov 16  }
 0x172   : > { %2936 = vmatprep.subr.bf16.mxu1 %v3278_v1  ;;  %v617_v24 = vpop.permute.xlu1 %616 }
 0x173   : > { %v626_v28 = vpack.c.bf16 %v617_v24, %v617_v24 }
 0x175   : > { %619 = vrot.lane.b32.xlu0 %v614_v12, %s3962_s19 }
 0x177   : > { %2927 = vmatmul.mubr.msk.bf16.vlgmr.msra.gmra.mrb[0].mxu1 %vm646_vm2, %v625_v21 }
 0x178   : > { %2938 = vmatprep.mubr.msk.bf16.mxu1 %vm3279_vm0, %v3278_v1 }
 0x1df   : > { %v695_v22 = vpop.permute.xlu0 %694  ;;  %v793_v27 = vpop.permute.xlu1 %792 }
 0x1e0   : > { %v700_v23 = vsel %vm646_vm2, %v695_v22, 0  ;;  %v798_v30 = vsel %vm646_vm2, %v793_v27, 0 }
 0x1e1   : > { %2931 = vmatpush3.bf16.xpose.msra.mxu0 %v700_v23 }
 0x1e2   : > { %2942 = vmatprep.subr.bf16.mxu0 %v3278_v1 }
 0x1e3   : > { %v744_v25 = vpop.permute.xlu0 %743  ;;  %v623_v32 = vpop.permute.xlu1 %622 }
 0x1e4   : > { %v749_v26 = vsel %vm646_vm2, %v744_v25, 0  ;;  %v628_v33 = vpack.c.bf16 %v623_v32, %v623_v32 }
 0x1e5   : > { %2937 = vmatpush3.bf16.xpose.msra.mxu1 %v749_v26 }
 0x1e6   : > { %2948 = vmatprep.subr.bf16.mxu1 %v3278_v1 }
 0x1e7   : > { %v620_v29 = vpop.permute.xlu0 %619 }
 0x1e8   : > { %2933 = vmatmul.mubr.msk.bf16.vlgmr.msra.gmra.mrb[4].mxu0 %vm646_vm2, %v626_v28  ;;  %v627_v31 = vpack.c.bf16 %v620_v29, %v620_v29 }
 0x1e9   : > { %2943 = vmatpush3.bf16.xpose.msra.mxu0 %v798_v30  ;;  %2944 = vmatprep.mubr.msk.bf16.mxu0 %vm3279_vm0, %v3278_v1 }
 0x1ea   : > { %2954 = vmatprep.subr.bf16.mxu0 %v3278_v1 }
 0x1ec   : > { %2939 = vmatmul.mubr.msk.bf16.vlgmr.msra.gmra.mrb[4].mxu1 %vm646_vm2, %v627_v31 }
 0x1ed   : > { %2950 = vmatprep.mubr.msk.bf16.mxu1 %vm3279_vm0, %v3278_v1 }
 0x1f0   : > { %2945 = vmatmul.mubr.msk.bf16.vlgmr.msra.gmra.mrb[8].mxu0 %vm646_vm2, %v628_v33 }
 0x1f1   : > { %2956 = vmatprep.mubr.msk.bf16.mxu0 %vm3279_vm0, %v3278_v1 }
 0x24a   : > { %v687_v34 = vpop.f32.mrb[0].mxu1 }
 0x24b   : > { %v2928_v35 = vpop.f32.mrb[1].mxu1  ;;  %v840_v36 = vsel %vm646_vm2, %v687_v34, -inf }
 0x24c   : > { %841 = vmax.xlane.f32.xlu0 %v840_v36  ;;  %v690_v37 = vpop.f32.mrb[2].mxu1 }
 0x24d   : > { %v2929_v38 = vpop.f32.mrb[3].mxu1 }
 0x2bb   : > { %v736_v39 = vpop.f32.mrb[4].mxu0 }
 0x2bc   : > { %v2934_v40 = vpop.f32.mrb[5].mxu0  ;;  %v843_v41 = vsel %vm646_vm2, %v736_v39, -inf }
 0x2bd   : > { %844 = vmax.xlane.f32.xlu1 %v843_v41  ;;  %v739_v42 = vpop.f32.mrb[6].mxu0  ;;  %v3116_v40 = vld [vmem:[%s3932_s3] sm:$0xff]   ;;  %v3117_v41 = vld [vmem:[%s3932_s3 + $0x8] sm:$0xff]  }
 0x2be   : > { %v2935_v43 = vpop.f32.mrb[7].mxu0 }
 0x2bf   : > { %v785_v44 = vpop.f32.mrb[4].mxu1 }
 0x2c0   : > { %v2940_v45 = vpop.f32.mrb[5].mxu1  ;;  %v846_v46 = vsel %vm646_vm2, %v785_v44, -inf }
 0x2c1   : > { %847 = vmax.xlane.f32.xlu0 %v846_v46  ;;  %v788_v47 = vpop.f32.mrb[6].mxu1 }
 0x2c2   : > { %v2941_v48 = vpop.f32.mrb[7].mxu1 }
 0x2c3   : > { %v834_v49 = vpop.f32.mrb[8].mxu0 }
 0x2c4   : > { %v2946_v50 = vpop.f32.mrb[9].mxu0  ;;  %v849_v51 = vsel %vm646_vm2, %v834_v49, -inf }
 0x2c5   : > { %850 = vmax.xlane.f32.xlu0 %v849_v51  ;;  %v837_v52 = vpop.f32.mrb[10].mxu0 }
 0x2c6   : > { %v2947_v53 = vpop.f32.mrb[11].mxu0 }
 0x2ce   : > { %888 = vrot.lane.b32.xlu1 %v3459_v11, %s3951_s21 }
 0x2d9   : > { %v842_v54 = vpop.xlane.xlu0 %841 }
 0x2da   : > { %v852_v55 = vsub.f32 %v687_v34, %v842_v54 }
 0x2dc   : > { %v856_v56 = vmul.f32 1.442695, %v852_v55 }
 0x2de   : > { %3172 = vpow2.f32 %v856_v56 }
 0x2e8   : > { %v3173_v57 = vpop.eup %3172 }
 0x2e9   : > { %v864_v58 = vsel %vm646_vm2, %v3173_v57, 0.0 }
 0x2f2   : > { %865 = vadd.xlane.f32.xlu1 %v864_v58 }
 0x34a   : > { %v845_v59 = vpop.xlane.xlu1 %844 }
 0x34b   : > { %v853_v60 = vsub.f32 %v736_v39, %v845_v59 }
 0x34d   : > { %v858_v61 = vmul.f32 1.442695, %v853_v60 }
 0x34e   : > { %v848_v62 = vpop.xlane.xlu0 %847  ;;  %v889_v63 = vpop.permute.xlu1 %888 }
 0x34f   : > { %3174 = vpow2.f32 %v858_v61  ;;  %v854_v0 = vsub.f32 %v785_v44, %v848_v62  ;;  %v895_v2 = vsel %vm893_vm3, %v889_v63, 0  ;;  %v2682_v61 = vld [vmem:[%s3933_s4] ss:$0 sm:$0xff] }
 0x350   : > { %2949 = vmatpush3.bf16.msra.mxu1 %v895_v2 }
 0x351   : > { %v860_v4 = vmul.f32 1.442695, %v854_v0  ;;  %2960 = vmatprep.subr.bf16.mxu1 %v3278_v1 }
 0x352   : > { %v851_v5 = vpop.xlane.xlu0 %850 }
 0x353   : > { %3176 = vpow2.f32 %v860_v4  ;;  %v855_v6 = vsub.f32 %v834_v49, %v851_v5 }
 0x355   : > { %v862_v7 = vmul.f32 1.442695, %v855_v6 }
 0x357   : > { %3178 = vpow2.f32 %v862_v7 }
 0x359   : > { %v3175_v8 = vpop.eup %3174 }
 0x35a   : > { %v867_v9 = vsel %vm646_vm2, %v3175_v8, 0.0 }
 0x35b   : > { %868 = vadd.xlane.f32.xlu0 %v867_v9 }
 0x35d   : > { %v3177_v10 = vpop.eup %3176 }
 0x35e   : > { %v870_v11 = vsel %vm646_vm2, %v3177_v10, 0.0 }
 0x35f   : > { %871 = vadd.xlane.f32.xlu1 %v870_v11 }
 0x361   : > { %v3179_v12 = vpop.eup %3178 }
 0x362   : > { %v873_v13 = vsel %vm646_vm2, %v3179_v12, 0.0 }
 0x363   : > { %874 = vadd.xlane.f32.xlu0 %v873_v13  ;;  %v3118_v13 = vld [vmem:[%s3936_s7] ss:$8 sps:$4 sm:$0xff]  }
 0x370   : > { %985 = vrot.lane.b32.xlu1 %v3473_v19, %s3951_s21 }
 0x374   : > { %1033 = vrot.lane.b32.xlu1 %v3465_v15, %s3951_s21 }
 0x379   : > { %937 = vrot.lane.b32.xlu0 %v3467_v16, %s3951_s21  ;;  %s3981_s21 = smov 104  }
 0x37f   : > { %v866_v14 = vpop.xlane.xlu1 %865 }
 0x380   : > { %3180 = vrcp.f32 %v866_v14  ;;  %v3123_v14 = vld [vmem:[%s3936_s7 + $0x14] ss:$8 sps:$4 sm:$0xff]  }
 0x38a   : > { %v3181_v17 = vpop.eup %3180 }
 0x38b   : > { %v880_v18 = vmul.f32 %v3181_v17, %v3173_v57  ;;  %v3288_v17 = vmov 0  }
 0x38d   : > { %v884_v20 = vpack.c.bf16 %v880_v18, %v880_v18  ;;  %v3124_v18 = vld [vmem:[%s3938_s9 + $0x40] sm:$0xff]  }
 0x38f   : > { %2951 = vmatmul.mubr.msk.bf16.vlgmr.msra.gmra.mrb[8].mxu1 %vm646_vm2, %v884_v20  ;;  %v3125_v20 = vld [vmem:[%s3938_s9] sm:$0xff]  }
 0x390   : > { %2962 = vmatprep.mubr.msk.bf16.mxu1 %vm3279_vm0, %v3278_v1 }
 0x3e8   : > { %v869_v21 = vpop.xlane.xlu0 %868 }
 0x3e9   : > { %3182 = vrcp.f32 %v869_v21  ;;  %v3126_v21 = vld [vmem:[%s3938_s9 + $0x48] sm:$0xff]  }
 0x3ec   : > { %v872_v22 = vpop.xlane.xlu1 %871 }
 0x3ed   : > { %3184 = vrcp.f32 %v872_v22  ;;  %v3127_v22 = vld [vmem:[%s3938_s9 + $0x8] sm:$0xff]  }
 0x3f0   : > { %v986_v19 = vpop.permute.xlu1 %985  ;;  %v875_v23 = vpop.xlane.xlu0 %874 }
 0x3f1   : > { %v991_v15 = vsel %vm893_vm3, %v986_v19, 0  ;;  %3186 = vrcp.f32 %v875_v23  ;;  %v3128_v19 = vld [vmem:[%s3938_s9 + $0x50] sm:$0xff]  }
 0x3f2   : > { %2961 = vmatpush3.bf16.msra.mxu1 %v991_v15  ;;  %v3129_v23 = vld [vmem:[%s3938_s9 + $0x10] sm:$0xff]   ;;  %v3130_v15 = vld [vmem:[%s3938_s9 + $0x58] sm:$0xff]  }
 0x3f3   : > { %v3183_v16 = vpop.eup %3182  ;;  %2972 = vmatprep.subr.bf16.mxu1 %v3278_v1 }
 0x3f4   : > { %v881_v24 = vmul.f32 %v3183_v16, %v3175_v8  ;;  %v938_v25 = vpop.permute.xlu0 %937  ;;  %v1034_v27 = vpop.permute.xlu1 %1033  ;;  %v3131_v16 = vld [vmem:[%s3938_s9 + $0x18] sm:$0xff]  }
 0x3f5   : > { %v943_v26 = vsel %vm893_vm3, %v938_v25, 0  ;;  %v1039_v31 = vsel %vm893_vm3, %v1034_v27, 0  ;;  %v3133_v25 = vld [vmem:[%s3938_s9 + $0x20] sm:$0xff]   ;;  %v3135_v27 = vld [vmem:[%s3938_s9 + $0x28] sm:$0xff]  }
 0x3f6   : > { %2955 = vmatpush3.bf16.msra.mxu0 %v943_v26  ;;  %v885_v28 = vpack.c.bf16 %v881_v24, %v881_v24  ;;  %v3132_v24 = vld [vmem:[%s3938_s9 + $0x60] sm:$0xff]   ;;  %v3134_v26 = vld [vmem:[%s3938_s9 + $0x68] sm:$0xff]  }
 0x3f7   : > { %v3185_v29 = vpop.eup %3184  ;;  %2966 = vmatprep.subr.bf16.mxu0 %v3278_v1 }
 0x3f8   : > { %v882_v30 = vmul.f32 %v3185_v29, %v3177_v10 }
 0x3f9   : > { %2957 = vmatmul.mubr.msk.bf16.vlgmr.msra.gmra.mrb[12].mxu0 %vm646_vm2, %v885_v28 }
 0x3fa   : > { %2967 = vmatpush3.bf16.msra.mxu0 %v1039_v31  ;;  %v886_v32 = vpack.c.bf16 %v882_v30, %v882_v30  ;;  %2968 = vmatprep.mubr.msk.bf16.mxu0 %vm3279_vm0, %v3278_v1 }
 0x3fb   : > { %v3187_v33 = vpop.eup %3186 }
 0x3fc   : > { %v883_v34 = vmul.f32 %v3187_v33, %v3179_v12  ;;  %2963 = vmatmul.mubr.msk.bf16.vlgmr.msra.gmra.mrb[12].mxu1 %vm646_vm2, %v886_v32  ;;  %v3120_v12 = vld [vmem:[%s3936_s7 + $0x4] ss:$8 sps:$4 sm:$0xff]   ;;  %v2686_v32 = vld [vmem:[%s3934_s5] ss:$0 sm:$0xff] }
 0x3fd   : > { %2976 = vmatprep.mubr.msk.bf16.mxu1 %vm3279_vm0, %v3278_v1  ;;  %2973 = vmatpush3.bf16.msra.mxu1 %v3116_v40  ;;  %v3138_v40 = vld [vmem:[%s3938_s9 + $0x78] sm:$0xff]  }
 0x3fe   : > { %v887_v35 = vpack.c.bf16 %v883_v34, %v883_v34  ;;  %2974 = vmatprep.subr.bf16.mxu1 %v3278_v1  ;;  %1236 = vmatprep.subr.bf16.mxu0 %v3120_v12  ;;  %v2687_v34 = vld [vmem:[%s3935_s6] ss:$0 sm:$0xff]  ;;  %v3141_v12 = vld [vmem:[%s3976_s23 + $0x18] sm:$0xff]  }
 0x401   : > { %2969 = vmatmul.mubr.msk.bf16.vlgmr.msra.gmra.mrb[16].mxu0 %vm646_vm2, %v887_v35  ;;  %2975 = vmatpush3.bf16.msra.mxu1 %v3117_v41  ;;  %v3139_v41 = vld [vmem:[%s3938_s9 + $0x38] sm:$0xff]  }
 0x402   : > { %1237 = vmatpush1.bf16.msra.mxu0 %v3118_v13  ;;  %1268 = vmatprep.mubr.bf16.mxu0 %v3288_v17 }
 0x403   : > { %1238 = vmatprep.subr.bf16.mxu0 %v3123_v14  ;;  %2842 = vmatprep.subr.bf16.mxu1 %v3124_v18 }
 0x462   : > { %v931_v36 = vpop.f32.mrb[8].mxu1 }
 0x463   : > { %v2952_v37 = vpop.f32.mrb[9].mxu1 }
 0x464   : > { %v934_v38 = vpop.f32.mrb[10].mxu1 }
 0x465   : > { %v2953_v39 = vpop.f32.mrb[11].mxu1  ;;  %v3136_v38 = vld [vmem:[%s3938_s9 + $0x70] sm:$0xff]  }
 0x466   : > { %v3137_v39 = vld [vmem:[%s3938_s9 + $0x30] sm:$0xff]  }
 0x4cc   : > { %v979_v42 = vpop.f32.mrb[12].mxu0 }
 0x4cd   : > { %1082 = vrot.lane.b32.xlu0 %v979_v42, %s3959_s18  ;;  %v2958_v43 = vpop.f32.mrb[13].mxu0  ;;  %v1203_v42 = vlaneseq  ;;  %s3983_s18 = smov 64  }
 0x4ce   : > { %v982_v44 = vpop.f32.mrb[14].mxu0 }
 0x4cf   : > { %v2959_v45 = vpop.f32.mrb[15].mxu0  ;;  %v1027_v46 = vpop.f32.mrb[12].mxu1  ;;  %v3624_v43 = vshrl.u32 %v1203_v42, 7 }
 0x4d0   : > { %1086 = vrot.lane.b32.xlu1 %v1027_v46, %s3957_s26  ;;  %v2964_v47 = vpop.f32.mrb[13].mxu1  ;;  %v1201_v45 = vld [vmem:[%s3937_s8] sm:$0x3]  ;;  %s3980_s26 = smov 120  }
 0x4d1   : > { %v1030_v48 = vpop.f32.mrb[14].mxu1  ;;  %v1205_v44 = vsub.s32 0, %v3624_v43  ;;  %v1209_v46 = vsub.s32 1, %v3624_v43 }
 0x4d2   : > { %v2965_v49 = vpop.f32.mrb[15].mxu1 }
 0x4d3   : > { %v1206_v47 = vrot.slane %v1201_v45, %v1205_v44  ;;  %v1210_v48 = vrot.slane %v1201_v45, %v1209_v46 }
 0x4d4   : > { %v1075_v50 = vpop.f32.mrb[16].mxu0 }
 0x4d5   : > { %1090 = vrot.lane.b32.xlu0 %v1075_v50, %s3958_s22  ;;  %v2970_v51 = vpop.f32.mrb[17].mxu0 }
 0x4d6   : > { %v1078_v52 = vpop.f32.mrb[18].mxu0 }
 0x4d7   : > { %v2971_v53 = vpop.f32.mrb[19].mxu0 }
 0x53f   : > { %v1083_v54 = vpop.permute.xlu0 %1082 }
 0x540   : > { %v1093_v56 = vsel %vm646_vm2, %v931_v36, %v1083_v54 }
 0x542   : > { %v1087_v55 = vpop.permute.xlu1 %1086 }
 0x543   : > { %v1095_v57 = vsel %vm1094_vm4, %v1093_v56, %v1087_v55 }
 0x547   : > { %v1091_v58 = vpop.permute.xlu0 %1090 }
 0x548   : > { %v1097_v59 = vsel %vm1096_vm5, %v1095_v57, %v1091_v58 }
 0x549   : > { %v1098_v60 = vpack.c.bf16 %v1097_v59, %v1097_v59 }
 0x54b   : > { %2977 = vmatmul.mubr.msk.bf16.vlgmr.msra.gmra.mrb[16].mxu1 %vm570_vm1, %v1098_v60  ;;  %v2693_v60 = vld [vmem:[%s3939_s10] ss:$0 sm:$0xff] }
 0x54c   : > { %2843 = vmatpush3.bf16.msra.mxu1 %v3125_v20  ;;  %v2710_v20 = vld [vmem:[%s3940_s11] ss:$0 sm:$0xff] }
 0x54d   : > { %2844 = vmatprep.subr.bf16.mxu1 %v3126_v21 }
 0x550   : > { %2845 = vmatpush3.bf16.msra.mxu1 %v3127_v22  ;;  %v2711_v22 = vld [vmem:[%s3941_s12] ss:$0 sm:$0xff] }
 0x551   : > { %2846 = vmatprep.subr.bf16.mxu1 %v3128_v19 }
 0x554   : > { %2847 = vmatpush3.bf16.msra.mxu1 %v3129_v23 }
 0x555   : > { %2848 = vmatprep.subr.bf16.mxu1 %v3130_v15 }
 0x558   : > { %2849 = vmatpush3.bf16.msra.mxu1 %v3131_v16  ;;  %v2717_v16 = vld [vmem:[%s3978_s2 + $0x1] ss:$0 sm:$0xff] }
 0x559   : > { %2850 = vmatprep.subr.bf16.mxu1 %v3132_v24 }
 0x55c   : > { %2851 = vmatpush3.bf16.msra.mxu1 %v3133_v25 }
 0x55d   : > { %2852 = vmatprep.subr.bf16.mxu1 %v3134_v26 }
 0x560   : > { %2853 = vmatpush3.bf16.msra.mxu1 %v3135_v27 }
 0x561   : > { %2854 = vmatprep.subr.bf16.mxu1 %v3136_v38 }
 0x564   : > { %2855 = vmatpush3.bf16.msra.mxu1 %v3137_v39 }
 0x565   : > { %2856 = vmatprep.subr.bf16.mxu1 %v3138_v40 }
 0x568   : > { %2857 = vmatpush3.bf16.msra.mxu1 %v3139_v41 }
 0x569   : > { %3006 = vmatprep.subr.bf16.mxu1 %v3278_v1 }
 0x61e   : > { %v1159_v62 = vpop.f32.mrb[16].mxu1 }
 0x61f   : > { %v1160_v63 = vadd.f32 %v2682_v61, %v1159_v62  ;;  %v2978_v0 = vpop.f32.mrb[17].mxu1 }
 0x620   : > { %v1162_v2 = vpop.f32.mrb[18].mxu1 }
 0x621   : > { %v2979_v4 = vpop.f32.mrb[19].mxu1  ;;  %v1165_v5 = vadd.f32 %v1160_v63, %v3447_v3  ;;  %v3121_v3 = vld [vmem:[%s3936_s7 + $0x10] ss:$8 sps:$4 sm:$0xff]  }
 0x622   : > { %1239 = vmatpush1.bf16.msra.mxu0 %v3121_v3 }
 0x623   : > { %v1168_v6 = vsel %vm570_vm1, %v1165_v5, 0.0  ;;  %2980 = vmatprep.subr.bf16.mxu0 %v3278_v1 }
 0x624   : > { %1169 = vadd.xlane.f32.xlu1 %v1168_v6 }
 0x6b1   : > { %v1170_v7 = vpop.xlane.xlu1 %1169 }
 0x6b2   : > { %v1172_v8 = vmul.f32 0.03125, %v1170_v7 }
 0x6b4   : > { %v1173_v9 = vsub.f32 %v1165_v5, %v1172_v8 }
 0x6b6   : > { %v1174_v10 = vmul.f32 %v1173_v9, %v1173_v9 }
 0x6b8   : > { %v1175_v11 = vsel %vm570_vm1, %v1174_v10, 0.0 }
 0x6b9   : > { %1176 = vadd.xlane.f32.xlu0 %v1175_v11  ;;  %v3140_v11 = vld [vmem:[%s3976_s23 + $0x10] sm:$0xff]  }
 0x746   : > { %v1177_v28 = vpop.xlane.xlu0 %1176 }
 0x747   : > { %v1178_v29 = vmul.f32 0.03125, %v1177_v28 }
 0x749   : > { %v1179_v30 = vadd.f32 1e-05, %v1178_v29 }
 0x74b   : > { %3188 = vrsqrt.f32 %v1179_v30 }
 0x755   : > { %v3189_v31 = vpop.eup %3188 }
 0x756   : > { %v1181_v33 = vmul.f32 %v3189_v31, %v1173_v9 }
 0x758   : > { %v1188_v35 = vmul.f32 %v2686_v32, %v1181_v33 }
 0x75a   : > { %v1195_v36 = vadd.f32 %v2687_v34, %v1188_v35 }
 0x75c   : > { %v1196_v37 = vpack.c.bf16 %v1195_v36, %v1195_v36 }
 0x75e   : > { %2692 = vmatmul.mubr.msk.bf16.vlgmr.msra.gmra.mrb[20].mxu0 %vm570_vm1, %v1196_v37 }
 0x75f   : > { %2984 = vmatprep.mubr.msk.bf16.mxu0 %vm3279_vm0, %v3278_v1  ;;  %2981 = vmatpush3.bf16.msra.mxu0 %v3140_v11 }
 0x760   : > { %2982 = vmatprep.subr.bf16.mxu0 %v3278_v1 }
 0x763   : > { %2983 = vmatpush3.bf16.msra.mxu0 %v3141_v12 }
 0x764   : > { %2988 = vmatprep.subr.bf16.mxu0 %v3278_v1 }
 0x831   : > { %v1270_v49 = vpop.f32.mrb[20].mxu0 }
 0x832   : > { %v1271_v50 = vadd.f32 %v1270_v49, %v1206_v47  ;;  %v1272_v51 = vpop.f32.mrb[21].mxu0 }
 0x833   : > { %v1273_v52 = vadd.f32 %v1272_v51, %v1210_v48  ;;  %v1274_v53 = vpop.f32.mrb[22].mxu0 }
 0x834   : > { %v1277_v54 = vmax.f32 %v1271_v50, 0.0  ;;  %v1275_v55 = vpop.f32.mrb[23].mxu0 }
 0x835   : > { %v1278_v56 = vmax.f32 %v1273_v52, 0.0 }
 0x836   : > { %v1279_v58 = vpack.c.bf16 %v1277_v54, %v1277_v54 }
 0x837   : > { %v1280_v57 = vpack.c.bf16 %v1278_v56, %v1278_v56 }
 0x839   : > { %1448 = vmatprep.mubr.bf16.mxu1 %v1280_v57 }
 0x83a   : > { %1449 = vmatmul.mubr.bf16.vlgmr.msra.gmra.mrb[20].mxu1 %v1279_v58 }
 0x83b   : > { %3008 = vmatprep.mubr.msk.bf16.mxu1 %vm3279_vm0, %v3278_v1 }
 0x90d   : > { %v2858_v59 = vpop.f32.mrb[20].mxu1 }
 0x90e   : > { %v2859_v61 = vpop.f32.mrb[21].mxu1 }
 0x90f   : > { %v2860_v62 = vadd.f32 %v2859_v61, %v2858_v59  ;;  %v2861_v63 = vpop.f32.mrb[22].mxu1 }
 0x910   : > { %v2862_v0 = vpop.f32.mrb[23].mxu1 }
 0x911   : > { %v1451_v2 = vadd.f32 %v2860_v62, %v2693_v60 }
 0x913   : > { %v1456_v4 = vadd.f32 %v1451_v2, %v1195_v36 }
 0x915   : > { %v1459_v5 = vsel %vm570_vm1, %v1456_v4, 0.0 }
 0x916   : > { %1460 = vadd.xlane.f32.xlu0 %v1459_v5 }
 0x9a3   : > { %v1461_v6 = vpop.xlane.xlu0 %1460 }
 0x9a4   : > { %v1462_v7 = vmul.f32 0.03125, %v1461_v6 }
 0x9a6   : > { %v1463_v8 = vsub.f32 %v1456_v4, %v1462_v7 }
 0x9a8   : > { %v1464_v9 = vmul.f32 %v1463_v8, %v1463_v8 }
 0x9aa   : > { %v1465_v10 = vsel %vm570_vm1, %v1464_v9, 0.0 }
 0x9ab   : > { %1466 = vadd.xlane.f32.xlu1 %v1465_v10 }
 0xa38   : > { %v1467_v13 = vpop.xlane.xlu1 %1466 }
 0xa39   : > { %v1468_v3 = vmul.f32 0.03125, %v1467_v13 }
 0xa3b   : > { %v1469_v14 = vadd.f32 1e-05, %v1468_v3 }
 0xa3d   : > { %3190 = vrsqrt.f32 %v1469_v14 }
 0xa47   : > { %v3191_v18 = vpop.eup %3190 }
 0xa48   : > { %v1471_v21 = vmul.f32 %v3191_v18, %v1463_v8 }
 0xa4a   : > { %v1478_v19 = vmul.f32 %v2710_v20, %v1471_v21 }
 0xa4c   : > { %v3656_v23 = vadd.f32 %v2711_v22, %v1478_v19 }
 0xa4e   : > { %v1486_v15 = vpack.c.bf16 %v3656_v23, %v3656_v23 }
 0xa50   : > { %2985 = vmatmul.mubr.msk.bf16.vlgmr.msra.gmra.mrb[24].mxu0 %vm570_vm1, %v1486_v15 }
 0xa51   : > { %2990 = vmatprep.mubr.msk.bf16.mxu0 %vm3279_vm0, %v3278_v1 }
 0xb23   : > { %v1549_v24 = vpop.f32.mrb[24].mxu0 }
 0xb24   : > { %v1550_v25 = vadd.f32 %v2717_v16, %v1549_v24  ;;  %v2986_v26 = vpop.f32.mrb[25].mxu0 }
 0xb25   : > { %v1552_v27 = vpop.f32.mrb[26].mxu0 }
 0xb26   : > { %1574 = vrot.lane.b32.xlu1 %v1550_v25, %s3979_s30  ;;  %1571 = vrot.lane.b32.xlu0 %v1550_v25, %s3980_s26  ;;  %v2987_v28 = vpop.f32.mrb[27].mxu0  ;;  %v3668_v29 = vpack.c.bf16 %v1550_v25, %v1550_v25  ;;  %v1555_v30 = vmul.f32 0.35355338, %v1550_v25 }
 0xb28   : > { %v1566_v39 = vpack.c.bf16 %v1555_v30, %v1555_v30 }
 0xb2a   : > { %1577 = vrot.lane.b32.xlu1 %v1550_v25, %s3981_s21  ;;  %1585 = vrot.lane.b32.xlu0 %v3668_v29, %s3982_s29 }
 0xb2e   : > { %1557 = vrot.lane.b32.xlu0 %v1555_v30, %s3980_s26  ;;  %s3986_s26 = smov 16  }
 0xb98   : > { %v1575_v31 = vpop.permute.xlu1 %1574  ;;  %v1572_v32 = vpop.permute.xlu0 %1571 }
 0xb99   : > { %v3674_v33 = vpack.c.bf16 %v1572_v32, %v1572_v32  ;;  %v3678_v36 = vpack.c.bf16 %v1575_v31, %v1575_v31 }
 0xb9b   : > { %1634 = vrot.lane.b32.xlu1 %v3674_v33, %s3982_s29 }
 0xb9c   : > { %v1578_v34 = vpop.permute.xlu1 %1577  ;;  %v1586_v35 = vpop.permute.xlu0 %1585 }
 0xb9d   : > { %v3680_v37 = vpack.c.bf16 %v1578_v34, %v1578_v34  ;;  %v1591_v38 = vsel %vm646_vm2, %v1586_v35, 0 }
 0xb9e   : > { %2989 = vmatpush3.bf16.xpose.msra.mxu0 %v1591_v38 }
 0xb9f   : > { %1683 = vrot.lane.b32.xlu1 %v3678_v36, %s3982_s29  ;;  %1732 = vrot.lane.b32.xlu0 %v3680_v37, %s3982_s29 }
 0xba0   : > { %2994 = vmatprep.subr.bf16.mxu0 %v3278_v1  ;;  %v1558_v40 = vpop.permute.xlu0 %1557 }
 0xba1   : > { %v1567_v49 = vpack.c.bf16 %v1558_v40, %v1558_v40 }
 0xba3   : > { %1560 = vrot.lane.b32.xlu1 %v1555_v30, %s3979_s30  ;;  %1563 = vrot.lane.b32.xlu0 %v1555_v30, %s3981_s21  ;;  %s3985_s30 = smov 24   ;;  %s537_s21 = sand.u32 1, %s3268_s25  }
 0xba4   : > { %s2668_s29 = sshll.u32 %s537_s21, 3 }
 0xba5   : > { %2991 = vmatmul.mubr.msk.bf16.vlgmr.msra.gmra.mrb[28].mxu0 %vm646_vm2, %v1566_v39  ;;  %s539_s22 = scalar_lea.vmem [#allocation2], %s2668_s29 }
 0xba6   : > { %2996 = vmatprep.mubr.msk.bf16.mxu0 %vm3279_vm0, %v3278_v1  ;;  %s2605_s0 = sshll.u32 %s539_s22, 4  ;;  %s3889_s0 = int_to_ptr.vmem [resolvable:$true] %s2605_s0 }
 0xc0d   : > { %v1635_v41 = vpop.permute.xlu1 %1634 }
 0xc0e   : > { %v1640_v42 = vsel %vm646_vm2, %v1635_v41, 0 }
 0xc0f   : > { %2995 = vmatpush3.bf16.xpose.msra.mxu0 %v1640_v42 }
 0xc10   : > { %3000 = vmatprep.subr.bf16.mxu0 %v3278_v1 }
 0xc11   : > { %v1733_v45 = vpop.permute.xlu0 %1732  ;;  %v1684_v48 = vpop.permute.xlu1 %1683 }
 0xc12   : > { %v1738_v47 = vsel %vm646_vm2, %v1733_v45, 0  ;;  %v1689_v51 = vsel %vm646_vm2, %v1684_v48, 0 }
 0xc13   : > { %3007 = vmatpush3.bf16.xpose.msra.mxu1 %v1738_v47 }
 0xc14   : > { %3018 = vmatprep.subr.bf16.mxu1 %v3278_v1 }
 0xc15   : > { %v1564_v50 = vpop.permute.xlu0 %1563  ;;  %v1561_v53 = vpop.permute.xlu1 %1560 }
 0xc16   : > { %2997 = vmatmul.mubr.msk.bf16.vlgmr.msra.gmra.mrb[32].mxu0 %vm646_vm2, %v1567_v49  ;;  %v1569_v52 = vpack.c.bf16 %v1564_v50, %v1564_v50  ;;  %v1568_v54 = vpack.c.bf16 %v1561_v53, %v1561_v53 }
 0xc17   : > { %3001 = vmatpush3.bf16.xpose.msra.mxu0 %v1689_v51  ;;  %3002 = vmatprep.mubr.msk.bf16.mxu0 %vm3279_vm0, %v3278_v1 }
 0xc18   : > { %3012 = vmatprep.subr.bf16.mxu0 %v3278_v1 }
 0xc1a   : > { %3009 = vmatmul.mubr.msk.bf16.vlgmr.msra.gmra.mrb[24].mxu1 %vm646_vm2, %v1569_v52 }
 0xc1b   : > { %3020 = vmatprep.mubr.msk.bf16.mxu1 %vm3279_vm0, %v3278_v1 }
 0xc1e   : > { %3003 = vmatmul.mubr.msk.bf16.vlgmr.msra.gmra.mrb[36].mxu0 %vm646_vm2, %v1568_v54 }
 0xc1f   : > { %3014 = vmatprep.mubr.msk.bf16.mxu0 %vm3279_vm0, %v3278_v1 }
 0xc78   : > { %v1627_v55 = vpop.f32.mrb[28].mxu0 }
 0xc79   : > { %v2992_v56 = vpop.f32.mrb[29].mxu0  ;;  %v1780_v57 = vsel %vm646_vm2, %v1627_v55, -inf }
 0xc7a   : > { %1781 = vmax.xlane.f32.xlu1 %v1780_v57  ;;  %v1630_v58 = vpop.f32.mrb[30].mxu0 }
 0xc7b   : > { %v2993_v59 = vpop.f32.mrb[31].mxu0 }
 0xce9   : > { %v1676_v60 = vpop.f32.mrb[32].mxu0 }
 0xcea   : > { %v2998_v61 = vpop.f32.mrb[33].mxu0  ;;  %v1783_v62 = vsel %vm646_vm2, %v1676_v60, -inf }
 0xceb   : > { %1784 = vmax.xlane.f32.xlu0 %v1783_v62  ;;  %v1679_v63 = vpop.f32.mrb[34].mxu0 }
 0xcec   : > { %v2999_v0 = vpop.f32.mrb[35].mxu0 }
 0xced   : > { %v1774_v2 = vpop.f32.mrb[24].mxu1 }
 0xcee   : > { %v3010_v4 = vpop.f32.mrb[25].mxu1  ;;  %v1789_v5 = vsel %vm646_vm2, %v1774_v2, -inf }
 0xcef   : > { %v1777_v6 = vpop.f32.mrb[26].mxu1  ;;  %1790 = vmax.xlane.f32.xlu1 %v1789_v5  ;;  %v3143_v4 = vld [vmem:[%s3932_s3 + $0x18] sm:$0xff]  }
 0xcf0   : > { %v3011_v7 = vpop.f32.mrb[27].mxu1 }
 0xcf1   : > { %v1725_v8 = vpop.f32.mrb[36].mxu0 }
 0xcf2   : > { %v3004_v9 = vpop.f32.mrb[37].mxu0  ;;  %v1786_v10 = vsel %vm646_vm2, %v1725_v8, -inf }
 0xcf3   : > { %1787 = vmax.xlane.f32.xlu0 %v1786_v10  ;;  %v1728_v11 = vpop.f32.mrb[38].mxu0 }
 0xcf4   : > { %v3005_v12 = vpop.f32.mrb[39].mxu0 }
 0xd00   : > { %1876 = vrot.lane.b32.xlu1 %v3674_v33, %s3983_s18 }
 0xd07   : > { %v1782_v13 = vpop.xlane.xlu1 %1781 }
 0xd08   : > { %v1792_v3 = vsub.f32 %v1627_v55, %v1782_v13 }
 0xd09   : > { %1828 = vrot.lane.b32.xlu0 %v3668_v29, %s3983_s18 }
 0xd0a   : > { %v1796_v14 = vmul.f32 1.442695, %v1792_v3 }
 0xd0c   : > { %3192 = vpow2.f32 %v1796_v14 }
 0xd16   : > { %v3193_v18 = vpop.eup %3192 }
 0xd17   : > { %v1804_v20 = vsel %vm646_vm2, %v3193_v18, 0.0 }
 0xd28   : > { %1805 = vadd.xlane.f32.xlu0 %v1804_v20 }
 0xd78   : > { %v1785_v21 = vpop.xlane.xlu0 %1784 }
 0xd79   : > { %v1793_v22 = vsub.f32 %v1676_v60, %v1785_v21 }
 0xd7b   : > { %v1798_v19 = vmul.f32 1.442695, %v1793_v22 }
 0xd7c   : > { %v1791_v15 = vpop.xlane.xlu1 %1790 }
 0xd7d   : > { %3194 = vpow2.f32 %v1798_v19  ;;  %v1795_v16 = vsub.f32 %v1774_v2, %v1791_v15  ;;  %v3142_v2 = vld [vmem:[%s3932_s3 + $0x10] sm:$0xff]  }
 0xd7f   : > { %v1802_v24 = vmul.f32 1.442695, %v1795_v16 }
 0xd80   : > { %v1877_v25 = vpop.permute.xlu1 %1876  ;;  %v1788_v26 = vpop.xlane.xlu0 %1787 }
 0xd81   : > { %3196 = vpow2.f32 %v1802_v24  ;;  %v1882_v27 = vsel %vm893_vm3, %v1877_v25, 0  ;;  %v1794_v28 = vsub.f32 %v1725_v8, %v1788_v26  ;;  %v2734_v24 = vld [vmem:[%s3933_s4 + $0x1] ss:$0 sm:$0xff] }
 0xd82   : > { %3019 = vmatpush3.bf16.msra.mxu1 %v1882_v27 }
 0xd83   : > { %v1800_v29 = vmul.f32 1.442695, %v1794_v28  ;;  %3030 = vmatprep.subr.bf16.mxu1 %v3278_v1 }
 0xd84   : > { %v1829_v30 = vpop.permute.xlu0 %1828 }
 0xd85   : > { %3198 = vpow2.f32 %v1800_v29  ;;  %v1834_v31 = vsel %vm893_vm3, %v1829_v30, 0 }
 0xd86   : > { %3013 = vmatpush3.bf16.msra.mxu0 %v1834_v31 }
 0xd87   : > { %v3195_v32 = vpop.eup %3194  ;;  %3024 = vmatprep.subr.bf16.mxu0 %v3278_v1 }
 0xd88   : > { %v1807_v33 = vsel %vm646_vm2, %v3195_v32, 0.0 }
 0xd89   : > { %1808 = vadd.xlane.f32.xlu1 %v1807_v33 }
 0xd8b   : > { %v3197_v34 = vpop.eup %3196 }
 0xd8c   : > { %v1813_v35 = vsel %vm646_vm2, %v3197_v34, 0.0 }
 0xd8d   : > { %1814 = vadd.xlane.f32.xlu1 %v1813_v35 }
 0xd8f   : > { %v3199_v38 = vpop.eup %3198 }
 0xd90   : > { %v1810_v39 = vsel %vm646_vm2, %v3199_v38, 0.0 }
 0xd91   : > { %1811 = vadd.xlane.f32.xlu0 %v1810_v39  ;;  %v3146_v39 = vld [vmem:[%s3936_s7 + $0x24] ss:$8 sps:$4 sm:$0xff]  }
 0xd9e   : > { %1924 = vrot.lane.b32.xlu1 %v3678_v36, %s3983_s18 }
 0xda7   : > { %1972 = vrot.lane.b32.xlu0 %v3680_v37, %s3983_s18  ;;  %s2817_s18 = sshll.u32 %s3401_s28, 7  ;;  %s3289_s28 = smov [#allocation2]  }
 0xda8   : > { %s3218_s29 = sshll.u32 %s3289_s28, 4  ;;  %s3219_s29 = int_to_ptr.vmem [resolvable:$false] %s3218_s29 }
 0xda9   : > { %s3220_s2 = scalar_lea.vmem %s3219_s29, 256  ;;  %p3221_p0 = scmp.lt.s32.totalorder %s3889_s0, %s3219_s29 }
 0xdb5   : > { %v1806_v40 = vpop.xlane.xlu0 %1805 }
 0xdb6   : > { %3200 = vrcp.f32 %v1806_v40  ;;  %v3144_v40 = vld [vmem:[%s3936_s7 + $0x20] ss:$8 sps:$4 sm:$0xff]  }
 0xdc0   : > { %v3201_v41 = vpop.eup %3200 }
 0xdc1   : > { %v1820_v42 = vmul.f32 %v3201_v41, %v3193_v18  ;;  %v3149_v41 = vld [vmem:[%s3936_s7 + $0x34] ss:$8 sps:$4 sm:$0xff]  }
 0xdc3   : > { %v1824_v45 = vpack.c.bf16 %v1820_v42, %v1820_v42  ;;  %v3150_v42 = vld [vmem:[%s3938_s9 + $0xc0] sm:$0xff]  }
 0xdc5   : > { %3015 = vmatmul.mubr.msk.bf16.vlgmr.msra.gmra.mrb[40].mxu0 %vm646_vm2, %v1824_v45  ;;  %v3151_v45 = vld [vmem:[%s3938_s9 + $0x80] sm:$0xff]  }
 0xdc6   : > { %3026 = vmatprep.mubr.msk.bf16.mxu0 %vm3279_vm0, %v3278_v1 }
 0xe16   : > { %v1809_v47 = vpop.xlane.xlu1 %1808 }
 0xe17   : > { %3202 = vrcp.f32 %v1809_v47  ;;  %v3152_v47 = vld [vmem:[%s3938_s9 + $0xc8] sm:$0xff]  }
 0xe1a   : > { %v1815_v48 = vpop.xlane.xlu1 %1814 }
 0xe1b   : > { %3204 = vrcp.f32 %v1815_v48  ;;  %v3153_v48 = vld [vmem:[%s3938_s9 + $0x88] sm:$0xff]  }
 0xe1e   : > { %v1925_v49 = vpop.permute.xlu1 %1924  ;;  %v1812_v50 = vpop.xlane.xlu0 %1811 }
 0xe1f   : > { %v1930_v36 = vsel %vm893_vm3, %v1925_v49, 0  ;;  %3206 = vrcp.f32 %v1812_v50  ;;  %v3154_v49 = vld [vmem:[%s3938_s9 + $0xd0] sm:$0xff]  }
 0xe20   : > { %3025 = vmatpush3.bf16.msra.mxu0 %v1930_v36  ;;  %v3155_v50 = vld [vmem:[%s3938_s9 + $0x90] sm:$0xff]   ;;  %v3156_v36 = vld [vmem:[%s3938_s9 + $0xd8] sm:$0xff]  }
 0xe21   : > { %v3203_v37 = vpop.eup %3202  ;;  %3036 = vmatprep.subr.bf16.mxu0 %v3278_v1 }
 0xe22   : > { %v1821_v51 = vmul.f32 %v3203_v37, %v3195_v32  ;;  %v1973_v52 = vpop.permute.xlu0 %1972  ;;  %v3157_v37 = vld [vmem:[%s3938_s9 + $0x98] sm:$0xff]  }
 0xe23   : > { %v1978_v55 = vsel %vm893_vm3, %v1973_v52, 0  ;;  %v3159_v52 = vld [vmem:[%s3938_s9 + $0xa0] sm:$0xff]  }
 0xe24   : > { %v1825_v53 = vpack.c.bf16 %v1821_v51, %v1821_v51  ;;  %v3158_v51 = vld [vmem:[%s3938_s9 + $0xe0] sm:$0xff]  }
 0xe25   : > { %v3205_v54 = vpop.eup %3204 }
 0xe26   : > { %3021 = vmatmul.mubr.msk.bf16.vlgmr.msra.gmra.mrb[28].mxu1 %vm646_vm2, %v1825_v53  ;;  %v1823_v56 = vmul.f32 %v3205_v54, %v3197_v34  ;;  %v3160_v53 = vld [vmem:[%s3938_s9 + $0xe8] sm:$0xff]  }
 0xe27   : > { %3031 = vmatpush3.bf16.msra.mxu1 %v1978_v55  ;;  %3032 = vmatprep.mubr.msk.bf16.mxu1 %vm3279_vm0, %v3278_v1  ;;  %v3161_v54 = vld [vmem:[%s3938_s9 + $0xa8] sm:$0xff]  }
 0xe28   : > { %v1827_v60 = vpack.c.bf16 %v1823_v56, %v1823_v56  ;;  %2178 = vmatprep.subr.bf16.mxu1 %v3146_v39  ;;  %v2804_v39 = vld [vmem:[%s3940_s11 + $0x1] ss:$0 sm:$0xff] }
 0xe29   : > { %v3207_v57 = vpop.eup %3206 }
 0xe2a   : > { %v1822_v58 = vmul.f32 %v3207_v57, %v3199_v38 }
 0xe2c   : > { %v1826_v59 = vpack.c.bf16 %v1822_v58, %v1822_v58 }
 0xe2e   : > { %3027 = vmatmul.mubr.msk.bf16.vlgmr.msra.gmra.mrb[44].mxu0 %vm646_vm2, %v1826_v59  ;;  %3033 = vmatmul.mubr.msk.bf16.vlgmr.msra.gmra.mrb[32].mxu1 %vm646_vm2, %v1827_v60  ;;  %v2740_v59 = vld [vmem:[%s3934_s5 + $0x1] ss:$0 sm:$0xff] }
 0xe2f   : > { %3040 = vmatprep.mubr.msk.bf16.mxu0 %vm3279_vm0, %v3278_v1  ;;  %2210 = vmatprep.mubr.bf16.mxu1 %v3288_v17 }
 0xe30   : > { %3037 = vmatpush3.bf16.msra.mxu0 %v3142_v2  ;;  %2179 = vmatpush1.bf16.msra.mxu1 %v3144_v40  ;;  %v3162_v2 = vld [vmem:[%s3938_s9 + $0xf0] sm:$0xff]  }
 0xe31   : > { %3038 = vmatprep.subr.bf16.mxu0 %v3278_v1  ;;  %2180 = vmatprep.subr.bf16.mxu1 %v3149_v41 }
 0xe34   : > { %3039 = vmatpush3.bf16.msra.mxu0 %v3143_v4  ;;  %v3163_v4 = vld [vmem:[%s3938_s9 + $0xb0] sm:$0xff]  }
 0xe35   : > { %2886 = vmatprep.subr.bf16.mxu0 %v3150_v42 }
 0xe98   : > { %v1870_v61 = vpop.f32.mrb[40].mxu0 }
 0xe99   : > { %v3016_v62 = vpop.f32.mrb[41].mxu0 }
 0xe9a   : > { %v1873_v63 = vpop.f32.mrb[42].mxu0 }
 0xe9b   : > { %v3017_v0 = vpop.f32.mrb[43].mxu0 }
 0xef9   : > { %v1918_v5 = vpop.f32.mrb[28].mxu1 }
 0xefa   : > { %2021 = vrot.lane.b32.xlu1 %v1918_v5, %s3984_s20  ;;  %v3022_v17 = vpop.f32.mrb[29].mxu1  ;;  %v3164_v5 = vld [vmem:[%s3938_s9 + $0xf8] sm:$0xff]   ;;  %s3887_s20 = scalar_lea.hbm %s3946_s17, %s2817_s18 }
 0xefb   : > { %v1921_v6 = vpop.f32.mrb[30].mxu1  ;;  %v3165_v17 = vld [vmem:[%s3938_s9 + $0xb8] sm:$0xff]  }
 0xefc   : > { %v3023_v7 = vpop.f32.mrb[31].mxu1  ;;  %v2746_v6 = vld [vmem:[%s3937_s8 + $0x2] sm:$0x3] }
 0xefd   : > { %v2148_v7 = vrot.slane %v2746_v6, %v1205_v44  ;;  %v2785_v44 = vld [vmem:[%s3939_s10 + $0x1] ss:$0 sm:$0xff] }
 0xf01   : > { %v1966_v8 = vpop.f32.mrb[44].mxu0  ;;  %v2014_v9 = vpop.f32.mrb[32].mxu1 }
 0xf02   : > { %2029 = vrot.lane.b32.xlu1 %v2014_v9, %s3985_s30  ;;  %v3034_v10 = vpop.f32.mrb[33].mxu1  ;;  %2025 = vrot.lane.b32.xlu0 %v1966_v8, %s3986_s26  ;;  %v3028_v11 = vpop.f32.mrb[45].mxu0  ;;  %v2152_v8 = vrot.slane %v2746_v6, %v1209_v46  ;;  %s2592_s30 = scalar_lea.sflag [#allocation3], %s537_s21  ;;  %s3214_s26 = scalar_lea.vmem %s3889_s0, 128 }
 0xf03   : > { %v1969_v12 = vpop.f32.mrb[46].mxu0  ;;  %v2017_v13 = vpop.f32.mrb[34].mxu1  ;;  %p3215_p11 = scmp.ne.s32.totalorder %s3889_s0, %s3214_s26  ;;  %p3222_p1 = scmp.lt.s32.totalorder %s3220_s2, %s3214_s26 }
 0xf04   : > { %v3029_v3 = vpop.f32.mrb[47].mxu0  ;;  %v3035_v14 = vpop.f32.mrb[35].mxu1 }
 0xf05   : > { %p3216_p12 = pnand %p3215_p11, %p3418_p5  ;;  %p3223_p2 = por %p3222_p1, %p3221_p0 }
 0xf07   : > { %p3217_p13 = pneg %p3216_p12 }
 0xf09   : > { %p3224_p3 = pnand %p3223_p2, %p3217_p13 }
 0xf6c   : > { %v2022_v18 = vpop.permute.xlu1 %2021 }
 0xf6d   : > { %v2032_v20 = vsel %vm646_vm2, %v1870_v61, %v2022_v18  ;;  %v2741_v61 = vld [vmem:[%s3935_s6 + $0x1] ss:$0 sm:$0xff] }
 0xf74   : > { %v2030_v21 = vpop.permute.xlu1 %2029  ;;  %v2026_v22 = vpop.permute.xlu0 %2025 }
 0xf75   : > { %v2033_v19 = vsel %vm1094_vm4, %v2032_v20, %v2026_v22 }
 0xf76   : > { %v2034_v15 = vsel %vm1096_vm5, %v2033_v19, %v2030_v21 }
 0xf77   : > { %v2035_v16 = vpack.c.bf16 %v2034_v15, %v2034_v15 }
 0xf79   : > { %3041 = vmatmul.mubr.msk.bf16.vlgmr.msra.gmra.mrb[48].mxu0 %vm570_vm1, %v2035_v16 }
 0xf7a   : > { %2887 = vmatpush3.bf16.msra.mxu0 %v3151_v45  ;;  %v3168_v45 = vld [vmem:[%s3944_s15] sm:$0xff]  }
 0xf7b   : > { %2888 = vmatprep.subr.bf16.mxu0 %v3152_v47 }
 0xf7e   : > { %2889 = vmatpush3.bf16.msra.mxu0 %v3153_v48  ;;  %v3169_v48 = vld [vmem:[%s3944_s15 + $0x8] sm:$0xff]  }
 0xf7f   : > { %2890 = vmatprep.subr.bf16.mxu0 %v3154_v49  ;;  %v3170_v49 = vld [vmem:[%s3944_s15 + $0x10] sm:$0xff]  }
 0xf82   : > { %2891 = vmatpush3.bf16.msra.mxu0 %v3155_v50  ;;  %v3171_v50 = vld [vmem:[%s3944_s15 + $0x18] sm:$0xff]  }
 0xf83   : > { %2892 = vmatprep.subr.bf16.mxu0 %v3156_v36  ;;  %v2806_v36 = vld [vmem:[%s3943_s14] ss:$0 sm:$0xff] }
 0xf86   : > { %2893 = vmatpush3.bf16.msra.mxu0 %v3157_v37 }
 0xf87   : > { %2894 = vmatprep.subr.bf16.mxu0 %v3158_v51 }
 0xf8a   : > { %2895 = vmatpush3.bf16.msra.mxu0 %v3159_v52 }
 0xf8b   : > { %2896 = vmatprep.subr.bf16.mxu0 %v3160_v53 }
 0xf8e   : > { %2897 = vmatpush3.bf16.msra.mxu0 %v3161_v54 }
 0xf8f   : > { %2898 = vmatprep.subr.bf16.mxu0 %v3162_v2 }
 0xf92   : > { %2899 = vmatpush3.bf16.msra.mxu0 %v3163_v4 }
 0xf93   : > { %2900 = vmatprep.subr.bf16.mxu0 %v3164_v5 }
 0xf96   : > { %2901 = vmatpush3.bf16.msra.mxu0 %v3165_v17 }
0x104c   : > { %v2098_v25 = vpop.f32.mrb[48].mxu0 }
0x104d   : > { %v2099_v26 = vadd.f32 %v2734_v24, %v2098_v25  ;;  %v3042_v27 = vpop.f32.mrb[49].mxu0 }
0x104e   : > { %v2101_v28 = vpop.f32.mrb[50].mxu0 }
0x104f   : > { %v3043_v29 = vpop.f32.mrb[51].mxu0  ;;  %v2104_v30 = vadd.f32 %v2099_v26, %v3656_v23  ;;  %v3147_v23 = vld [vmem:[%s3936_s7 + $0x30] ss:$8 sps:$4 sm:$0xff]  }
0x1050   : > { %2181 = vmatpush1.bf16.msra.mxu1 %v3147_v23  ;;  %v2805_v23 = vld [vmem:[%s3941_s12 + $0x1] ss:$0 sm:$0xff] }
0x1051   : > { %v2109_v31 = vsel %vm570_vm1, %v2104_v30, 0.0  ;;  %3044 = vmatprep.subr.bf16.mxu1 %v3278_v1 }
0x1052   : > { %2110 = vadd.xlane.f32.xlu0 %v2109_v31  ;;  %v3166_v31 = vld [vmem:[%s3942_s13] sm:$0xff]  }
0x10df   : > { %v2111_v32 = vpop.xlane.xlu0 %2110 }
0x10e0   : > { %v2112_v33 = vmul.f32 0.03125, %v2111_v32  ;;  %v3167_v32 = vld [vmem:[%s3942_s13 + $0x8] sm:$0xff]  }
0x10e2   : > { %v2113_v34 = vsub.f32 %v2104_v30, %v2112_v33 }
0x10e4   : > { %v2114_v35 = vmul.f32 %v2113_v34, %v2113_v34 }
0x10e6   : > { %v2115_v38 = vsel %vm570_vm1, %v2114_v35, 0.0 }
0x10e7   : > { %2116 = vadd.xlane.f32.xlu1 %v2115_v38 }
0x1174   : > { %v2117_v55 = vpop.xlane.xlu1 %2116 }
0x1175   : > { %v2118_v56 = vmul.f32 0.03125, %v2117_v55 }
0x1177   : > { %v2119_v57 = vadd.f32 1e-05, %v2118_v56 }
0x1179   : > { %3208 = vrsqrt.f32 %v2119_v57 }
0x1183   : > { %v3209_v58 = vpop.eup %3208 }
0x1184   : > { %v2121_v60 = vmul.f32 %v3209_v58, %v2113_v34 }
0x1186   : > { %v2128_v62 = vmul.f32 %v2740_v59, %v2121_v60 }
0x1188   : > { %v2135_v63 = vadd.f32 %v2741_v61, %v2128_v62 }
0x118a   : > { %v2136_v0 = vpack.c.bf16 %v2135_v63, %v2135_v63 }
0x118c   : > { %2751 = vmatmul.mubr.msk.bf16.vlgmr.msra.gmra.mrb[36].mxu1 %vm570_vm1, %v2136_v0 }
0x118d   : > { %3048 = vmatprep.mubr.msk.bf16.mxu1 %vm3279_vm0, %v3278_v1  ;;  %3045 = vmatpush3.bf16.msra.mxu1 %v3166_v31 }
0x118e   : > { %3046 = vmatprep.subr.bf16.mxu1 %v3278_v1 }
0x1191   : > { %3047 = vmatpush3.bf16.msra.mxu1 %v3167_v32 }
0x1192   : > { %3052 = vmatprep.subr.bf16.mxu1 %v3278_v1 }
0x125f   : > { %v2212_v9 = vpop.f32.mrb[36].mxu1 }
0x1260   : > { %v2213_v10 = vadd.f32 %v2212_v9, %v2148_v7  ;;  %v2214_v11 = vpop.f32.mrb[37].mxu1 }
0x1261   : > { %v2215_v12 = vadd.f32 %v2214_v11, %v2152_v8  ;;  %v2216_v13 = vpop.f32.mrb[38].mxu1 }
0x1262   : > { %v2219_v3 = vmax.f32 %v2213_v10, 0.0  ;;  %v2217_v14 = vpop.f32.mrb[39].mxu1 }
0x1263   : > { %v2220_v18 = vmax.f32 %v2215_v12, 0.0 }
0x1264   : > { %v2221_v21 = vpack.c.bf16 %v2219_v3, %v2219_v3 }
0x1265   : > { %v2222_v20 = vpack.c.bf16 %v2220_v18, %v2220_v18 }
0x1267   : > { %2392 = vmatprep.mubr.bf16.mxu0 %v2222_v20 }
0x1268   : > { %2393 = vmatmul.mubr.bf16.vlgmr.msra.gmra.mrb[52].mxu0 %v2221_v21 }
0x133b   : > { %v2902_v22 = vpop.f32.mrb[52].mxu0 }
0x133c   : > { %v2903_v19 = vpop.f32.mrb[53].mxu0 }
0x133d   : > { %v2904_v43 = vadd.f32 %v2903_v19, %v2902_v22  ;;  %v2905_v46 = vpop.f32.mrb[54].mxu0 }
0x133e   : > { %v2906_v15 = vpop.f32.mrb[55].mxu0 }
0x133f   : > { %v2395_v16 = vadd.f32 %v2904_v43, %v2785_v44 }
0x1341   : > { %v2400_v24 = vadd.f32 %v2395_v16, %v2135_v63 }
0x1343   : > { %v2405_v25 = vsel %vm570_vm1, %v2400_v24, 0.0 }
0x1344   : > { %2406 = vadd.xlane.f32.xlu0 %v2405_v25 }
0x13d1   : > { %v2407_v26 = vpop.xlane.xlu0 %2406 }
0x13d2   : > { %v2408_v27 = vmul.f32 0.03125, %v2407_v26 }
0x13d4   : > { %v2409_v28 = vsub.f32 %v2400_v24, %v2408_v27 }
0x13d6   : > { %v2410_v29 = vmul.f32 %v2409_v28, %v2409_v28 }
0x13d8   : > { %v2411_v30 = vsel %vm570_vm1, %v2410_v29, 0.0 }
0x13d9   : > { %2412 = vadd.xlane.f32.xlu0 %v2411_v30 }
0x1466   : > { %v2413_v33 = vpop.xlane.xlu0 %2412 }
0x1467   : > { %v2414_v34 = vmul.f32 0.03125, %v2413_v33 }
0x1469   : > { %v2415_v35 = vadd.f32 1e-05, %v2414_v34 }
0x146b   : > { %3210 = vrsqrt.f32 %v2415_v35 }
0x1475   : > { %v3211_v38 = vpop.eup %3210 }
0x1476   : > { %v2417_v40 = vmul.f32 %v3211_v38, %v2409_v28 }
0x1478   : > { %v2424_v41 = vmul.f32 %v2804_v39, %v2417_v40 }
0x147a   : > { %v2431_v42 = vadd.f32 %v2805_v23, %v2424_v41 }
0x147c   : > { %v2432_v47 = vpack.c.bf16 %v2431_v42, %v2431_v42 }
0x147e   : > { %3049 = vmatmul.mubr.msk.bf16.vlgmr.msra.gmra.mrb[40].mxu1 %vm570_vm1, %v2432_v47 }
0x147f   : > { %3053 = vmatpush3.bf16.msra.mxu1 %v3168_v45  ;;  %3060 = vmatprep.mubr.msk.bf16.mxu1 %vm3279_vm0, %v3278_v1 }
0x1480   : > { %3054 = vmatprep.subr.bf16.mxu1 %v3278_v1 }
0x1483   : > { %3055 = vmatpush3.bf16.msra.mxu1 %v3169_v48 }
0x1484   : > { %3056 = vmatprep.subr.bf16.mxu1 %v3278_v1 }
0x1487   : > { %3057 = vmatpush3.bf16.msra.mxu1 %v3170_v49 }
0x1488   : > { %3058 = vmatprep.subr.bf16.mxu1 %v3278_v1  ;;  %v2810_v1 = vld [vmem:[%s3945_s16] ss:$0 sm:$0xff] }
0x148b   : > { %3059 = vmatpush3.bf16.msra.mxu1 %v3171_v50 }
0x1551   : > { %v2493_v37 = vpop.f32.mrb[40].mxu1 }
0x1552   : > { %v2494_v51 = vadd.f32 %v2806_v36, %v2493_v37  ;;  %v3050_v52 = vpop.f32.mrb[41].mxu1 }
0x1553   : > { %v2496_v53 = vpop.f32.mrb[42].mxu1 }
0x1554   : > { %v2499_v54 = vmax.f32 %v2494_v51, 0.0  ;;  %v3051_v55 = vpop.f32.mrb[43].mxu1 }
0x1556   : > { %v2500_v56 = vpack.c.bf16 %v2499_v54, %v2499_v54 }
0x1558   : > { %3061 = vmatmul.mubr.msk.bf16.vlgmr.msra.gmra.mrb[44].mxu1 %vm2540_vm6, %v2500_v56 }
0x162b   : > { %v2578_v57 = vpop.f32.mrb[44].mxu1 }
0x162c   : > { %v2579_v58 = vadd.f32 %v2810_v1, %v2578_v57  ;;  %v3062_v59 = vpop.f32.mrb[45].mxu1 }
0x162d   : > { %v2581_v60 = vpop.f32.mrb[46].mxu1 }
0x162e   : > { %v3063_v61 = vpop.f32.mrb[47].mxu1  ;;  %v2584_v62 = vmul.f32 %v2579_v58, %v2579_v58 }
0x1630   : > { %2585 = vadd.xlane.f32.xlu1 %v2584_v62 }
0x16bd   : > { %v2586_v63 = vpop.xlane.xlu1 %2585 }
0x16be   : > { %v2587_v0 = vmax.f32 %v2586_v63, 1e-24 }
0x16c0   : > { %3212 = vrsqrt.f32 %v2587_v0 }
0x16ca   : > { %v3213_v2 = vpop.eup %3212 }
0x16cb   : > { %v2589_v4 = vmul.f32 %v3213_v2, %v2579_v58 }
0x16cd   : > { %2590 = vst [vmem:[%s539_s22] sm:$0xff] %v2589_v4 }
0x16ce   : > { %3227 = shalt.err (!%p3224_p3)
}
0x16cf   : > { %s3228_s21 = scalar_lea.hbm %s3887_s20, 128  ;;  %s3232_s19 = scalar_lea.hbm %s3946_s17, 256 }
0x16d0   : > { %p3229_p4 = scmp.ne.s32.totalorder %s3887_s20, %s3228_s21  ;;  %p3233_p9 = scmp.lt.u32.totalorder %s3887_s20, %s3946_s17 }
0x16d1   : > { %p3234_p10 = scmp.lt.u32.totalorder %s3232_s19, %s3228_s21  ;;  %p3236_p12 = scmp.lt.u32.totalorder %s3228_s21, %s3887_s20 }
0x16d2   : > { %p3230_p7 = pnand %p3229_p4, %p3418_p5 }
0x16d3   : > { %p3235_p11 = por %p3234_p10, %p3233_p9 }
0x16d4   : > { %p3231_p8 = pneg %p3230_p7 }
0x16d5   : > { %p3237_p13 = por %p3236_p12, %p3235_p11 }
0x16d7   : > { %p3238_p0 = pnand %p3237_p13, %p3231_p8 }
0x16d9   : > { %3241 = shalt.err (!%p3238_p0)
}
0x16da   : > { %3064 = dma.vmem_to_hbm [thread:$0]  (%p3418_p5), %s3889_s0, 128, %s3887_s20, %s2592_s30  }
0x16db PF: > { %s3987_s2 = sld [smem:[#allocation5_spill]]  ;;  %p3070_p1 = scmp.ge.s32.totalorder %s3276_s27, 2 }
0x16dd   : > { %p3067_p2 = pnand %p3070_p1, %p3422_p6 }
0x16e1   : > { %s2617_s29 = sand.u32 1, %s3987_s2  }
0x16e2   : > { %s2618_s18 = scalar_lea.sflag [#allocation3], %s2617_s29 }
0x16e3   : > { %3259 = dma.done.wait (!%p3067_p2), %s2618_s18, 128  }
0x16e4   : > { %3261 = vsyncadd (!%p3067_p2), %s2618_s18, 4294967168  ;;  %s3989_s27 = sld [smem:[#allocation7_spill]]  ;;  %s3990_s21 = sld [smem:[#allocation6_spill]] }
0x16e5   : > { %s3991_s26 = sld [smem:[#allocation8_spill]]  ;;  %s3992_s24 = smov %s3268_s25 }
0x16ea   : > { %p27_p3 = scmp.ge.s32.totalorder %s3989_s27, 4   ;;  %s3993_s25 = smov %s3990_s21 }
0x16ec   :  { %29 = sbr.rel (!%p27_p3) target bundleno = 7 (0x7), region = 135 }
0x16f3   :  { %2623 = vsyncpa [#allocation3], 1 }
0x16f4   :  { %2625 = vsyncpa [#allocation3 + $0x1], 1 }

// kernel: tpu_custom_call.1
= control target key start
LH: loop header
LB: loop body
LE: loop exit
PB: predicated region body
PF: predicated region fallthrough
CT: control target
= control target key end

     0   :  { %s3929_s0 = inlined_call_operand.vmem [shape: f32[16,32], index: 0, kind: input, shape index: {}]   ;;  %s3930_s1 = inlined_call_operand.vmem [shape: bf16[2,32,96], index: 1, kind: input, shape index: {}]   ;;  %s3931_s2 = inlined_call_operand.vmem [shape: f32[2,1,96], index: 2, kind: input, shape index: {}]   ;;  %s3932_s3 = inlined_call_operand.vmem [shape: bf16[2,32,32], index: 3, kind: input, shape index: {}]   ;;  %s3933_s4 = inlined_call_operand.vmem [shape: f32[2,1,32], index: 4, kind: input, shape index: {}]   ;;  %s3934_s5 = inlined_call_operand.vmem [shape: f32[2,1,32], index: 5, kind: input, shape index: {}]   ;;  %s3935_s6 = inlined_call_operand.vmem [shape: f32[2,1,32], index: 6, kind: input, shape index: {}]   ;;  %s3936_s7 = inlined_call_operand.vmem [shape: bf16[2,32,256], index: 7, kind: input, shape index: {}]   ;;  %s3937_s8 = inlined_call_operand.vmem [shape: f32[2,1,256], index: 8, kind: input, shape index: {}]   ;;  %s3938_s9 = inlined_call_operand.vmem [shape: bf16[2,256,32], index: 9, kind: input, shape index: {}]   ;;  %s3939_s10 = inlined_call_operand.vmem [shape: f32[2,1,32], index: 10, kind: input, shape index: {}]   ;;  %s3940_s11 = inlined_call_operand.vmem [shape: f32[2,1,32], index: 11, kind: input, shape index: {}]   ;;  %s3941_s12 = inlined_call_operand.vmem [shape: f32[2,1,32], index: 12, kind: input, shape index: {}]   ;;  %s3942_s13 = inlined_call_operand.vmem [shape: bf16[32,64], index: 13, kind: input, shape index: {}]   ;;  %s3943_s14 = inlined_call_operand.vmem [shape: f32[1,64], index: 14, kind: input, shape index: {}]   ;;  %s3944_s15 = inlined_call_operand.vmem [shape: bf16[64,128], index: 15, kind: input, shape index: {}]   ;;  %s3945_s16 = inlined_call_operand.vmem [shape: f32[1,128], index: 16, kind: input, shape index: {}]   ;;  %s3946_s17 = inlined_call_operand.hbm [shape: f32[16,128], index: 17, kind: output, shape index: {}]  }
   0x1   :  { %3966 = sst [smem:[#allocation10_spill]] %s3929_s0 }
   0x2   :  { %3967 = sst [smem:[#allocation11_spill]] %s3930_s1 }
   0x3   :  { %3968 = sst [smem:[#allocation12_spill]] %s3931_s2 }
   0x4   :  { %22 = vsyncpa [#allocation3], 0 }
   0x5   :  { %24 = vsyncpa [#allocation3 + $0x1], 0  ;;  %s3380_s24 = smov 0   ;;  %s3382_s25 = smov 0  }
   0x6   :  { %s3384_s26 = smov 0   ;;  %s3386_s27 = smov 0  }
   0x7 LB: > { %3969 = sst [smem:[#allocation5_spill]] %s3264_s24  ;;  %s3401_s28 = sadd.s32 4294967295, %s3276_s27   ;;  %s3276_s27 = sphi %s3386_s27, %s3989_s27   ;;  %s3272_s26 = sphi %s3384_s26, %s3991_s26   ;;  %s3268_s25 = sphi %s3382_s25, %s3993_s25   ;;  %s3264_s24 = sphi %s3380_s24, %s3992_s24  }
   0x8   : > { %3970 = sst [smem:[#allocation6_spill]] %s3272_s26  ;;  %s2664_s29 = sadd.s32 4294967294, %s3276_s27  }
   0x9   : > { %s3405_s0 = sadd.s32 1, %s3276_s27   ;;  %s399_s30 = sadd.s32 1, %s3272_s26 }
   0xa   : > { %3971 = sst [smem:[#allocation7_spill]] %s3405_s0  ;;  %s396_s18 = ssub.s32 %s3276_s27, %s3405_s0 }
   0xb   : > { %p409_p0 = scmp.ne.s32.totalorder %s3272_s26, %s3268_s25  ;;  %p397_p1 = scmp.eq.s32.totalorder %s396_s18, 0 }
   0xc   : > { %p410_p2 = scmp.eq.s32.totalorder %s3401_s28, 1  ;;  %p415_p3 = scmp.ne.s32.totalorder %s3268_s25, %s3264_s24 }
   0xd   : > { %p416_p4 = scmp.eq.s32.totalorder %s2664_s29, 1  ;;  %p2667_p7 = scmp.ge.s32.totalorder %s3276_s27, 1 }
   0xe   : > { %s3416_s19 = scalar_select %p397_p1, %s3272_s26, %s399_s30  }
   0xf   : > { %p3418_p5 = por %p410_p2, %p409_p0  ;;  %p3422_p6 = por %p416_p4, %p415_p3 }
  0x10   : > { %3972 = sst [smem:[#allocation8_spill]] %s3416_s19  ;;  %p489_p8 = scmp.lt.s32.totalorder %s3276_s27, 3 }
  0x11   : > { %s3974_s20 = scalar_select %p3422_p6, 1, 0 }
  0x12   : > { %p490_p9 = pnand %p2667_p7, %p489_p8 }
  0x13   : > { %3975 = sst [smem:[#allocation9_spill]] %s3974_s20  ;;  %s3976_s23 = sld [smem:[#allocation11_spill]] (!%p490_p9)  ;;  %v3278_v1 = vmov (!%p490_p9), 0.0   ;;  %vm3279_vm0 = vmmov (!%p490_p9), 0   ;;  %vm570_vm1 = vcmask (!%p490_p9), 261120   ;;  %vm646_vm2 = vcmask (!%p490_p9), 64512  }
  0x14   : > { %493 = sbr.rel (%p490_p9) target bundleno = 5851 (0x16db), region = 88  ;;  %2916 = vmatprep.subr.bf16.mxu0 (!%p490_p9), %v3278_v1  ;;  %2924 = vmatprep.subr.bf16.mxu1 (!%p490_p9), %v3278_v1  ;;  %p540_p10 = scmp.lt.s32.totalorder (!%p490_p9), %s3401_s28, 1  ;;  %vm893_vm3 = vcmask (!%p490_p9), 1043456   ;;  %vm1094_vm4 = vcmask (!%p490_p9), 130048   ;;  %vm1096_vm5 = vcmask (!%p490_p9), 195584   ;;  %vm2540_vm6 = vcmask (!%p490_p9), 523264  }
  0x15   : > { %2920 = vmatprep.mubr.msk.bf16.mxu0 (!%p490_p9), %vm3279_vm0, %v3278_v1  ;;  %2926 = vmatprep.mubr.msk.bf16.mxu1 (!%p490_p9), %vm3279_vm0, %v3278_v1  ;;  %s3977_s26 = sld [smem:[#allocation10_spill]] (!%p490_p9)  ;;  %s3978_s2 = sld [smem:[#allocation12_spill]] (!%p490_p9) }
  0x16   : > { %s3962_s19 = smov (!%p490_p9), 112   ;;  %s3958_s22 = smov (!%p490_p9), 24  }
  0x17   : > { %s3979_s30 = smov (!%p490_p9), 112   ;;  %s3982_s29 = smov (!%p490_p9), 96  }
  0x18   : > { %s3984_s20 = smov (!%p490_p9), 8  }
  0x19   : > { %v3114_v0 = vld [vmem:[%s3976_s23] sm:$0xff] (!%p490_p9)   ;;  %v3115_v2 = vld [vmem:[%s3976_s23 + $0x8] sm:$0xff] (!%p490_p9)  }
  0x1a   : > { %2917 = vmatpush3.bf16.msra.mxu0 (!%p490_p9), %v3114_v0 }
  0x1b   : > { %2918 = vmatprep.subr.bf16.mxu0 %v3278_v1  ;;  %s541_s18 = scalar_select %p540_p10, %s3401_s28, 1  ;;  %v2670_v5 = vld [vmem:[%s3978_s2] ss:$0 sm:$0xff] }
  0x1d   : > { %s2669_s21 = sshll.u32 %s541_s18, 3  ;;  %s3953_s18 = smov 96  }
  0x1e   : > { %2919 = vmatpush3.bf16.msra.mxu0 %v3115_v2  ;;  %s543_s0 = scalar_lea.vmem %s3977_s26, %s2669_s21  ;;  %s3955_s26 = smov 104  }
  0x1f   : > { %2930 = vmatprep.subr.bf16.mxu0 %v3278_v1  ;;  %v3447_v3 = vld [vmem:[%s543_s0] sm:$0xff]  ;;  %s3960_s0 = smov 120   ;;  %s3951_s21 = smov 64  }
  0x20   : > { %v546_v4 = vpack.c.bf16 %v3447_v3, %v3447_v3 }
  0x22   : > { %2921 = vmatmul.mubr.msk.bf16.vlgmr.msra.gmra.mrb[0].mxu0 %vm570_vm1, %v546_v4 }
  0x23   : > { %2932 = vmatprep.mubr.msk.bf16.mxu0 %vm3279_vm0, %v3278_v1 }
  0xf5   : > { %v608_v6 = vpop.f32.mrb[0].mxu0 }
  0xf6   : > { %v609_v7 = vadd.f32 %v2670_v5, %v608_v6  ;;  %v2922_v8 = vpop.f32.mrb[1].mxu0 }
  0xf7   : > { %v611_v9 = vpop.f32.mrb[2].mxu0 }
  0xf8   : > { %636 = vrot.lane.b32.xlu1 %v609_v7, %s3955_s26  ;;  %630 = vrot.lane.b32.xlu0 %v609_v7, %s3960_s0  ;;  %v2923_v10 = vpop.f32.mrb[3].mxu0  ;;  %v3459_v11 = vpack.c.bf16 %v609_v7, %v609_v7  ;;  %v614_v12 = vmul.f32 0.35355338, %v609_v7 }
  0xfa   : > { %v625_v21 = vpack.c.bf16 %v614_v12, %v614_v12 }
  0xfc   : > { %633 = vrot.lane.b32.xlu0 %v609_v7, %s3962_s19  ;;  %644 = vrot.lane.b32.xlu1 %v3459_v11, %s3953_s18 }
 0x100   : > { %616 = vrot.lane.b32.xlu1 %v614_v12, %s3960_s0 }
 0x16a   : > { %v637_v13 = vpop.permute.xlu1 %636  ;;  %v631_v14 = vpop.permute.xlu0 %630 }
 0x16b   : > { %v3465_v15 = vpack.c.bf16 %v637_v13, %v637_v13  ;;  %v3467_v16 = vpack.c.bf16 %v631_v14, %v631_v14 }
 0x16d   : > { %694 = vrot.lane.b32.xlu0 %v3467_v16, %s3953_s18  ;;  %792 = vrot.lane.b32.xlu1 %v3465_v15, %s3953_s18 }
 0x16e   : > { %v634_v17 = vpop.permute.xlu0 %633  ;;  %v645_v18 = vpop.permute.xlu1 %644 }
 0x16f   : > { %v3473_v19 = vpack.c.bf16 %v634_v17, %v634_v17  ;;  %v651_v20 = vsel %vm646_vm2, %v645_v18, 0 }
 0x170   : > { %2925 = vmatpush3.bf16.xpose.msra.mxu1 %v651_v20 }
 0x171   : > { %743 = vrot.lane.b32.xlu0 %v3473_v19, %s3953_s18  ;;  %622 = vrot.lane.b32.xlu1 %v614_v12, %s3955_s26  ;;  %s3959_s18 = smov 8   ;;  %s3957_s26 = smov 16  }
 0x172   : > { %2936 = vmatprep.subr.bf16.mxu1 %v3278_v1  ;;  %v617_v24 = vpop.permute.xlu1 %616 }
 0x173   : > { %v626_v28 = vpack.c.bf16 %v617_v24, %v617_v24 }
 0x175   : > { %619 = vrot.lane.b32.xlu0 %v614_v12, %s3962_s19 }
 0x177   : > { %2927 = vmatmul.mubr.msk.bf16.vlgmr.msra.gmra.mrb[0].mxu1 %vm646_vm2, %v625_v21 }
 0x178   : > { %2938 = vmatprep.mubr.msk.bf16.mxu1 %vm3279_vm0, %v3278_v1 }
 0x1df   : > { %v695_v22 = vpop.permute.xlu0 %694  ;;  %v793_v27 = vpop.permute.xlu1 %792 }
 0x1e0   : > { %v700_v23 = vsel %vm646_vm2, %v695_v22, 0  ;;  %v798_v30 = vsel %vm646_vm2, %v793_v27, 0 }
 0x1e1   : > { %2931 = vmatpush3.bf16.xpose.msra.mxu0 %v700_v23 }
 0x1e2   : > { %2942 = vmatprep.subr.bf16.mxu0 %v3278_v1 }
 0x1e3   : > { %v744_v25 = vpop.permute.xlu0 %743  ;;  %v623_v32 = vpop.permute.xlu1 %622 }
 0x1e4   : > { %v749_v26 = vsel %vm646_vm2, %v744_v25, 0  ;;  %v628_v33 = vpack.c.bf16 %v623_v32, %v623_v32 }
 0x1e5   : > { %2937 = vmatpush3.bf16.xpose.msra.mxu1 %v749_v26 }
 0x1e6   : > { %2948 = vmatprep.subr.bf16.mxu1 %v3278_v1 }
 0x1e7   : > { %v620_v29 = vpop.permute.xlu0 %619 }
 0x1e8   : > { %2933 = vmatmul.mubr.msk.bf16.vlgmr.msra.gmra.mrb[4].mxu0 %vm646_vm2, %v626_v28  ;;  %v627_v31 = vpack.c.bf16 %v620_v29, %v620_v29 }
 0x1e9   : > { %2943 = vmatpush3.bf16.xpose.msra.mxu0 %v798_v30  ;;  %2944 = vmatprep.mubr.msk.bf16.mxu0 %vm3279_vm0, %v3278_v1 }
 0x1ea   : > { %2954 = vmatprep.subr.bf16.mxu0 %v3278_v1 }
 0x1ec   : > { %2939 = vmatmul.mubr.msk.bf16.vlgmr.msra.gmra.mrb[4].mxu1 %vm646_vm2, %v627_v31 }
 0x1ed   : > { %2950 = vmatprep.mubr.msk.bf16.mxu1 %vm3279_vm0, %v3278_v1 }
 0x1f0   : > { %2945 = vmatmul.mubr.msk.bf16.vlgmr.msra.gmra.mrb[8].mxu0 %vm646_vm2, %v628_v33 }
 0x1f1   : > { %2956 = vmatprep.mubr.msk.bf16.mxu0 %vm3279_vm0, %v3278_v1 }
 0x24a   : > { %v687_v34 = vpop.f32.mrb[0].mxu1 }
 0x24b   : > { %v2928_v35 = vpop.f32.mrb[1].mxu1  ;;  %v840_v36 = vsel %vm646_vm2, %v687_v34, -inf }
 0x24c   : > { %841 = vmax.xlane.f32.xlu0 %v840_v36  ;;  %v690_v37 = vpop.f32.mrb[2].mxu1 }
 0x24d   : > { %v2929_v38 = vpop.f32.mrb[3].mxu1 }
 0x2bb   : > { %v736_v39 = vpop.f32.mrb[4].mxu0 }
 0x2bc   : > { %v2934_v40 = vpop.f32.mrb[5].mxu0  ;;  %v843_v41 = vsel %vm646_vm2, %v736_v39, -inf }
 0x2bd   : > { %844 = vmax.xlane.f32.xlu1 %v843_v41  ;;  %v739_v42 = vpop.f32.mrb[6].mxu0  ;;  %v3116_v40 = vld [vmem:[%s3932_s3] sm:$0xff]   ;;  %v3117_v41 = vld [vmem:[%s3932_s3 + $0x8] sm:$0xff]  }
 0x2be   : > { %v2935_v43 = vpop.f32.mrb[7].mxu0 }
 0x2bf   : > { %v785_v44 = vpop.f32.mrb[4].mxu1 }
 0x2c0   : > { %v2940_v45 = vpop.f32.mrb[5].mxu1  ;;  %v846_v46 = vsel %vm646_vm2, %v785_v44, -inf }
 0x2c1   : > { %847 = vmax.xlane.f32.xlu0 %v846_v46  ;;  %v788_v47 = vpop.f32.mrb[6].mxu1 }
 0x2c2   : > { %v2941_v48 = vpop.f32.mrb[7].mxu1 }
 0x2c3   : > { %v834_v49 = vpop.f32.mrb[8].mxu0 }
 0x2c4   : > { %v2946_v50 = vpop.f32.mrb[9].mxu0  ;;  %v849_v51 = vsel %vm646_vm2, %v834_v49, -inf }
 0x2c5   : > { %850 = vmax.xlane.f32.xlu0 %v849_v51  ;;  %v837_v52 = vpop.f32.mrb[10].mxu0 }
 0x2c6   : > { %v2947_v53 = vpop.f32.mrb[11].mxu0 }
 0x2ce   : > { %888 = vrot.lane.b32.xlu1 %v3459_v11, %s3951_s21 }
 0x2d9   : > { %v842_v54 = vpop.xlane.xlu0 %841 }
 0x2da   : > { %v852_v55 = vsub.f32 %v687_v34, %v842_v54 }
 0x2dc   : > { %v856_v56 = vmul.f32 1.442695, %v852_v55 }
 0x2de   : > { %3172 = vpow2.f32 %v856_v56 }
 0x2e8   : > { %v3173_v57 = vpop.eup %3172 }
 0x2e9   : > { %v864_v58 = vsel %vm646_vm2, %v3173_v57, 0.0 }
 0x2f2   : > { %865 = vadd.xlane.f32.xlu1 %v864_v58 }
 0x34a   : > { %v845_v59 = vpop.xlane.xlu1 %844 }
 0x34b   : > { %v853_v60 = vsub.f32 %v736_v39, %v845_v59 }
 0x34d   : > { %v858_v61 = vmul.f32 1.442695, %v853_v60 }
 0x34e   : > { %v848_v62 = vpop.xlane.xlu0 %847  ;;  %v889_v63 = vpop.permute.xlu1 %888 }
 0x34f   : > { %3174 = vpow2.f32 %v858_v61  ;;  %v854_v0 = vsub.f32 %v785_v44, %v848_v62  ;;  %v895_v2 = vsel %vm893_vm3, %v889_v63, 0  ;;  %v2682_v61 = vld [vmem:[%s3933_s4] ss:$0 sm:$0xff] }
 0x350   : > { %2949 = vmatpush3.bf16.msra.mxu1 %v895_v2 }
 0x351   : > { %v860_v4 = vmul.f32 1.442695, %v854_v0  ;;  %2960 = vmatprep.subr.bf16.mxu1 %v3278_v1 }
 0x352   : > { %v851_v5 = vpop.xlane.xlu0 %850 }
 0x353   : > { %3176 = vpow2.f32 %v860_v4  ;;  %v855_v6 = vsub.f32 %v834_v49, %v851_v5 }
 0x355   : > { %v862_v7 = vmul.f32 1.442695, %v855_v6 }
 0x357   : > { %3178 = vpow2.f32 %v862_v7 }
 0x359   : > { %v3175_v8 = vpop.eup %3174 }
 0x35a   : > { %v867_v9 = vsel %vm646_vm2, %v3175_v8, 0.0 }
 0x35b   : > { %868 = vadd.xlane.f32.xlu0 %v867_v9 }
 0x35d   : > { %v3177_v10 = vpop.eup %3176 }
 0x35e   : > { %v870_v11 = vsel %vm646_vm2, %v3177_v10, 0.0 }
 0x35f   : > { %871 = vadd.xlane.f32.xlu1 %v870_v11 }
 0x361   : > { %v3179_v12 = vpop.eup %3178 }
 0x362   : > { %v873_v13 = vsel %vm646_vm2, %v3179_v12, 0.0 }
 0x363   : > { %874 = vadd.xlane.f32.xlu0 %v873_v13  ;;  %v3118_v13 = vld [vmem:[%s3936_s7] ss:$8 sps:$4 sm:$0xff]  }
 0x370   : > { %985 = vrot.lane.b32.xlu1 %v3473_v19, %s3951_s21 }
 0x374   : > { %1033 = vrot.lane.b32.xlu1 %v3465_v15, %s3951_s21 }
 0x379   : > { %937 = vrot.lane.b32.xlu0 %v3467_v16, %s3951_s21  ;;  %s3981_s21 = smov 104  }
 0x37f   : > { %v866_v14 = vpop.xlane.xlu1 %865 }
 0x380   : > { %3180 = vrcp.f32 %v866_v14  ;;  %v3123_v14 = vld [vmem:[%s3936_s7 + $0x14] ss:$8 sps:$4 sm:$0xff]  }
 0x38a   : > { %v3181_v17 = vpop.eup %3180 }
 0x38b   : > { %v880_v18 = vmul.f32 %v3181_v17, %v3173_v57  ;;  %v3288_v17 = vmov 0  }
 0x38d   : > { %v884_v20 = vpack.c.bf16 %v880_v18, %v880_v18  ;;  %v3124_v18 = vld [vmem:[%s3938_s9 + $0x40] sm:$0xff]  }
 0x38f   : > { %2951 = vmatmul.mubr.msk.bf16.vlgmr.msra.gmra.mrb[8].mxu1 %vm646_vm2, %v884_v20  ;;  %v3125_v20 = vld [vmem:[%s3938_s9] sm:$0xff]  }
 0x390   : > { %2962 = vmatprep.mubr.msk.bf16.mxu1 %vm3279_vm0, %v3278_v1 }
 0x3e8   : > { %v869_v21 = vpop.xlane.xlu0 %868 }
 0x3e9   : > { %3182 = vrcp.f32 %v869_v21  ;;  %v3126_v21 = vld [vmem:[%s3938_s9 + $0x48] sm:$0xff]  }
 0x3ec   : > { %v872_v22 = vpop.xlane.xlu1 %871 }
 0x3ed   : > { %3184 = vrcp.f32 %v872_v22  ;;  %v3127_v22 = vld [vmem:[%s3938_s9 + $0x8] sm:$0xff]  }
 0x3f0   : > { %v986_v19 = vpop.permute.xlu1 %985  ;;  %v875_v23 = vpop.xlane.xlu0 %874 }
 0x3f1   : > { %v991_v15 = vsel %vm893_vm3, %v986_v19, 0  ;;  %3186 = vrcp.f32 %v875_v23  ;;  %v3128_v19 = vld [vmem:[%s3938_s9 + $0x50] sm:$0xff]  }
 0x3f2   : > { %2961 = vmatpush3.bf16.msra.mxu1 %v991_v15  ;;  %v3129_v23 = vld [vmem:[%s3938_s9 + $0x10] sm:$0xff]   ;;  %v3130_v15 = vld [vmem:[%s3938_s9 + $0x58] sm:$0xff]  }
 0x3f3   : > { %v3183_v16 = vpop.eup %3182  ;;  %2972 = vmatprep.subr.bf16.mxu1 %v3278_v1 }
 0x3f4   : > { %v881_v24 = vmul.f32 %v3183_v16, %v3175_v8  ;;  %v938_v25 = vpop.permute.xlu0 %937  ;;  %v1034_v27 = vpop.permute.xlu1 %1033  ;;  %v3131_v16 = vld [vmem:[%s3938_s9 + $0x18] sm:$0xff]  }
 0x3f5   : > { %v943_v26 = vsel %vm893_vm3, %v938_v25, 0  ;;  %v1039_v31 = vsel %vm893_vm3, %v1034_v27, 0  ;;  %v3133_v25 = vld [vmem:[%s3938_s9 + $0x20] sm:$0xff]   ;;  %v3135_v27 = vld [vmem:[%s3938_s9 + $0x28] sm:$0xff]  }
 0x3f6   : > { %2955 = vmatpush3.bf16.msra.mxu0 %v943_v26  ;;  %v885_v28 = vpack.c.bf16 %v881_v24, %v881_v24  ;;  %v3132_v24 = vld [vmem:[%s3938_s9 + $0x60] sm:$0xff]   ;;  %v3134_v26 = vld [vmem:[%s3938_s9 + $0x68] sm:$0xff]  }
 0x3f7   : > { %v3185_v29 = vpop.eup %3184  ;;  %2966 = vmatprep.subr.bf16.mxu0 %v3278_v1 }
 0x3f8   : > { %v882_v30 = vmul.f32 %v3185_v29, %v3177_v10 }
 0x3f9   : > { %2957 = vmatmul.mubr.msk.bf16.vlgmr.msra.gmra.mrb[12].mxu0 %vm646_vm2, %v885_v28 }
 0x3fa   : > { %2967 = vmatpush3.bf16.msra.mxu0 %v1039_v31  ;;  %v886_v32 = vpack.c.bf16 %v882_v30, %v882_v30  ;;  %2968 = vmatprep.mubr.msk.bf16.mxu0 %vm3279_vm0, %v3278_v1 }
 0x3fb   : > { %v3187_v33 = vpop.eup %3186 }
 0x3fc   : > { %v883_v34 = vmul.f32 %v3187_v33, %v3179_v12  ;;  %2963 = vmatmul.mubr.msk.bf16.vlgmr.msra.gmra.mrb[12].mxu1 %vm646_vm2, %v886_v32  ;;  %v3120_v12 = vld [vmem:[%s3936_s7 + $0x4] ss:$8 sps:$4 sm:$0xff]   ;;  %v2686_v32 = vld [vmem:[%s3934_s5] ss:$0 sm:$0xff] }
 0x3fd   : > { %2976 = vmatprep.mubr.msk.bf16.mxu1 %vm3279_vm0, %v3278_v1  ;;  %2973 = vmatpush3.bf16.msra.mxu1 %v3116_v40  ;;  %v3138_v40 = vld [vmem:[%s3938_s9 + $0x78] sm:$0xff]  }
 0x3fe   : > { %v887_v35 = vpack.c.bf16 %v883_v34, %v883_v34  ;;  %2974 = vmatprep.subr.bf16.mxu1 %v3278_v1  ;;  %1236 = vmatprep.subr.bf16.mxu0 %v3120_v12  ;;  %v2687_v34 = vld [vmem:[%s3935_s6] ss:$0 sm:$0xff]  ;;  %v3141_v12 = vld [vmem:[%s3976_s23 + $0x18] sm:$0xff]  }
 0x401   : > { %2969 = vmatmul.mubr.msk.bf16.vlgmr.msra.gmra.mrb[16].mxu0 %vm646_vm2, %v887_v35  ;;  %2975 = vmatpush3.bf16.msra.mxu1 %v3117_v41  ;;  %v3139_v41 = vld [vmem:[%s3938_s9 + $0x38] sm:$0xff]  }
 0x402   : > { %1237 = vmatpush1.bf16.msra.mxu0 %v3118_v13  ;;  %1268 = vmatprep.mubr.bf16.mxu0 %v3288_v17 }
 0x403   : > { %1238 = vmatprep.subr.bf16.mxu0 %v3123_v14  ;;  %2842 = vmatprep.subr.bf16.mxu1 %v3124_v18 }
 0x462   : > { %v931_v36 = vpop.f32.mrb[8].mxu1 }
 0x463   : > { %v2952_v37 = vpop.f32.mrb[9].mxu1 }
 0x464   : > { %v934_v38 = vpop.f32.mrb[10].mxu1 }
 0x465   : > { %v2953_v39 = vpop.f32.mrb[11].mxu1  ;;  %v3136_v38 = vld [vmem:[%s3938_s9 + $0x70] sm:$0xff]  }
 0x466   : > { %v3137_v39 = vld [vmem:[%s3938_s9 + $0x30] sm:$0xff]  }
 0x4cc   : > { %v979_v42 = vpop.f32.mrb[12].mxu0 }
 0x4cd   : > { %1082 = vrot.lane.b32.xlu0 %v979_v42, %s3959_s18  ;;  %v2958_v43 = vpop.f32.mrb[13].mxu0  ;;  %v1203_v42 = vlaneseq  ;;  %s3983_s18 = smov 64  }
 0x4ce   : > { %v982_v44 = vpop.f32.mrb[14].mxu0 }
 0x4cf   : > { %v2959_v45 = vpop.f32.mrb[15].mxu0  ;;  %v1027_v46 = vpop.f32.mrb[12].mxu1  ;;  %v3624_v43 = vshrl.u32 %v1203_v42, 7 }
 0x4d0   : > { %1086 = vrot.lane.b32.xlu1 %v1027_v46, %s3957_s26  ;;  %v2964_v47 = vpop.f32.mrb[13].mxu1  ;;  %v1201_v45 = vld [vmem:[%s3937_s8] sm:$0x3]  ;;  %s3980_s26 = smov 120  }
 0x4d1   : > { %v1030_v48 = vpop.f32.mrb[14].mxu1  ;;  %v1205_v44 = vsub.s32 0, %v3624_v43  ;;  %v1209_v46 = vsub.s32 1, %v3624_v43 }
 0x4d2   : > { %v2965_v49 = vpop.f32.mrb[15].mxu1 }
 0x4d3   : > { %v1206_v47 = vrot.slane %v1201_v45, %v1205_v44  ;;  %v1210_v48 = vrot.slane %v1201_v45, %v1209_v46 }
 0x4d4   : > { %v1075_v50 = vpop.f32.mrb[16].mxu0 }
 0x4d5   : > { %1090 = vrot.lane.b32.xlu0 %v1075_v50, %s3958_s22  ;;  %v2970_v51 = vpop.f32.mrb[17].mxu0 }
 0x4d6   : > { %v1078_v52 = vpop.f32.mrb[18].mxu0 }
 0x4d7   : > { %v2971_v53 = vpop.f32.mrb[19].mxu0 }
 0x53f   : > { %v1083_v54 = vpop.permute.xlu0 %1082 }
 0x540   : > { %v1093_v56 = vsel %vm646_vm2, %v931_v36, %v1083_v54 }
 0x542   : > { %v1087_v55 = vpop.permute.xlu1 %1086 }
 0x543   : > { %v1095_v57 = vsel %vm1094_vm4, %v1093_v56, %v1087_v55 }
 0x547   : > { %v1091_v58 = vpop.permute.xlu0 %1090 }
 0x548   : > { %v1097_v59 = vsel %vm1096_vm5, %v1095_v57, %v1091_v58 }
 0x549   : > { %v1098_v60 = vpack.c.bf16 %v1097_v59, %v1097_v59 }
 0x54b   : > { %2977 = vmatmul.mubr.msk.bf16.vlgmr.msra.gmra.mrb[16].mxu1 %vm570_vm1, %v1098_v60  ;;  %v2693_v60 = vld [vmem:[%s3939_s10] ss:$0 sm:$0xff] }
 0x54c   : > { %2843 = vmatpush3.bf16.msra.mxu1 %v3125_v20  ;;  %v2710_v20 = vld [vmem:[%s3940_s11] ss:$0 sm:$0xff] }
 0x54d   : > { %2844 = vmatprep.subr.bf16.mxu1 %v3126_v21 }
 0x550   : > { %2845 = vmatpush3.bf16.msra.mxu1 %v3127_v22  ;;  %v2711_v22 = vld [vmem:[%s3941_s12] ss:$0 sm:$0xff] }
 0x551   : > { %2846 = vmatprep.subr.bf16.mxu1 %v3128_v19 }
 0x554   : > { %2847 = vmatpush3.bf16.msra.mxu1 %v3129_v23 }
 0x555   : > { %2848 = vmatprep.subr.bf16.mxu1 %v3130_v15 }
 0x558   : > { %2849 = vmatpush3.bf16.msra.mxu1 %v3131_v16  ;;  %v2717_v16 = vld [vmem:[%s3978_s2 + $0x1] ss:$0 sm:$0xff] }
 0x559   : > { %2850 = vmatprep.subr.bf16.mxu1 %v3132_v24 }
 0x55c   : > { %2851 = vmatpush3.bf16.msra.mxu1 %v3133_v25 }
 0x55d   : > { %2852 = vmatprep.subr.bf16.mxu1 %v3134_v26 }
 0x560   : > { %2853 = vmatpush3.bf16.msra.mxu1 %v3135_v27 }
 0x561   : > { %2854 = vmatprep.subr.bf16.mxu1 %v3136_v38 }
 0x564   : > { %2855 = vmatpush3.bf16.msra.mxu1 %v3137_v39 }
 0x565   : > { %2856 = vmatprep.subr.bf16.mxu1 %v3138_v40 }
 0x568   : > { %2857 = vmatpush3.bf16.msra.mxu1 %v3139_v41 }
 0x569   : > { %3006 = vmatprep.subr.bf16.mxu1 %v3278_v1 }
 0x61e   : > { %v1159_v62 = vpop.f32.mrb[16].mxu1 }
 0x61f   : > { %v1160_v63 = vadd.f32 %v2682_v61, %v1159_v62  ;;  %v2978_v0 = vpop.f32.mrb[17].mxu1 }
 0x620   : > { %v1162_v2 = vpop.f32.mrb[18].mxu1 }
 0x621   : > { %v2979_v4 = vpop.f32.mrb[19].mxu1  ;;  %v1165_v5 = vadd.f32 %v1160_v63, %v3447_v3  ;;  %v3121_v3 = vld [vmem:[%s3936_s7 + $0x10] ss:$8 sps:$4 sm:$0xff]  }
 0x622   : > { %1239 = vmatpush1.bf16.msra.mxu0 %v3121_v3 }
 0x623   : > { %v1168_v6 = vsel %vm570_vm1, %v1165_v5, 0.0  ;;  %2980 = vmatprep.subr.bf16.mxu0 %v3278_v1 }
 0x624   : > { %1169 = vadd.xlane.f32.xlu1 %v1168_v6 }
 0x6b1   : > { %v1170_v7 = vpop.xlane.xlu1 %1169 }
 0x6b2   : > { %v1172_v8 = vmul.f32 0.03125, %v1170_v7 }
 0x6b4   : > { %v1173_v9 = vsub.f32 %v1165_v5, %v1172_v8 }
 0x6b6   : > { %v1174_v10 = vmul.f32 %v1173_v9, %v1173_v9 }
 0x6b8   : > { %v1175_v11 = vsel %vm570_vm1, %v1174_v10, 0.0 }
 0x6b9   : > { %1176 = vadd.xlane.f32.xlu0 %v1175_v11  ;;  %v3140_v11 = vld [vmem:[%s3976_s23 + $0x10] sm:$0xff]  }
 0x746   : > { %v1177_v28 = vpop.xlane.xlu0 %1176 }
 0x747   : > { %v1178_v29 = vmul.f32 0.03125, %v1177_v28 }
 0x749   : > { %v1179_v30 = vadd.f32 1e-05, %v1178_v29 }
 0x74b   : > { %3188 = vrsqrt.f32 %v1179_v30 }
 0x755   : > { %v3189_v31 = vpop.eup %3188 }
 0x756   : > { %v1181_v33 = vmul.f32 %v3189_v31, %v1173_v9 }
 0x758   : > { %v1188_v35 = vmul.f32 %v2686_v32, %v1181_v33 }
 0x75a   : > { %v1195_v36 = vadd.f32 %v2687_v34, %v1188_v35 }
 0x75c   : > { %v1196_v37 = vpack.c.bf16 %v1195_v36, %v1195_v36 }
 0x75e   : > { %2692 = vmatmul.mubr.msk.bf16.vlgmr.msra.gmra.mrb[20].mxu0 %vm570_vm1, %v1196_v37 }
 0x75f   : > { %2984 = vmatprep.mubr.msk.bf16.mxu0 %vm3279_vm0, %v3278_v1  ;;  %2981 = vmatpush3.bf16.msra.mxu0 %v3140_v11 }
 0x760   : > { %2982 = vmatprep.subr.bf16.mxu0 %v3278_v1 }
 0x763   : > { %2983 = vmatpush3.bf16.msra.mxu0 %v3141_v12 }
 0x764   : > { %2988 = vmatprep.subr.bf16.mxu0 %v3278_v1 }
 0x831   : > { %v1270_v49 = vpop.f32.mrb[20].mxu0 }
 0x832   : > { %v1271_v50 = vadd.f32 %v1270_v49, %v1206_v47  ;;  %v1272_v51 = vpop.f32.mrb[21].mxu0 }
 0x833   : > { %v1273_v52 = vadd.f32 %v1272_v51, %v1210_v48  ;;  %v1274_v53 = vpop.f32.mrb[22].mxu0 }
 0x834   : > { %v1277_v54 = vmax.f32 %v1271_v50, 0.0  ;;  %v1275_v55 = vpop.f32.mrb[23].mxu0 }
 0x835   : > { %v1278_v56 = vmax.f32 %v1273_v52, 0.0 }
 0x836   : > { %v1279_v58 = vpack.c.bf16 %v1277_v54, %v1277_v54 }
 0x837   : > { %v1280_v57 = vpack.c.bf16 %v1278_v56, %v1278_v56 }
 0x839   : > { %1448 = vmatprep.mubr.bf16.mxu1 %v1280_v57 }
 0x83a   : > { %1449 = vmatmul.mubr.bf16.vlgmr.msra.gmra.mrb[20].mxu1 %v1279_v58 }
 0x83b   : > { %3008 = vmatprep.mubr.msk.bf16.mxu1 %vm3279_vm0, %v3278_v1 }
 0x90d   : > { %v2858_v59 = vpop.f32.mrb[20].mxu1 }
 0x90e   : > { %v2859_v61 = vpop.f32.mrb[21].mxu1 }
 0x90f   : > { %v2860_v62 = vadd.f32 %v2859_v61, %v2858_v59  ;;  %v2861_v63 = vpop.f32.mrb[22].mxu1 }
 0x910   : > { %v2862_v0 = vpop.f32.mrb[23].mxu1 }
 0x911   : > { %v1451_v2 = vadd.f32 %v2860_v62, %v2693_v60 }
 0x913   : > { %v1456_v4 = vadd.f32 %v1451_v2, %v1195_v36 }
 0x915   : > { %v1459_v5 = vsel %vm570_vm1, %v1456_v4, 0.0 }
 0x916   : > { %1460 = vadd.xlane.f32.xlu0 %v1459_v5 }
 0x9a3   : > { %v1461_v6 = vpop.xlane.xlu0 %1460 }
 0x9a4   : > { %v1462_v7 = vmul.f32 0.03125, %v1461_v6 }
 0x9a6   : > { %v1463_v8 = vsub.f32 %v1456_v4, %v1462_v7 }
 0x9a8   : > { %v1464_v9 = vmul.f32 %v1463_v8, %v1463_v8 }
 0x9aa   : > { %v1465_v10 = vsel %vm570_vm1, %v1464_v9, 0.0 }
 0x9ab   : > { %1466 = vadd.xlane.f32.xlu1 %v1465_v10 }
 0xa38   : > { %v1467_v13 = vpop.xlane.xlu1 %1466 }
 0xa39   : > { %v1468_v3 = vmul.f32 0.03125, %v1467_v13 }
 0xa3b   : > { %v1469_v14 = vadd.f32 1e-05, %v1468_v3 }
 0xa3d   : > { %3190 = vrsqrt.f32 %v1469_v14 }
 0xa47   : > { %v3191_v18 = vpop.eup %3190 }
 0xa48   : > { %v1471_v21 = vmul.f32 %v3191_v18, %v1463_v8 }
 0xa4a   : > { %v1478_v19 = vmul.f32 %v2710_v20, %v1471_v21 }
 0xa4c   : > { %v3656_v23 = vadd.f32 %v2711_v22, %v1478_v19 }
 0xa4e   : > { %v1486_v15 = vpack.c.bf16 %v3656_v23, %v3656_v23 }
 0xa50   : > { %2985 = vmatmul.mubr.msk.bf16.vlgmr.msra.gmra.mrb[24].mxu0 %vm570_vm1, %v1486_v15 }
 0xa51   : > { %2990 = vmatprep.mubr.msk.bf16.mxu0 %vm3279_vm0, %v3278_v1 }
 0xb23   : > { %v1549_v24 = vpop.f32.mrb[24].mxu0 }
 0xb24   : > { %v1550_v25 = vadd.f32 %v2717_v16, %v1549_v24  ;;  %v2986_v26 = vpop.f32.mrb[25].mxu0 }
 0xb25   : > { %v1552_v27 = vpop.f32.mrb[26].mxu0 }
 0xb26   : > { %1574 = vrot.lane.b32.xlu1 %v1550_v25, %s3979_s30  ;;  %1571 = vrot.lane.b32.xlu0 %v1550_v25, %s3980_s26  ;;  %v2987_v28 = vpop.f32.mrb[27].mxu0  ;;  %v3668_v29 = vpack.c.bf16 %v1550_v25, %v1550_v25  ;;  %v1555_v30 = vmul.f32 0.35355338, %v1550_v25 }
 0xb28   : > { %v1566_v39 = vpack.c.bf16 %v1555_v30, %v1555_v30 }
 0xb2a   : > { %1577 = vrot.lane.b32.xlu1 %v1550_v25, %s3981_s21  ;;  %1585 = vrot.lane.b32.xlu0 %v3668_v29, %s3982_s29 }
 0xb2e   : > { %1557 = vrot.lane.b32.xlu0 %v1555_v30, %s3980_s26  ;;  %s3986_s26 = smov 16  }
 0xb98   : > { %v1575_v31 = vpop.permute.xlu1 %1574  ;;  %v1572_v32 = vpop.permute.xlu0 %1571 }
 0xb99   : > { %v3674_v33 = vpack.c.bf16 %v1572_v32, %v1572_v32  ;;  %v3678_v36 = vpack.c.bf16 %v1575_v31, %v1575_v31 }
 0xb9b   : > { %1634 = vrot.lane.b32.xlu1 %v3674_v33, %s3982_s29 }
 0xb9c   : > { %v1578_v34 = vpop.permute.xlu1 %1577  ;;  %v1586_v35 = vpop.permute.xlu0 %1585 }
 0xb9d   : > { %v3680_v37 = vpack.c.bf16 %v1578_v34, %v1578_v34  ;;  %v1591_v38 = vsel %vm646_vm2, %v1586_v35, 0 }
 0xb9e   : > { %2989 = vmatpush3.bf16.xpose.msra.mxu0 %v1591_v38 }
 0xb9f   : > { %1683 = vrot.lane.b32.xlu1 %v3678_v36, %s3982_s29  ;;  %1732 = vrot.lane.b32.xlu0 %v3680_v37, %s3982_s29 }
 0xba0   : > { %2994 = vmatprep.subr.bf16.mxu0 %v3278_v1  ;;  %v1558_v40 = vpop.permute.xlu0 %1557 }
 0xba1   : > { %v1567_v49 = vpack.c.bf16 %v1558_v40, %v1558_v40 }
 0xba3   : > { %1560 = vrot.lane.b32.xlu1 %v1555_v30, %s3979_s30  ;;  %1563 = vrot.lane.b32.xlu0 %v1555_v30, %s3981_s21  ;;  %s3985_s30 = smov 24   ;;  %s537_s21 = sand.u32 1, %s3268_s25  }
 0xba4   : > { %s2668_s29 = sshll.u32 %s537_s21, 3 }
 0xba5   : > { %2991 = vmatmul.mubr.msk.bf16.vlgmr.msra.gmra.mrb[28].mxu0 %vm646_vm2, %v1566_v39  ;;  %s539_s22 = scalar_lea.vmem [#allocation2], %s2668_s29 }
 0xba6   : > { %2996 = vmatprep.mubr.msk.bf16.mxu0 %vm3279_vm0, %v3278_v1  ;;  %s2605_s0 = sshll.u32 %s539_s22, 4  ;;  %s3889_s0 = int_to_ptr.vmem [resolvable:$true] %s2605_s0 }
 0xc0d   : > { %v1635_v41 = vpop.permute.xlu1 %1634 }
 0xc0e   : > { %v1640_v42 = vsel %vm646_vm2, %v1635_v41, 0 }
 0xc0f   : > { %2995 = vmatpush3.bf16.xpose.msra.mxu0 %v1640_v42 }
 0xc10   : > { %3000 = vmatprep.subr.bf16.mxu0 %v3278_v1 }
 0xc11   : > { %v1733_v45 = vpop.permute.xlu0 %1732  ;;  %v1684_v48 = vpop.permute.xlu1 %1683 }
 0xc12   : > { %v1738_v47 = vsel %vm646_vm2, %v1733_v45, 0  ;;  %v1689_v51 = vsel %vm646_vm2, %v1684_v48, 0 }
 0xc13   : > { %3007 = vmatpush3.bf16.xpose.msra.mxu1 %v1738_v47 }
 0xc14   : > { %3018 = vmatprep.subr.bf16.mxu1 %v3278_v1 }
 0xc15   : > { %v1564_v50 = vpop.permute.xlu0 %1563  ;;  %v1561_v53 = vpop.permute.xlu1 %1560 }
 0xc16   : > { %2997 = vmatmul.mubr.msk.bf16.vlgmr.msra.gmra.mrb[32].mxu0 %vm646_vm2, %v1567_v49  ;;  %v1569_v52 = vpack.c.bf16 %v1564_v50, %v1564_v50  ;;  %v1568_v54 = vpack.c.bf16 %v1561_v53, %v1561_v53 }
 0xc17   : > { %3001 = vmatpush3.bf16.xpose.msra.mxu0 %v1689_v51  ;;  %3002 = vmatprep.mubr.msk.bf16.mxu0 %vm3279_vm0, %v3278_v1 }
 0xc18   : > { %3012 = vmatprep.subr.bf16.mxu0 %v3278_v1 }
 0xc1a   : > { %3009 = vmatmul.mubr.msk.bf16.vlgmr.msra.gmra.mrb[24].mxu1 %vm646_vm2, %v1569_v52 }
 0xc1b   : > { %3020 = vmatprep.mubr.msk.bf16.mxu1 %vm3279_vm0, %v3278_v1 }
 0xc1e   : > { %3003 = vmatmul.mubr.msk.bf16.vlgmr.msra.gmra.mrb[36].mxu0 %vm646_vm2, %v1568_v54 }
 0xc1f   : > { %3014 = vmatprep.mubr.msk.bf16.mxu0 %vm3279_vm0, %v3278_v1 }
 0xc78   : > { %v1627_v55 = vpop.f32.mrb[28].mxu0 }
 0xc79   : > { %v2992_v56 = vpop.f32.mrb[29].mxu0  ;;  %v1780_v57 = vsel %vm646_vm2, %v1627_v55, -inf }
 0xc7a   : > { %1781 = vmax.xlane.f32.xlu1 %v1780_v57  ;;  %v1630_v58 = vpop.f32.mrb[30].mxu0 }
 0xc7b   : > { %v2993_v59 = vpop.f32.mrb[31].mxu0 }
 0xce9   : > { %v1676_v60 = vpop.f32.mrb[32].mxu0 }
 0xcea   : > { %v2998_v61 = vpop.f32.mrb[33].mxu0  ;;  %v1783_v62 = vsel %vm646_vm2, %v1676_v60, -inf }
 0xceb   : > { %1784 = vmax.xlane.f32.xlu0 %v1783_v62  ;;  %v1679_v63 = vpop.f32.mrb[34].mxu0 }
 0xcec   : > { %v2999_v0 = vpop.f32.mrb[35].mxu0 }
 0xced   : > { %v1774_v2 = vpop.f32.mrb[24].mxu1 }
 0xcee   : > { %v3010_v4 = vpop.f32.mrb[25].mxu1  ;;  %v1789_v5 = vsel %vm646_vm2, %v1774_v2, -inf }
 0xcef   : > { %v1777_v6 = vpop.f32.mrb[26].mxu1  ;;  %1790 = vmax.xlane.f32.xlu1 %v1789_v5  ;;  %v3143_v4 = vld [vmem:[%s3932_s3 + $0x18] sm:$0xff]  }
 0xcf0   : > { %v3011_v7 = vpop.f32.mrb[27].mxu1 }
 0xcf1   : > { %v1725_v8 = vpop.f32.mrb[36].mxu0 }
 0xcf2   : > { %v3004_v9 = vpop.f32.mrb[37].mxu0  ;;  %v1786_v10 = vsel %vm646_vm2, %v1725_v8, -inf }
 0xcf3   : > { %1787 = vmax.xlane.f32.xlu0 %v1786_v10  ;;  %v1728_v11 = vpop.f32.mrb[38].mxu0 }
 0xcf4   : > { %v3005_v12 = vpop.f32.mrb[39].mxu0 }
 0xd00   : > { %1876 = vrot.lane.b32.xlu1 %v3674_v33, %s3983_s18 }
 0xd07   : > { %v1782_v13 = vpop.xlane.xlu1 %1781 }
 0xd08   : > { %v1792_v3 = vsub.f32 %v1627_v55, %v1782_v13 }
 0xd09   : > { %1828 = vrot.lane.b32.xlu0 %v3668_v29, %s3983_s18 }
 0xd0a   : > { %v1796_v14 = vmul.f32 1.442695, %v1792_v3 }
 0xd0c   : > { %3192 = vpow2.f32 %v1796_v14 }
 0xd16   : > { %v3193_v18 = vpop.eup %3192 }
 0xd17   : > { %v1804_v20 = vsel %vm646_vm2, %v3193_v18, 0.0 }
 0xd28   : > { %1805 = vadd.xlane.f32.xlu0 %v1804_v20 }
 0xd78   : > { %v1785_v21 = vpop.xlane.xlu0 %1784 }
 0xd79   : > { %v1793_v22 = vsub.f32 %v1676_v60, %v1785_v21 }
 0xd7b   : > { %v1798_v19 = vmul.f32 1.442695, %v1793_v22 }
 0xd7c   : > { %v1791_v15 = vpop.xlane.xlu1 %1790 }
 0xd7d   : > { %3194 = vpow2.f32 %v1798_v19  ;;  %v1795_v16 = vsub.f32 %v1774_v2, %v1791_v15  ;;  %v3142_v2 = vld [vmem:[%s3932_s3 + $0x10] sm:$0xff]  }
 0xd7f   : > { %v1802_v24 = vmul.f32 1.442695, %v1795_v16 }
 0xd80   : > { %v1877_v25 = vpop.permute.xlu1 %1876  ;;  %v1788_v26 = vpop.xlane.xlu0 %1787 }
 0xd81   : > { %3196 = vpow2.f32 %v1802_v24  ;;  %v1882_v27 = vsel %vm893_vm3, %v1877_v25, 0  ;;  %v1794_v28 = vsub.f32 %v1725_v8, %v1788_v26  ;;  %v2734_v24 = vld [vmem:[%s3933_s4 + $0x1] ss:$0 sm:$0xff] }
 0xd82   : > { %3019 = vmatpush3.bf16.msra.mxu1 %v1882_v27 }
 0xd83   : > { %v1800_v29 = vmul.f32 1.442695, %v1794_v28  ;;  %3030 = vmatprep.subr.bf16.mxu1 %v3278_v1 }
 0xd84   : > { %v1829_v30 = vpop.permute.xlu0 %1828 }
 0xd85   : > { %3198 = vpow2.f32 %v1800_v29  ;;  %v1834_v31 = vsel %vm893_vm3, %v1829_v30, 0 }
 0xd86   : > { %3013 = vmatpush3.bf16.msra.mxu0 %v1834_v31 }
 0xd87   : > { %v3195_v32 = vpop.eup %3194  ;;  %3024 = vmatprep.subr.bf16.mxu0 %v3278_v1 }
 0xd88   : > { %v1807_v33 = vsel %vm646_vm2, %v3195_v32, 0.0 }
 0xd89   : > { %1808 = vadd.xlane.f32.xlu1 %v1807_v33 }
 0xd8b   : > { %v3197_v34 = vpop.eup %3196 }
 0xd8c   : > { %v1813_v35 = vsel %vm646_vm2, %v3197_v34, 0.0 }
 0xd8d   : > { %1814 = vadd.xlane.f32.xlu1 %v1813_v35 }
 0xd8f   : > { %v3199_v38 = vpop.eup %3198 }
 0xd90   : > { %v1810_v39 = vsel %vm646_vm2, %v3199_v38, 0.0 }
 0xd91   : > { %1811 = vadd.xlane.f32.xlu0 %v1810_v39  ;;  %v3146_v39 = vld [vmem:[%s3936_s7 + $0x24] ss:$8 sps:$4 sm:$0xff]  }
 0xd9e   : > { %1924 = vrot.lane.b32.xlu1 %v3678_v36, %s3983_s18 }
 0xda7   : > { %1972 = vrot.lane.b32.xlu0 %v3680_v37, %s3983_s18  ;;  %s2817_s18 = sshll.u32 %s3401_s28, 7  ;;  %s3289_s28 = smov [#allocation2]  }
 0xda8   : > { %s3218_s29 = sshll.u32 %s3289_s28, 4  ;;  %s3219_s29 = int_to_ptr.vmem [resolvable:$false] %s3218_s29 }
 0xda9   : > { %s3220_s2 = scalar_lea.vmem %s3219_s29, 256  ;;  %p3221_p0 = scmp.lt.s32.totalorder %s3889_s0, %s3219_s29 }
 0xdb5   : > { %v1806_v40 = vpop.xlane.xlu0 %1805 }
 0xdb6   : > { %3200 = vrcp.f32 %v1806_v40  ;;  %v3144_v40 = vld [vmem:[%s3936_s7 + $0x20] ss:$8 sps:$4 sm:$0xff]  }
 0xdc0   : > { %v3201_v41 = vpop.eup %3200 }
 0xdc1   : > { %v1820_v42 = vmul.f32 %v3201_v41, %v3193_v18  ;;  %v3149_v41 = vld [vmem:[%s3936_s7 + $0x34] ss:$8 sps:$4 sm:$0xff]  }
 0xdc3   : > { %v1824_v45 = vpack.c.bf16 %v1820_v42, %v1820_v42  ;;  %v3150_v42 = vld [vmem:[%s3938_s9 + $0xc0] sm:$0xff]  }
 0xdc5   : > { %3015 = vmatmul.mubr.msk.bf16.vlgmr.msra.gmra.mrb[40].mxu0 %vm646_vm2, %v1824_v45  ;;  %v3151_v45 = vld [vmem:[%s3938_s9 + $0x80] sm:$0xff]  }
 0xdc6   : > { %3026 = vmatprep.mubr.msk.bf16.mxu0 %vm3279_vm0, %v3278_v1 }
 0xe16   : > { %v1809_v47 = vpop.xlane.xlu1 %1808 }
 0xe17   : > { %3202 = vrcp.f32 %v1809_v47  ;;  %v3152_v47 = vld [vmem:[%s3938_s9 + $0xc8] sm:$0xff]  }
 0xe1a   : > { %v1815_v48 = vpop.xlane.xlu1 %1814 }
 0xe1b   : > { %3204 = vrcp.f32 %v1815_v48  ;;  %v3153_v48 = vld [vmem:[%s3938_s9 + $0x88] sm:$0xff]  }
 0xe1e   : > { %v1925_v49 = vpop.permute.xlu1 %1924  ;;  %v1812_v50 = vpop.xlane.xlu0 %1811 }
 0xe1f   : > { %v1930_v36 = vsel %vm893_vm3, %v1925_v49, 0  ;;  %3206 = vrcp.f32 %v1812_v50  ;;  %v3154_v49 = vld [vmem:[%s3938_s9 + $0xd0] sm:$0xff]  }
 0xe20   : > { %3025 = vmatpush3.bf16.msra.mxu0 %v1930_v36  ;;  %v3155_v50 = vld [vmem:[%s3938_s9 + $0x90] sm:$0xff]   ;;  %v3156_v36 = vld [vmem:[%s3938_s9 + $0xd8] sm:$0xff]  }
 0xe21   : > { %v3203_v37 = vpop.eup %3202  ;;  %3036 = vmatprep.subr.bf16.mxu0 %v3278_v1 }
 0xe22   : > { %v1821_v51 = vmul.f32 %v3203_v37, %v3195_v32  ;;  %v1973_v52 = vpop.permute.xlu0 %1972  ;;  %v3157_v37 = vld [vmem:[%s3938_s9 + $0x98] sm:$0xff]  }
 0xe23   : > { %v1978_v55 = vsel %vm893_vm3, %v1973_v52, 0  ;;  %v3159_v52 = vld [vmem:[%s3938_s9 + $0xa0] sm:$0xff]  }
 0xe24   : > { %v1825_v53 = vpack.c.bf16 %v1821_v51, %v1821_v51  ;;  %v3158_v51 = vld [vmem:[%s3938_s9 + $0xe0] sm:$0xff]  }
 0xe25   : > { %v3205_v54 = vpop.eup %3204 }
 0xe26   : > { %3021 = vmatmul.mubr.msk.bf16.vlgmr.msra.gmra.mrb[28].mxu1 %vm646_vm2, %v1825_v53  ;;  %v1823_v56 = vmul.f32 %v3205_v54, %v3197_v34  ;;  %v3160_v53 = vld [vmem:[%s3938_s9 + $0xe8] sm:$0xff]  }
 0xe27   : > { %3031 = vmatpush3.bf16.msra.mxu1 %v1978_v55  ;;  %3032 = vmatprep.mubr.msk.bf16.mxu1 %vm3279_vm0, %v3278_v1  ;;  %v3161_v54 = vld [vmem:[%s3938_s9 + $0xa8] sm:$0xff]  }
 0xe28   : > { %v1827_v60 = vpack.c.bf16 %v1823_v56, %v1823_v56  ;;  %2178 = vmatprep.subr.bf16.mxu1 %v3146_v39  ;;  %v2804_v39 = vld [vmem:[%s3940_s11 + $0x1] ss:$0 sm:$0xff] }
 0xe29   : > { %v3207_v57 = vpop.eup %3206 }
 0xe2a   : > { %v1822_v58 = vmul.f32 %v3207_v57, %v3199_v38 }
 0xe2c   : > { %v1826_v59 = vpack.c.bf16 %v1822_v58, %v1822_v58 }
 0xe2e   : > { %3027 = vmatmul.mubr.msk.bf16.vlgmr.msra.gmra.mrb[44].mxu0 %vm646_vm2, %v1826_v59  ;;  %3033 = vmatmul.mubr.msk.bf16.vlgmr.msra.gmra.mrb[32].mxu1 %vm646_vm2, %v1827_v60  ;;  %v2740_v59 = vld [vmem:[%s3934_s5 + $0x1] ss:$0 sm:$0xff] }
 0xe2f   : > { %3040 = vmatprep.mubr.msk.bf16.mxu0 %vm3279_vm0, %v3278_v1  ;;  %2210 = vmatprep.mubr.bf16.mxu1 %v3288_v17 }
 0xe30   : > { %3037 = vmatpush3.bf16.msra.mxu0 %v3142_v2  ;;  %2179 = vmatpush1.bf16.msra.mxu1 %v3144_v40  ;;  %v3162_v2 = vld [vmem:[%s3938_s9 + $0xf0] sm:$0xff]  }
 0xe31   : > { %3038 = vmatprep.subr.bf16.mxu0 %v3278_v1  ;;  %2180 = vmatprep.subr.bf16.mxu1 %v3149_v41 }
 0xe34   : > { %3039 = vmatpush3.bf16.msra.mxu0 %v3143_v4  ;;  %v3163_v4 = vld [vmem:[%s3938_s9 + $0xb0] sm:$0xff]  }
 0xe35   : > { %2886 = vmatprep.subr.bf16.mxu0 %v3150_v42 }
 0xe98   : > { %v1870_v61 = vpop.f32.mrb[40].mxu0 }
 0xe99   : > { %v3016_v62 = vpop.f32.mrb[41].mxu0 }
 0xe9a   : > { %v1873_v63 = vpop.f32.mrb[42].mxu0 }
 0xe9b   : > { %v3017_v0 = vpop.f32.mrb[43].mxu0 }
 0xef9   : > { %v1918_v5 = vpop.f32.mrb[28].mxu1 }
 0xefa   : > { %2021 = vrot.lane.b32.xlu1 %v1918_v5, %s3984_s20  ;;  %v3022_v17 = vpop.f32.mrb[29].mxu1  ;;  %v3164_v5 = vld [vmem:[%s3938_s9 + $0xf8] sm:$0xff]   ;;  %s3887_s20 = scalar_lea.hbm %s3946_s17, %s2817_s18 }
 0xefb   : > { %v1921_v6 = vpop.f32.mrb[30].mxu1  ;;  %v3165_v17 = vld [vmem:[%s3938_s9 + $0xb8] sm:$0xff]  }
 0xefc   : > { %v3023_v7 = vpop.f32.mrb[31].mxu1  ;;  %v2746_v6 = vld [vmem:[%s3937_s8 + $0x2] sm:$0x3] }
 0xefd   : > { %v2148_v7 = vrot.slane %v2746_v6, %v1205_v44  ;;  %v2785_v44 = vld [vmem:[%s3939_s10 + $0x1] ss:$0 sm:$0xff] }
 0xf01   : > { %v1966_v8 = vpop.f32.mrb[44].mxu0  ;;  %v2014_v9 = vpop.f32.mrb[32].mxu1 }
 0xf02   : > { %2029 = vrot.lane.b32.xlu1 %v2014_v9, %s3985_s30  ;;  %v3034_v10 = vpop.f32.mrb[33].mxu1  ;;  %2025 = vrot.lane.b32.xlu0 %v1966_v8, %s3986_s26  ;;  %v3028_v11 = vpop.f32.mrb[45].mxu0  ;;  %v2152_v8 = vrot.slane %v2746_v6, %v1209_v46  ;;  %s2592_s30 = scalar_lea.sflag [#allocation3], %s537_s21  ;;  %s3214_s26 = scalar_lea.vmem %s3889_s0, 128 }
 0xf03   : > { %v1969_v12 = vpop.f32.mrb[46].mxu0  ;;  %v2017_v13 = vpop.f32.mrb[34].mxu1  ;;  %p3215_p11 = scmp.ne.s32.totalorder %s3889_s0, %s3214_s26  ;;  %p3222_p1 = scmp.lt.s32.totalorder %s3220_s2, %s3214_s26 }
 0xf04   : > { %v3029_v3 = vpop.f32.mrb[47].mxu0  ;;  %v3035_v14 = vpop.f32.mrb[35].mxu1 }
 0xf05   : > { %p3216_p12 = pnand %p3215_p11, %p3418_p5  ;;  %p3223_p2 = por %p3222_p1, %p3221_p0 }
 0xf07   : > { %p3217_p13 = pneg %p3216_p12 }
 0xf09   : > { %p3224_p3 = pnand %p3223_p2, %p3217_p13 }
 0xf6c   : > { %v2022_v18 = vpop.permute.xlu1 %2021 }
 0xf6d   : > { %v2032_v20 = vsel %vm646_vm2, %v1870_v61, %v2022_v18  ;;  %v2741_v61 = vld [vmem:[%s3935_s6 + $0x1] ss:$0 sm:$0xff] }
 0xf74   : > { %v2030_v21 = vpop.permute.xlu1 %2029  ;;  %v2026_v22 = vpop.permute.xlu0 %2025 }
 0xf75   : > { %v2033_v19 = vsel %vm1094_vm4, %v2032_v20, %v2026_v22 }
 0xf76   : > { %v2034_v15 = vsel %vm1096_vm5, %v2033_v19, %v2030_v21 }
 0xf77   : > { %v2035_v16 = vpack.c.bf16 %v2034_v15, %v2034_v15 }
 0xf79   : > { %3041 = vmatmul.mubr.msk.bf16.vlgmr.msra.gmra.mrb[48].mxu0 %vm570_vm1, %v2035_v16 }
 0xf7a   : > { %2887 = vmatpush3.bf16.msra.mxu0 %v3151_v45  ;;  %v3168_v45 = vld [vmem:[%s3944_s15] sm:$0xff]  }
 0xf7b   : > { %2888 = vmatprep.subr.bf16.mxu0 %v3152_v47 }
 0xf7e   : > { %2889 = vmatpush3.bf16.msra.mxu0 %v3153_v48  ;;  %v3169_v48 = vld [vmem:[%s3944_s15 + $0x8] sm:$0xff]  }
 0xf7f   : > { %2890 = vmatprep.subr.bf16.mxu0 %v3154_v49  ;;  %v3170_v49 = vld [vmem:[%s3944_s15 + $0x10] sm:$0xff]  }
 0xf82   : > { %2891 = vmatpush3.bf16.msra.mxu0 %v3155_v50  ;;  %v3171_v50 = vld [vmem:[%s3944_s15 + $0x18] sm:$0xff]  }
 0xf83   : > { %2892 = vmatprep.subr.bf16.mxu0 %v3156_v36  ;;  %v2806_v36 = vld [vmem:[%s3943_s14] ss:$0 sm:$0xff] }
 0xf86   : > { %2893 = vmatpush3.bf16.msra.mxu0 %v3157_v37 }
 0xf87   : > { %2894 = vmatprep.subr.bf16.mxu0 %v3158_v51 }
 0xf8a   : > { %2895 = vmatpush3.bf16.msra.mxu0 %v3159_v52 }
 0xf8b   : > { %2896 = vmatprep.subr.bf16.mxu0 %v3160_v53 }
 0xf8e   : > { %2897 = vmatpush3.bf16.msra.mxu0 %v3161_v54 }
 0xf8f   : > { %2898 = vmatprep.subr.bf16.mxu0 %v3162_v2 }
 0xf92   : > { %2899 = vmatpush3.bf16.msra.mxu0 %v3163_v4 }
 0xf93   : > { %2900 = vmatprep.subr.bf16.mxu0 %v3164_v5 }
 0xf96   : > { %2901 = vmatpush3.bf16.msra.mxu0 %v3165_v17 }
0x104c   : > { %v2098_v25 = vpop.f32.mrb[48].mxu0 }
0x104d   : > { %v2099_v26 = vadd.f32 %v2734_v24, %v2098_v25  ;;  %v3042_v27 = vpop.f32.mrb[49].mxu0 }
0x104e   : > { %v2101_v28 = vpop.f32.mrb[50].mxu0 }
0x104f   : > { %v3043_v29 = vpop.f32.mrb[51].mxu0  ;;  %v2104_v30 = vadd.f32 %v2099_v26, %v3656_v23  ;;  %v3147_v23 = vld [vmem:[%s3936_s7 + $0x30] ss:$8 sps:$4 sm:$0xff]  }
0x1050   : > { %2181 = vmatpush1.bf16.msra.mxu1 %v3147_v23  ;;  %v2805_v23 = vld [vmem:[%s3941_s12 + $0x1] ss:$0 sm:$0xff] }
0x1051   : > { %v2109_v31 = vsel %vm570_vm1, %v2104_v30, 0.0  ;;  %3044 = vmatprep.subr.bf16.mxu1 %v3278_v1 }
0x1052   : > { %2110 = vadd.xlane.f32.xlu0 %v2109_v31  ;;  %v3166_v31 = vld [vmem:[%s3942_s13] sm:$0xff]  }
0x10df   : > { %v2111_v32 = vpop.xlane.xlu0 %2110 }
0x10e0   : > { %v2112_v33 = vmul.f32 0.03125, %v2111_v32  ;;  %v3167_v32 = vld [vmem:[%s3942_s13 + $0x8] sm:$0xff]  }
0x10e2   : > { %v2113_v34 = vsub.f32 %v2104_v30, %v2112_v33 }
0x10e4   : > { %v2114_v35 = vmul.f32 %v2113_v34, %v2113_v34 }
0x10e6   : > { %v2115_v38 = vsel %vm570_vm1, %v2114_v35, 0.0 }
0x10e7   : > { %2116 = vadd.xlane.f32.xlu1 %v2115_v38 }
0x1174   : > { %v2117_v55 = vpop.xlane.xlu1 %2116 }
0x1175   : > { %v2118_v56 = vmul.f32 0.03125, %v2117_v55 }
0x1177   : > { %v2119_v57 = vadd.f32 1e-05, %v2118_v56 }
0x1179   : > { %3208 = vrsqrt.f32 %v2119_v57 }
0x1183   : > { %v3209_v58 = vpop.eup %3208 }
0x1184   : > { %v2121_v60 = vmul.f32 %v3209_v58, %v2113_v34 }
0x1186   : > { %v2128_v62 = vmul.f32 %v2740_v59, %v2121_v60 }
0x1188   : > { %v2135_v63 = vadd.f32 %v2741_v61, %v2128_v62 }
0x118a   : > { %v2136_v0 = vpack.c.bf16 %v2135_v63, %v2135_v63 }
0x118c   : > { %2751 = vmatmul.mubr.msk.bf16.vlgmr.msra.gmra.mrb[36].mxu1 %vm570_vm1, %v2136_v0 }
0x118d   : > { %3048 = vmatprep.mubr.msk.bf16.mxu1 %vm3279_vm0, %v3278_v1  ;;  %3045 = vmatpush3.bf16.msra.mxu1 %v3166_v31 }
0x118e   : > { %3046 = vmatprep.subr.bf16.mxu1 %v3278_v1 }
0x1191   : > { %3047 = vmatpush3.bf16.msra.mxu1 %v3167_v32 }
0x1192   : > { %3052 = vmatprep.subr.bf16.mxu1 %v3278_v1 }
0x125f   : > { %v2212_v9 = vpop.f32.mrb[36].mxu1 }
0x1260   : > { %v2213_v10 = vadd.f32 %v2212_v9, %v2148_v7  ;;  %v2214_v11 = vpop.f32.mrb[37].mxu1 }
0x1261   : > { %v2215_v12 = vadd.f32 %v2214_v11, %v2152_v8  ;;  %v2216_v13 = vpop.f32.mrb[38].mxu1 }
0x1262   : > { %v2219_v3 = vmax.f32 %v2213_v10, 0.0  ;;  %v2217_v14 = vpop.f32.mrb[39].mxu1 }
0x1263   : > { %v2220_v18 = vmax.f32 %v2215_v12, 0.0 }
0x1264   : > { %v2221_v21 = vpack.c.bf16 %v2219_v3, %v2219_v3 }
0x1265   : > { %v2222_v20 = vpack.c.bf16 %v2220_v18, %v2220_v18 }
0x1267   : > { %2392 = vmatprep.mubr.bf16.mxu0 %v2222_v20 }
0x1268   : > { %2393 = vmatmul.mubr.bf16.vlgmr.msra.gmra.mrb[52].mxu0 %v2221_v21 }
0x133b   : > { %v2902_v22 = vpop.f32.mrb[52].mxu0 }
0x133c   : > { %v2903_v19 = vpop.f32.mrb[53].mxu0 }
0x133d   : > { %v2904_v43 = vadd.f32 %v2903_v19, %v2902_v22  ;;  %v2905_v46 = vpop.f32.mrb[54].mxu0 }
0x133e   : > { %v2906_v15 = vpop.f32.mrb[55].mxu0 }
0x133f   : > { %v2395_v16 = vadd.f32 %v2904_v43, %v2785_v44 }
0x1341   : > { %v2400_v24 = vadd.f32 %v2395_v16, %v2135_v63 }
0x1343   : > { %v2405_v25 = vsel %vm570_vm1, %v2400_v24, 0.0 }
0x1344   : > { %2406 = vadd.xlane.f32.xlu0 %v2405_v25 }
0x13d1   : > { %v2407_v26 = vpop.xlane.xlu0 %2406 }
0x13d2   : > { %v2408_v27 = vmul.f32 0.03125, %v2407_v26 }
0x13d4   : > { %v2409_v28 = vsub.f32 %v2400_v24, %v2408_v27 }
0x13d6   : > { %v2410_v29 = vmul.f32 %v2409_v28, %v2409_v28 }
0x13d8   : > { %v2411_v30 = vsel %vm570_vm1, %v2410_v29, 0.0 }
0x13d9   : > { %2412 = vadd.xlane.f32.xlu0 %v2411_v30 }
0x1466   : > { %v2413_v33 = vpop.xlane.xlu0 %2412 }
0x1467   : > { %v2414_v34 = vmul.f32 0.03125, %v2413_v33 }
0x1469   : > { %v2415_v35 = vadd.f32 1e-05, %v2414_v34 }
0x146b   : > { %3210 = vrsqrt.f32 %v2415_v35 }
0x1475   : > { %v3211_v38 = vpop.eup %3210 }
0x1476   : > { %v2417_v40 = vmul.f32 %v3211_v38, %v2409_v28 }
0x1478   : > { %v2424_v41 = vmul.f32 %v2804_v39, %v2417_v40 }
0x147a   : > { %v2431_v42 = vadd.f32 %v2805_v23, %v2424_v41 }
0x147c   : > { %v2432_v47 = vpack.c.bf16 %v2431_v42, %v2431_v42 }
0x147e   : > { %3049 = vmatmul.mubr.msk.bf16.vlgmr.msra.gmra.mrb[40].mxu1 %vm570_vm1, %v2432_v47 }
0x147f   : > { %3053 = vmatpush3.bf16.msra.mxu1 %v3168_v45  ;;  %3060 = vmatprep.mubr.msk.bf16.mxu1 %vm3279_vm0, %v3278_v1 }
0x1480   : > { %3054 = vmatprep.subr.bf16.mxu1 %v3278_v1 }
0x1483   : > { %3055 = vmatpush3.bf16.msra.mxu1 %v3169_v48 }
0x1484   : > { %3056 = vmatprep.subr.bf16.mxu1 %v3278_v1 }
0x1487   : > { %3057 = vmatpush3.bf16.msra.mxu1 %v3170_v49 }
0x1488   : > { %3058 = vmatprep.subr.bf16.mxu1 %v3278_v1  ;;  %v2810_v1 = vld [vmem:[%s3945_s16] ss:$0 sm:$0xff] }
0x148b   : > { %3059 = vmatpush3.bf16.msra.mxu1 %v3171_v50 }
0x1551   : > { %v2493_v37 = vpop.f32.mrb[40].mxu1 }
0x1552   : > { %v2494_v51 = vadd.f32 %v2806_v36, %v2493_v37  ;;  %v3050_v52 = vpop.f32.mrb[41].mxu1 }
0x1553   : > { %v2496_v53 = vpop.f32.mrb[42].mxu1 }
0x1554   : > { %v2499_v54 = vmax.f32 %v2494_v51, 0.0  ;;  %v3051_v55 = vpop.f32.mrb[43].mxu1 }
0x1556   : > { %v2500_v56 = vpack.c.bf16 %v2499_v54, %v2499_v54 }
0x1558   : > { %3061 = vmatmul.mubr.msk.bf16.vlgmr.msra.gmra.mrb[44].mxu1 %vm2540_vm6, %v2500_v56 }
0x162b   : > { %v2578_v57 = vpop.f32.mrb[44].mxu1 }
0x162c   : > { %v2579_v58 = vadd.f32 %v2810_v1, %v2578_v57  ;;  %v3062_v59 = vpop.f32.mrb[45].mxu1 }
0x162d   : > { %v2581_v60 = vpop.f32.mrb[46].mxu1 }
0x162e   : > { %v3063_v61 = vpop.f32.mrb[47].mxu1  ;;  %v2584_v62 = vmul.f32 %v2579_v58, %v2579_v58 }
0x1630   : > { %2585 = vadd.xlane.f32.xlu1 %v2584_v62 }
0x16bd   : > { %v2586_v63 = vpop.xlane.xlu1 %2585 }
0x16be   : > { %v2587_v0 = vmax.f32 %v2586_v63, 1e-24 }
0x16c0   : > { %3212 = vrsqrt.f32 %v2587_v0 }
0x16ca   : > { %v3213_v2 = vpop.eup %3212 }
0x16cb   : > { %v2589_v4 = vmul.f32 %v3213_v2, %v2579_v58 }
0x16cd   : > { %2590 = vst [vmem:[%s539_s22] sm:$0xff] %v2589_v4 }
0x16ce   : > { %3227 = shalt.err (!%p3224_p3)
}
0x16cf   : > { %s3228_s21 = scalar_lea.hbm %s3887_s20, 128  ;;  %s3232_s19 = scalar_lea.hbm %s3946_s17, 256 }
0x16d0   : > { %p3229_p4 = scmp.ne.s32.totalorder %s3887_s20, %s3228_s21  ;;  %p3233_p9 = scmp.lt.u32.totalorder %s3887_s20, %s3946_s17 }
0x16d1   : > { %p3234_p10 = scmp.lt.u32.totalorder %s3232_s19, %s3228_s21  ;;  %p3236_p12 = scmp.lt.u32.totalorder %s3228_s21, %s3887_s20 }
0x16d2   : > { %p3230_p7 = pnand %p3229_p4, %p3418_p5 }
0x16d3   : > { %p3235_p11 = por %p3234_p10, %p3233_p9 }
0x16d4   : > { %p3231_p8 = pneg %p3230_p7 }
0x16d5   : > { %p3237_p13 = por %p3236_p12, %p3235_p11 }
0x16d7   : > { %p3238_p0 = pnand %p3237_p13, %p3231_p8 }
0x16d9   : > { %3241 = shalt.err (!%p3238_p0)
}
0x16da   : > { %3064 = dma.vmem_to_hbm [thread:$0]  (%p3418_p5), %s3889_s0, 128, %s3887_s20, %s2592_s30  }
0x16db PF: > { %s3987_s2 = sld [smem:[#allocation5_spill]]  ;;  %p3070_p1 = scmp.ge.s32.totalorder %s3276_s27, 2 }
0x16dd   : > { %p3067_p2 = pnand %p3070_p1, %p3422_p6 }
0x16e1   : > { %s2617_s29 = sand.u32 1, %s3987_s2  }
0x16e2   : > { %s2618_s18 = scalar_lea.sflag [#allocation3], %s2617_s29 }
0x16e3   : > { %3259 = dma.done.wait (!%p3067_p2), %s2618_s18, 128  }
0x16e4   : > { %3261 = vsyncadd (!%p3067_p2), %s2618_s18, 4294967168  ;;  %s3989_s27 = sld [smem:[#allocation7_spill]]  ;;  %s3990_s21 = sld [smem:[#allocation6_spill]] }
0x16e5   : > { %s3991_s26 = sld [smem:[#allocation8_spill]]  ;;  %s3992_s24 = smov %s3268_s25 }
0x16ea   : > { %p27_p3 = scmp.ge.s32.totalorder %s3989_s27, 4   ;;  %s3993_s25 = smov %s3990_s21 }
0x16ec   :  { %29 = sbr.rel (!%p27_p3) target bundleno = 7 (0x7), region = 135 }
0x16f3   :  { %2623 = vsyncpa [#allocation3], 1 }
0x16f4   :  { %2625 = vsyncpa [#allocation3 + $0x1], 1 }

</bundles_post_ra>
